<compile_context>
chip_gen: v5e
topology: v5e:2x2
jax: 0.10.0
libtpu: 0.0.40
codegen_flags: <defaults>
</compile_context>

<pallas_src>
import functools

import numpy as np

import jax
import jax.numpy as jnp
from jax.experimental import pallas as pl
from jax.experimental.pallas import tpu as pltpu


# ----------------------------------------------------------------------------
# Fused Pallas kernel
# ----------------------------------------------------------------------------
def _cbam_kernel(x_ref, w1t_ref, w2_ref, wsa_ref, cmask_ref, out_ref,
                 *, nb, C, HW, W, k, pad, Ch, S):
    """One grid step = `nb` batch items.

    x_ref    : (nb, C, HW)   activation block (any float dtype; compute in f32)
    w1t_ref  : (C, Ch)       first FC weight, transposed  (Conv2d(C, C//r, 1))
    w2_ref   : (C, Ch)       second FC weight             (Conv2d(C//r, C, 1))
    wsa_ref  : (2*k*k,)      spatial conv weight, flat, in SMEM (scalar reads)
    cmask_ref: (k, HW)       0/1 column-validity mask per horizontal tap offset
    out_ref  : (nb, C, HW)   final gated output
    """
    w1t = w1t_ref[...].astype(jnp.float32)        # (C, Ch)
    w2 = w2_ref[...].astype(jnp.float32)          # (C, Ch)
    cmask = cmask_ref[...]                        # (k, HW), float32 {0,1}
    kk = k * k

    for b in range(nb):                           # static, small unroll
        x = x_ref[b].astype(jnp.float32)          # (C, HW), lane-dense

        # ---- ChannelAttention: global avg/max pool + shared 2-layer FC (VPU) ----
        s_avg = jnp.mean(x, axis=1, keepdims=True)            # (C, 1)
        s_max = jnp.max(x, axis=1, keepdims=True)             # (C, 1)
        s = jnp.concatenate([s_avg, s_max], axis=1)           # (C, 2): [avg | max]

        # y = w2 @ relu(w1 @ s); done as Ch rank-1 updates on the VPU (no tiny MXU op).
        y = jnp.zeros((C, 2), jnp.float32)
        for i in range(Ch):
            hi = jnp.sum(w1t[:, i:i + 1] * s, axis=0, keepdims=True)   # (1, 2)
            hi = jnp.maximum(hi, 0.0)                                  # ReLU
            y = y + w2[:, i:i + 1] * hi                                # (C, 2)
        ch_gate = jax.nn.sigmoid(y[:, 0:1] + y[:, 1:2])                # (C, 1)
        xc = x * ch_gate                                               # channel-gated x

        # ---- SpatialAttention: channel-wise mean/max + 7x7 conv in flat lane space --
        cavg = jnp.mean(xc, axis=0, keepdims=True)                     # (1, HW)
        cmax = jnp.max(xc, axis=0, keepdims=True)                      # (1, HW)
        p = jnp.concatenate([cavg, cmax], axis=0)                      # (2, HW)

        # Zero-extend the flat map by S = pad*W + pad on both sides; a tap at spatial
        # offset (oy, ox) is then the static window  pflat[:, S + oy*W + ox : ... + HW].
        # Row out-of-range -> lands in the zero pad; column wrap -> killed by cmask.
        zpad = jnp.zeros((2, S), jnp.float32)
        pflat = jnp.concatenate([zpad, p, zpad], axis=1)               # (2, HW + 2S)

        logits = jnp.zeros((1, HW), jnp.float32)
        for dy in range(k):
            oy = dy - pad
            for dx in range(k):
                ox = dx - pad
                off = S + oy * W + ox
                win = pflat[:, off:off + HW]                           # (2, HW)
                t = dy * k + dx
                contrib = (wsa_ref[t] * win[0:1, :]
                           + wsa_ref[kk + t] * win[1:2, :])            # (1, HW)
                if dx != pad:                                          # ox != 0 -> mask
                    contrib = contrib * cmask[dx:dx + 1, :]
                logits = logits + contrib
        sp_gate = jax.nn.sigmoid(logits)                               # (1, HW)

        out_ref[b] = (xc * sp_gate).astype(out_ref.dtype)


# ----------------------------------------------------------------------------
# Forward pass
# ----------------------------------------------------------------------------
def cbam_forward(params, x, *, max_items_per_block=8, target_block_bytes=2 << 20):
    N, C, H, W = x.shape
    HW = H * W
    w1 = params['w1']          # (C//r, C)     <- Conv2d(C, C//r, 1, bias=False)
    w2 = params['w2']          # (C, C//r)     <- Conv2d(C//r, C, 1, bias=False)
    w_sa = params['w_sa']      # (1, 2, k, k)  <- Conv2d(2, 1, k, bias=False)
    Ch = w1.shape[0]
    k = w_sa.shape[-1]
    pad = k // 2
    S = pad * W + pad          # max |flat shift| of any conv tap

    # ---- batch packing: bigger blocks amortize per-step overhead; keep >=2 grid
    #      steps when N allows so the BlockSpec pipeline has something to overlap,
    #      and cap the in-kernel unroll.
    item_bytes = C * HW * x.dtype.itemsize
    nb = int(max(1, min(max_items_per_block, N, target_block_bytes // max(item_bytes, 1))))
    while nb > 1 and (N % nb != 0 or N // nb < 2):
        nb -= 1
    grid = (N // nb,)

    x2 = x.reshape(N, C, HW)
    w1t = jnp.asarray(w1, jnp.float32).T                 # (C, Ch)
    w2f = jnp.asarray(w2, jnp.float32)                   # (C, Ch)
    w_flat = jnp.asarray(w_sa, jnp.float32).reshape(-1)  # (2*k*k,) -> SMEM scalars

    # Host-precomputed per-column validity mask for each horizontal tap offset ox=dx-pad
    # (kills the column-wrap terms of the flat-shifted windows). Tiny constant.
    xx = np.arange(HW) % W
    colmask = np.stack(
        [((xx + (dx - pad) >= 0) & (xx + (dx - pad) < W)).astype(np.float32)
         for dx in range(k)], axis=0)                    # (k, HW)
    colmask = jnp.asarray(colmask)

    kernel = functools.partial(_cbam_kernel, nb=nb, C=C, HW=HW, W=W,
                               k=k, pad=pad, Ch=Ch, S=S)

    out = pl.pallas_call(
        kernel,
        grid=grid,
        in_specs=[
            pl.BlockSpec((nb, C, HW), lambda n: (n, 0, 0)),
            pl.BlockSpec((C, Ch), lambda n: (0, 0)),
            pl.BlockSpec((C, Ch), lambda n: (0, 0)),
            pl.BlockSpec(memory_space=pltpu.MemorySpace.SMEM),   # conv weights as scalars
            pl.BlockSpec((k, HW), lambda n: (0, 0)),
        ],
        out_specs=pl.BlockSpec((nb, C, HW), lambda n: (n, 0, 0)),
        out_shape=jax.ShapeDtypeStruct((N, C, HW), x.dtype),
        compiler_params=pltpu.CompilerParams(
            dimension_semantics=("parallel",),
            vmem_limit_bytes=32 * 1024 * 1024,
        ),
    )(x2, w1t, w2f, w_flat, colmask)

    return out.reshape(N, C, H, W)


# ----------------------------------------------------------------------------
# Pure-JAX reference (PyTorch semantics) for the correctness check
# ----------------------------------------------------------------------------
def cbam_reference(params, x):
    w1, w2, w_sa = params['w1'], params['w2'], params['w_sa']
    avg = jnp.mean(x, axis=(2, 3))                       # (N, C)
    mx = jnp.max(x, axis=(2, 3))                         # (N, C)

    def fc(v):
        return jnp.maximum(v @ w1.T, 0.0) @ w2.T

    ch = jax.nn.sigmoid(fc(avg) + fc(mx))[:, :, None, None]
    xc = x * ch
    sp = jnp.stack([jnp.mean(xc, axis=1), jnp.max(xc, axis=1)], axis=1)  # (N,2,H,W)
    k = w_sa.shape[-1]
    logits = jax.lax.conv_general_dilated(
        sp, w_sa, window_strides=(1, 1),
        padding=((k // 2, k // 2), (k // 2, k // 2)),
        dimension_numbers=('NCHW', 'OIHW', 'NCHW'))
    return xc * jax.nn.sigmoid(logits)


# ----------------------------------------------------------------------------
if __name__ == "__main__":
    # ChannelAttention uses r=16, so input_dim must be >= 16; use C=32 (Ch=2).
    N, C, H, W = 2, 32, 16, 16
    r = 16
    Ch = C // r
    k = 7

    key = jax.random.PRNGKey(0)
    k_x, k_w1, k_w2, k_ws = jax.random.split(key, 4)
    params = {
        'w1': jax.random.normal(k_w1, (Ch, C), jnp.float32) * 0.1,         # Conv2d(C, C//r, 1)
        'w2': jax.random.normal(k_w2, (C, Ch), jnp.float32) * 0.1,         # Conv2d(C//r, C, 1)
        'w_sa': jax.random.normal(k_ws, (1, 2, k, k), jnp.float32) * 0.1,  # Conv2d(2, 1, 7)
    }
    x = jax.random.normal(k_x, (N, C, H, W), jnp.float32)

    # --- float32 path: exact module semantics -------------------------------
    fwd = jax.jit(lambda inp: cbam_forward(params, inp))
    y = fwd(x)
    jax.block_until_ready(y)
    assert y.shape == (N, C, H, W), y.shape
    assert bool(jnp.all(jnp.isfinite(y)))
    y_ref = cbam_reference(params, x)
    err = float(jnp.max(jnp.abs(y - y_ref)))
    assert err < 1e-4, f"max abs error vs reference (f32): {err}"

    # --- bfloat16 HBM storage path (f32 accumulation in-kernel) -------------
    xb = x.astype(jnp.bfloat16)
    yb = jax.jit(lambda inp: cbam_forward(params, inp))(xb)
    jax.block_until_ready(yb)
    assert yb.dtype == jnp.bfloat16
    y_ref_b = cbam_reference(params, xb.astype(jnp.float32))
    err_b = float(jnp.max(jnp.abs(yb.astype(jnp.float32) - y_ref_b)))
    assert err_b < 1e-1, f"max abs error vs reference (bf16 storage): {err_b}"

    print("KERNEL_OK")
</pallas_src>

<mosaic_0001>
module attributes {stable_mosaic.version = 11 : i64} {
  func.func @_cbam_kernel(%arg0: i32, %arg1: memref<1x32x256xf32, #tpu.memory_space<vmem>>, %arg2: memref<32x2xf32, #tpu.memory_space<vmem>>, %arg3: memref<32x2xf32, #tpu.memory_space<vmem>>, %arg4: memref<98xf32, #tpu.memory_space<smem>>, %arg5: memref<7x256xf32, #tpu.memory_space<vmem>>, %arg6: memref<1x32x256xf32, #tpu.memory_space<vmem>>) attributes {dimension_semantics = [#tpu.dimension_semantics<parallel>], iteration_bounds = array<i64: 2>, scalar_prefetch = 0 : i64, scratch_operands = 0 : i64, tpu.core_type = #tpu.core_type<tc>, window_params = [{transform_indices = @transform_0, window_bounds = array<i64: 1, 32, 256>}, {pipeline_mode = #tpu.pipeline_mode<synchronous>, transform_indices = @transform_1, window_bounds = array<i64: 32, 2>}, {pipeline_mode = #tpu.pipeline_mode<synchronous>, transform_indices = @transform_2, window_bounds = array<i64: 32, 2>}, {transform_indices = @transform_3, window_bounds = array<i64: 98>}, {pipeline_mode = #tpu.pipeline_mode<synchronous>, transform_indices = @transform_4, window_bounds = array<i64: 7, 256>}, {transform_indices = @transform_5, window_bounds = array<i64: 1, 32, 256>}]} {
    %c0 = arith.constant 0 : index
    %c0_0 = arith.constant 0 : index
    %0 = vector.load %arg2[%c0, %c0_0] : memref<32x2xf32, #tpu.memory_space<vmem>>, vector<32x2xf32>
    %c0_1 = arith.constant 0 : index
    %c0_2 = arith.constant 0 : index
    %1 = vector.load %arg3[%c0_1, %c0_2] : memref<32x2xf32, #tpu.memory_space<vmem>>, vector<32x2xf32>
    %c0_3 = arith.constant 0 : index
    %c0_4 = arith.constant 0 : index
    %2 = vector.load %arg5[%c0_3, %c0_4] : memref<7x256xf32, #tpu.memory_space<vmem>>, vector<7x256xf32>
    %c0_5 = arith.constant 0 : index
    %c0_6 = arith.constant 0 : index
    %c0_7 = arith.constant 0 : index
    %3 = vector.load %arg1[%c0_5, %c0_6, %c0_7] : memref<1x32x256xf32, #tpu.memory_space<vmem>>, vector<1x32x256xf32>
    %4 = vector.shape_cast %3 : vector<1x32x256xf32> to vector<32x256xf32>
    %cst = arith.constant dense<0.000000e+00> : vector<32xf32>
    %5 = vector.multi_reduction <add>, %4, %cst [1] : vector<32x256xf32> to vector<32xf32>
    %6 = vector.shape_cast %5 : vector<32xf32> to vector<32x1xf32>
    %cst_8 = arith.constant 2.560000e+02 : f32
    %7 = vector.broadcast %cst_8 : f32 to vector<32x1xf32>
    %8 = arith.divf %6, %7 : vector<32x1xf32>
    %cst_9 = arith.constant dense<0xFF800000> : vector<32xf32>
    %9 = vector.multi_reduction <maximumf>, %4, %cst_9 [1] : vector<32x256xf32> to vector<32xf32>
    %10 = vector.shape_cast %9 : vector<32xf32> to vector<32x1xf32>
    %11 = tpu.concatenate %8, %10 in 1 : vector<32x1xf32>, vector<32x1xf32> -> vector<32x2xf32>
    %cst_10 = arith.constant 0.000000e+00 : f32
    %12 = vector.broadcast %cst_10 : f32 to vector<32x2xf32>
    %13 = vector.extract_strided_slice %0 {offsets = [0, 0], sizes = [32, 1], strides = [1, 1]} : vector<32x2xf32> to vector<32x1xf32>
    %14 = vector.broadcast %13 : vector<32x1xf32> to vector<32x2xf32>
    %15 = arith.mulf %14, %11 : vector<32x2xf32>
    %cst_11 = arith.constant dense<0.000000e+00> : vector<2xf32>
    %16 = vector.multi_reduction <add>, %15, %cst_11 [0] : vector<32x2xf32> to vector<2xf32>
    %17 = vector.shape_cast %16 : vector<2xf32> to vector<1x2xf32>
    %cst_12 = arith.constant 0.000000e+00 : f32
    %18 = vector.broadcast %cst_12 : f32 to vector<1x2xf32>
    %19 = arith.maximumf %17, %18 : vector<1x2xf32>
    %20 = vector.extract_strided_slice %1 {offsets = [0, 0], sizes = [32, 1], strides = [1, 1]} : vector<32x2xf32> to vector<32x1xf32>
    %21 = vector.broadcast %20 : vector<32x1xf32> to vector<32x2xf32>
    %22 = vector.broadcast %19 : vector<1x2xf32> to vector<32x2xf32>
    %23 = arith.mulf %21, %22 : vector<32x2xf32>
    %24 = arith.addf %12, %23 : vector<32x2xf32>
    %25 = vector.extract_strided_slice %0 {offsets = [0, 1], sizes = [32, 1], strides = [1, 1]} : vector<32x2xf32> to vector<32x1xf32>
    %26 = vector.broadcast %25 : vector<32x1xf32> to vector<32x2xf32>
    %27 = arith.mulf %26, %11 : vector<32x2xf32>
    %cst_13 = arith.constant dense<0.000000e+00> : vector<2xf32>
    %28 = vector.multi_reduction <add>, %27, %cst_13 [0] : vector<32x2xf32> to vector<2xf32>
    %29 = vector.shape_cast %28 : vector<2xf32> to vector<1x2xf32>
    %cst_14 = arith.constant 0.000000e+00 : f32
    %30 = vector.broadcast %cst_14 : f32 to vector<1x2xf32>
    %31 = arith.maximumf %29, %30 : vector<1x2xf32>
    %32 = vector.extract_strided_slice %1 {offsets = [0, 1], sizes = [32, 1], strides = [1, 1]} : vector<32x2xf32> to vector<32x1xf32>
    %33 = vector.broadcast %32 : vector<32x1xf32> to vector<32x2xf32>
    %34 = vector.broadcast %31 : vector<1x2xf32> to vector<32x2xf32>
    %35 = arith.mulf %33, %34 : vector<32x2xf32>
    %36 = arith.addf %24, %35 : vector<32x2xf32>
    %37 = vector.extract_strided_slice %36 {offsets = [0, 0], sizes = [32, 1], strides = [1, 1]} : vector<32x2xf32> to vector<32x1xf32>
    %38 = vector.extract_strided_slice %36 {offsets = [0, 1], sizes = [32, 1], strides = [1, 1]} : vector<32x2xf32> to vector<32x1xf32>
    %39 = arith.addf %37, %38 : vector<32x1xf32>
    %40 = arith.negf %39 : vector<32x1xf32>
    %41 = math.exp %40 : vector<32x1xf32>
    %cst_15 = arith.constant 1.000000e+00 : f32
    %42 = vector.broadcast %cst_15 : f32 to vector<32x1xf32>
    %43 = arith.addf %42, %41 : vector<32x1xf32>
    %44 = arith.divf %42, %43 : vector<32x1xf32>
    %45 = vector.broadcast %44 : vector<32x1xf32> to vector<32x256xf32>
    %46 = arith.mulf %4, %45 : vector<32x256xf32>
    %cst_16 = arith.constant dense<0.000000e+00> : vector<256xf32>
    %47 = vector.multi_reduction <add>, %46, %cst_16 [0] : vector<32x256xf32> to vector<256xf32>
    %48 = vector.shape_cast %47 : vector<256xf32> to vector<1x256xf32>
    %cst_17 = arith.constant 3.200000e+01 : f32
    %49 = vector.broadcast %cst_17 : f32 to vector<1x256xf32>
    %50 = arith.divf %48, %49 : vector<1x256xf32>
    %cst_18 = arith.constant dense<0xFF800000> : vector<256xf32>
    %51 = vector.multi_reduction <maximumf>, %46, %cst_18 [0] : vector<32x256xf32> to vector<256xf32>
    %52 = vector.shape_cast %51 : vector<256xf32> to vector<1x256xf32>
    %53 = tpu.concatenate %50, %52 in 0 : vector<1x256xf32>, vector<1x256xf32> -> vector<2x256xf32>
    %cst_19 = arith.constant 0.000000e+00 : f32
    %54 = vector.broadcast %cst_19 : f32 to vector<2x51xf32>
    %55 = tpu.concatenate %54, %53, %54 in 1 : vector<2x51xf32>, vector<2x256xf32>, vector<2x51xf32> -> vector<2x358xf32>
    %cst_20 = arith.constant 0.000000e+00 : f32
    %56 = vector.broadcast %cst_20 : f32 to vector<1x256xf32>
    %57 = vector.extract_strided_slice %55 {offsets = [0, 0], sizes = [2, 256], strides = [1, 1]} : vector<2x358xf32> to vector<2x256xf32>
    %c0_21 = arith.constant 0 : index
    %58 = memref.load %arg4[%c0_21] : memref<98xf32, #tpu.memory_space<smem>>
    %59 = vector.extract_strided_slice %57 {offsets = [0, 0], sizes = [1, 256], strides = [1, 1]} : vector<2x256xf32> to vector<1x256xf32>
    %60 = vector.broadcast %58 : f32 to vector<1x256xf32>
    %61 = arith.mulf %60, %59 : vector<1x256xf32>
    %c49 = arith.constant 49 : index
    %62 = memref.load %arg4[%c49] : memref<98xf32, #tpu.memory_space<smem>>
    %63 = vector.extract_strided_slice %57 {offsets = [1, 0], sizes = [1, 256], strides = [1, 1]} : vector<2x256xf32> to vector<1x256xf32>
    %64 = vector.broadcast %62 : f32 to vector<1x256xf32>
    %65 = arith.mulf %64, %63 : vector<1x256xf32>
    %66 = arith.addf %61, %65 : vector<1x256xf32>
    %67 = vector.extract_strided_slice %2 {offsets = [0, 0], sizes = [1, 256], strides = [1, 1]} : vector<7x256xf32> to vector<1x256xf32>
    %68 = arith.mulf %66, %67 : vector<1x256xf32>
    %69 = arith.addf %56, %68 : vector<1x256xf32>
    %70 = vector.extract_strided_slice %55 {offsets = [0, 1], sizes = [2, 256], strides = [1, 1]} : vector<2x358xf32> to vector<2x256xf32>
    %c1 = arith.constant 1 : index
    %71 = memref.load %arg4[%c1] : memref<98xf32, #tpu.memory_space<smem>>
    %72 = vector.extract_strided_slice %70 {offsets = [0, 0], sizes = [1, 256], strides = [1, 1]} : vector<2x256xf32> to vector<1x256xf32>
    %73 = vector.broadcast %71 : f32 to vector<1x256xf32>
    %74 = arith.mulf %73, %72 : vector<1x256xf32>
    %c50 = arith.constant 50 : index
    %75 = memref.load %arg4[%c50] : memref<98xf32, #tpu.memory_space<smem>>
    %76 = vector.extract_strided_slice %70 {offsets = [1, 0], sizes = [1, 256], strides = [1, 1]} : vector<2x256xf32> to vector<1x256xf32>
    %77 = vector.broadcast %75 : f32 to vector<1x256xf32>
    %78 = arith.mulf %77, %76 : vector<1x256xf32>
    %79 = arith.addf %74, %78 : vector<1x256xf32>
    %80 = vector.extract_strided_slice %2 {offsets = [1, 0], sizes = [1, 256], strides = [1, 1]} : vector<7x256xf32> to vector<1x256xf32>
    %81 = arith.mulf %79, %80 : vector<1x256xf32>
    %82 = arith.addf %69, %81 : vector<1x256xf32>
    %83 = vector.extract_strided_slice %55 {offsets = [0, 2], sizes = [2, 256], strides = [1, 1]} : vector<2x358xf32> to vector<2x256xf32>
    %c2 = arith.constant 2 : index
    %84 = memref.load %arg4[%c2] : memref<98xf32, #tpu.memory_space<smem>>
    %85 = vector.extract_strided_slice %83 {offsets = [0, 0], sizes = [1, 256], strides = [1, 1]} : vector<2x256xf32> to vector<1x256xf32>
    %86 = vector.broadcast %84 : f32 to vector<1x256xf32>
    %87 = arith.mulf %86, %85 : vector<1x256xf32>
    %c51 = arith.constant 51 : index
    %88 = memref.load %arg4[%c51] : memref<98xf32, #tpu.memory_space<smem>>
    %89 = vector.extract_strided_slice %83 {offsets = [1, 0], sizes = [1, 256], strides = [1, 1]} : vector<2x256xf32> to vector<1x256xf32>
    %90 = vector.broadcast %88 : f32 to vector<1x256xf32>
    %91 = arith.mulf %90, %89 : vector<1x256xf32>
    %92 = arith.addf %87, %91 : vector<1x256xf32>
    %93 = vector.extract_strided_slice %2 {offsets = [2, 0], sizes = [1, 256], strides = [1, 1]} : vector<7x256xf32> to vector<1x256xf32>
    %94 = arith.mulf %92, %93 : vector<1x256xf32>
    %95 = arith.addf %82, %94 : vector<1x256xf32>
    %96 = vector.extract_strided_slice %55 {offsets = [0, 3], sizes = [2, 256], strides = [1, 1]} : vector<2x358xf32> to vector<2x256xf32>
    %c3 = arith.constant 3 : index
    %97 = memref.load %arg4[%c3] : memref<98xf32, #tpu.memory_space<smem>>
    %98 = vector.extract_strided_slice %96 {offsets = [0, 0], sizes = [1, 256], strides = [1, 1]} : vector<2x256xf32> to vector<1x256xf32>
    %99 = vector.broadcast %97 : f32 to vector<1x256xf32>
    %100 = arith.mulf %99, %98 : vector<1x256xf32>
    %c52 = arith.constant 52 : index
    %101 = memref.load %arg4[%c52] : memref<98xf32, #tpu.memory_space<smem>>
    %102 = vector.extract_strided_slice %96 {offsets = [1, 0], sizes = [1, 256], strides = [1, 1]} : vector<2x256xf32> to vector<1x256xf32>
    %103 = vector.broadcast %101 : f32 to vector<1x256xf32>
    %104 = arith.mulf %103, %102 : vector<1x256xf32>
    %105 = arith.addf %100, %104 : vector<1x256xf32>
    %106 = arith.addf %95, %105 : vector<1x256xf32>
    %107 = vector.extract_strided_slice %55 {offsets = [0, 4], sizes = [2, 256], strides = [1, 1]} : vector<2x358xf32> to vector<2x256xf32>
    %c4 = arith.constant 4 : index
    %108 = memref.load %arg4[%c4] : memref<98xf32, #tpu.memory_space<smem>>
    %109 = vector.extract_strided_slice %107 {offsets = [0, 0], sizes = [1, 256], strides = [1, 1]} : vector<2x256xf32> to vector<1x256xf32>
    %110 = vector.broadcast %108 : f32 to vector<1x256xf32>
    %111 = arith.mulf %110, %109 : vector<1x256xf32>
    %c53 = arith.constant 53 : index
    %112 = memref.load %arg4[%c53] : memref<98xf32, #tpu.memory_space<smem>>
    %113 = vector.extract_strided_slice %107 {offsets = [1, 0], sizes = [1, 256], strides = [1, 1]} : vector<2x256xf32> to vector<1x256xf32>
    %114 = vector.broadcast %112 : f32 to vector<1x256xf32>
    %115 = arith.mulf %114, %113 : vector<1x256xf32>
    %116 = arith.addf %111, %115 : vector<1x256xf32>
    %117 = vector.extract_strided_slice %2 {offsets = [4, 0], sizes = [1, 256], strides = [1, 1]} : vector<7x256xf32> to vector<1x256xf32>
    %118 = arith.mulf %116, %117 : vector<1x256xf32>
    %119 = arith.addf %106, %118 : vector<1x256xf32>
    %120 = vector.extract_strided_slice %55 {offsets = [0, 5], sizes = [2, 256], strides = [1, 1]} : vector<2x358xf32> to vector<2x256xf32>
    %c5 = arith.constant 5 : index
    %121 = memref.load %arg4[%c5] : memref<98xf32, #tpu.memory_space<smem>>
    %122 = vector.extract_strided_slice %120 {offsets = [0, 0], sizes = [1, 256], strides = [1, 1]} : vector<2x256xf32> to vector<1x256xf32>
    %123 = vector.broadcast %121 : f32 to vector<1x256xf32>
    %124 = arith.mulf %123, %122 : vector<1x256xf32>
    %c54 = arith.constant 54 : index
    %125 = memref.load %arg4[%c54] : memref<98xf32, #tpu.memory_space<smem>>
    %126 = vector.extract_strided_slice %120 {offsets = [1, 0], sizes = [1, 256], strides = [1, 1]} : vector<2x256xf32> to vector<1x256xf32>
    %127 = vector.broadcast %125 : f32 to vector<1x256xf32>
    %128 = arith.mulf %127, %126 : vector<1x256xf32>
    %129 = arith.addf %124, %128 : vector<1x256xf32>
    %130 = vector.extract_strided_slice %2 {offsets = [5, 0], sizes = [1, 256], strides = [1, 1]} : vector<7x256xf32> to vector<1x256xf32>
    %131 = arith.mulf %129, %130 : vector<1x256xf32>
    %132 = arith.addf %119, %131 : vector<1x256xf32>
    %133 = vector.extract_strided_slice %55 {offsets = [0, 6], sizes = [2, 256], strides = [1, 1]} : vector<2x358xf32> to vector<2x256xf32>
    %c6 = arith.constant 6 : index
    %134 = memref.load %arg4[%c6] : memref<98xf32, #tpu.memory_space<smem>>
    %135 = vector.extract_strided_slice %133 {offsets = [0, 0], sizes = [1, 256], strides = [1, 1]} : vector<2x256xf32> to vector<1x256xf32>
    %136 = vector.broadcast %134 : f32 to vector<1x256xf32>
    %137 = arith.mulf %136, %135 : vector<1x256xf32>
    %c55 = arith.constant 55 : index
    %138 = memref.load %arg4[%c55] : memref<98xf32, #tpu.memory_space<smem>>
    %139 = vector.extract_strided_slice %133 {offsets = [1, 0], sizes = [1, 256], strides = [1, 1]} : vector<2x256xf32> to vector<1x256xf32>
    %140 = vector.broadcast %138 : f32 to vector<1x256xf32>
    %141 = arith.mulf %140, %139 : vector<1x256xf32>
    %142 = arith.addf %137, %141 : vector<1x256xf32>
    %143 = vector.extract_strided_slice %2 {offsets = [6, 0], sizes = [1, 256], strides = [1, 1]} : vector<7x256xf32> to vector<1x256xf32>
    %144 = arith.mulf %142, %143 : vector<1x256xf32>
    %145 = arith.addf %132, %144 : vector<1x256xf32>
    %146 = vector.extract_strided_slice %55 {offsets = [0, 16], sizes = [2, 256], strides = [1, 1]} : vector<2x358xf32> to vector<2x256xf32>
    %c7 = arith.constant 7 : index
    %147 = memref.load %arg4[%c7] : memref<98xf32, #tpu.memory_space<smem>>
    %148 = vector.extract_strided_slice %146 {offsets = [0, 0], sizes = [1, 256], strides = [1, 1]} : vector<2x256xf32> to vector<1x256xf32>
    %149 = vector.broadcast %147 : f32 to vector<1x256xf32>
    %150 = arith.mulf %149, %148 : vector<1x256xf32>
    %c56 = arith.constant 56 : index
    %151 = memref.load %arg4[%c56] : memref<98xf32, #tpu.memory_space<smem>>
    %152 = vector.extract_strided_slice %146 {offsets = [1, 0], sizes = [1, 256], strides = [1, 1]} : vector<2x256xf32> to vector<1x256xf32>
    %153 = vector.broadcast %151 : f32 to vector<1x256xf32>
    %154 = arith.mulf %153, %152 : vector<1x256xf32>
    %155 = arith.addf %150, %154 : vector<1x256xf32>
    %156 = vector.extract_strided_slice %2 {offsets = [0, 0], sizes = [1, 256], strides = [1, 1]} : vector<7x256xf32> to vector<1x256xf32>
    %157 = arith.mulf %155, %156 : vector<1x256xf32>
    %158 = arith.addf %145, %157 : vector<1x256xf32>
    %159 = vector.extract_strided_slice %55 {offsets = [0, 17], sizes = [2, 256], strides = [1, 1]} : vector<2x358xf32> to vector<2x256xf32>
    %c8 = arith.constant 8 : index
    %160 = memref.load %arg4[%c8] : memref<98xf32, #tpu.memory_space<smem>>
    %161 = vector.extract_strided_slice %159 {offsets = [0, 0], sizes = [1, 256], strides = [1, 1]} : vector<2x256xf32> to vector<1x256xf32>
    %162 = vector.broadcast %160 : f32 to vector<1x256xf32>
    %163 = arith.mulf %162, %161 : vector<1x256xf32>
    %c57 = arith.constant 57 : index
    %164 = memref.load %arg4[%c57] : memref<98xf32, #tpu.memory_space<smem>>
    %165 = vector.extract_strided_slice %159 {offsets = [1, 0], sizes = [1, 256], strides = [1, 1]} : vector<2x256xf32> to vector<1x256xf32>
    %166 = vector.broadcast %164 : f32 to vector<1x256xf32>
    %167 = arith.mulf %166, %165 : vector<1x256xf32>
    %168 = arith.addf %163, %167 : vector<1x256xf32>
    %169 = vector.extract_strided_slice %2 {offsets = [1, 0], sizes = [1, 256], strides = [1, 1]} : vector<7x256xf32> to vector<1x256xf32>
    %170 = arith.mulf %168, %169 : vector<1x256xf32>
    %171 = arith.addf %158, %170 : vector<1x256xf32>
    %172 = vector.extract_strided_slice %55 {offsets = [0, 18], sizes = [2, 256], strides = [1, 1]} : vector<2x358xf32> to vector<2x256xf32>
    %c9 = arith.constant 9 : index
    %173 = memref.load %arg4[%c9] : memref<98xf32, #tpu.memory_space<smem>>
    %174 = vector.extract_strided_slice %172 {offsets = [0, 0], sizes = [1, 256], strides = [1, 1]} : vector<2x256xf32> to vector<1x256xf32>
    %175 = vector.broadcast %173 : f32 to vector<1x256xf32>
    %176 = arith.mulf %175, %174 : vector<1x256xf32>
    %c58 = arith.constant 58 : index
    %177 = memref.load %arg4[%c58] : memref<98xf32, #tpu.memory_space<smem>>
    %178 = vector.extract_strided_slice %172 {offsets = [1, 0], sizes = [1, 256], strides = [1, 1]} : vector<2x256xf32> to vector<1x256xf32>
    %179 = vector.broadcast %177 : f32 to vector<1x256xf32>
    %180 = arith.mulf %179, %178 : vector<1x256xf32>
    %181 = arith.addf %176, %180 : vector<1x256xf32>
    %182 = vector.extract_strided_slice %2 {offsets = [2, 0], sizes = [1, 256], strides = [1, 1]} : vector<7x256xf32> to vector<1x256xf32>
    %183 = arith.mulf %181, %182 : vector<1x256xf32>
    %184 = arith.addf %171, %183 : vector<1x256xf32>
    %185 = vector.extract_strided_slice %55 {offsets = [0, 19], sizes = [2, 256], strides = [1, 1]} : vector<2x358xf32> to vector<2x256xf32>
    %c10 = arith.constant 10 : index
    %186 = memref.load %arg4[%c10] : memref<98xf32, #tpu.memory_space<smem>>
    %187 = vector.extract_strided_slice %185 {offsets = [0, 0], sizes = [1, 256], strides = [1, 1]} : vector<2x256xf32> to vector<1x256xf32>
    %188 = vector.broadcast %186 : f32 to vector<1x256xf32>
    %189 = arith.mulf %188, %187 : vector<1x256xf32>
    %c59 = arith.constant 59 : index
    %190 = memref.load %arg4[%c59] : memref<98xf32, #tpu.memory_space<smem>>
    %191 = vector.extract_strided_slice %185 {offsets = [1, 0], sizes = [1, 256], strides = [1, 1]} : vector<2x256xf32> to vector<1x256xf32>
    %192 = vector.broadcast %190 : f32 to vector<1x256xf32>
    %193 = arith.mulf %192, %191 : vector<1x256xf32>
    %194 = arith.addf %189, %193 : vector<1x256xf32>
    %195 = arith.addf %184, %194 : vector<1x256xf32>
    %196 = vector.extract_strided_slice %55 {offsets = [0, 20], sizes = [2, 256], strides = [1, 1]} : vector<2x358xf32> to vector<2x256xf32>
    %c11 = arith.constant 11 : index
    %197 = memref.load %arg4[%c11] : memref<98xf32, #tpu.memory_space<smem>>
    %198 = vector.extract_strided_slice %196 {offsets = [0, 0], sizes = [1, 256], strides = [1, 1]} : vector<2x256xf32> to vector<1x256xf32>
    %199 = vector.broadcast %197 : f32 to vector<1x256xf32>
    %200 = arith.mulf %199, %198 : vector<1x256xf32>
    %c60 = arith.constant 60 : index
    %201 = memref.load %arg4[%c60] : memref<98xf32, #tpu.memory_space<smem>>
    %202 = vector.extract_strided_slice %196 {offsets = [1, 0], sizes = [1, 256], strides = [1, 1]} : vector<2x256xf32> to vector<1x256xf32>
    %203 = vector.broadcast %201 : f32 to vector<1x256xf32>
    %204 = arith.mulf %203, %202 : vector<1x256xf32>
    %205 = arith.addf %200, %204 : vector<1x256xf32>
    %206 = vector.extract_strided_slice %2 {offsets = [4, 0], sizes = [1, 256], strides = [1, 1]} : vector<7x256xf32> to vector<1x256xf32>
    %207 = arith.mulf %205, %206 : vector<1x256xf32>
    %208 = arith.addf %195, %207 : vector<1x256xf32>
    %209 = vector.extract_strided_slice %55 {offsets = [0, 21], sizes = [2, 256], strides = [1, 1]} : vector<2x358xf32> to vector<2x256xf32>
    %c12 = arith.constant 12 : index
    %210 = memref.load %arg4[%c12] : memref<98xf32, #tpu.memory_space<smem>>
    %211 = vector.extract_strided_slice %209 {offsets = [0, 0], sizes = [1, 256], strides = [1, 1]} : vector<2x256xf32> to vector<1x256xf32>
    %212 = vector.broadcast %210 : f32 to vector<1x256xf32>
    %213 = arith.mulf %212, %211 : vector<1x256xf32>
    %c61 = arith.constant 61 : index
    %214 = memref.load %arg4[%c61] : memref<98xf32, #tpu.memory_space<smem>>
    %215 = vector.extract_strided_slice %209 {offsets = [1, 0], sizes = [1, 256], strides = [1, 1]} : vector<2x256xf32> to vector<1x256xf32>
    %216 = vector.broadcast %214 : f32 to vector<1x256xf32>
    %217 = arith.mulf %216, %215 : vector<1x256xf32>
    %218 = arith.addf %213, %217 : vector<1x256xf32>
    %219 = vector.extract_strided_slice %2 {offsets = [5, 0], sizes = [1, 256], strides = [1, 1]} : vector<7x256xf32> to vector<1x256xf32>
    %220 = arith.mulf %218, %219 : vector<1x256xf32>
    %221 = arith.addf %208, %220 : vector<1x256xf32>
    %222 = vector.extract_strided_slice %55 {offsets = [0, 22], sizes = [2, 256], strides = [1, 1]} : vector<2x358xf32> to vector<2x256xf32>
    %c13 = arith.constant 13 : index
    %223 = memref.load %arg4[%c13] : memref<98xf32, #tpu.memory_space<smem>>
    %224 = vector.extract_strided_slice %222 {offsets = [0, 0], sizes = [1, 256], strides = [1, 1]} : vector<2x256xf32> to vector<1x256xf32>
    %225 = vector.broadcast %223 : f32 to vector<1x256xf32>
    %226 = arith.mulf %225, %224 : vector<1x256xf32>
    %c62 = arith.constant 62 : index
    %227 = memref.load %arg4[%c62] : memref<98xf32, #tpu.memory_space<smem>>
    %228 = vector.extract_strided_slice %222 {offsets = [1, 0], sizes = [1, 256], strides = [1, 1]} : vector<2x256xf32> to vector<1x256xf32>
    %229 = vector.broadcast %227 : f32 to vector<1x256xf32>
    %230 = arith.mulf %229, %228 : vector<1x256xf32>
    %231 = arith.addf %226, %230 : vector<1x256xf32>
    %232 = vector.extract_strided_slice %2 {offsets = [6, 0], sizes = [1, 256], strides = [1, 1]} : vector<7x256xf32> to vector<1x256xf32>
    %233 = arith.mulf %231, %232 : vector<1x256xf32>
    %234 = arith.addf %221, %233 : vector<1x256xf32>
    %235 = vector.extract_strided_slice %55 {offsets = [0, 32], sizes = [2, 256], strides = [1, 1]} : vector<2x358xf32> to vector<2x256xf32>
    %c14 = arith.constant 14 : index
    %236 = memref.load %arg4[%c14] : memref<98xf32, #tpu.memory_space<smem>>
    %237 = vector.extract_strided_slice %235 {offsets = [0, 0], sizes = [1, 256], strides = [1, 1]} : vector<2x256xf32> to vector<1x256xf32>
    %238 = vector.broadcast %236 : f32 to vector<1x256xf32>
    %239 = arith.mulf %238, %237 : vector<1x256xf32>
    %c63 = arith.constant 63 : index
    %240 = memref.load %arg4[%c63] : memref<98xf32, #tpu.memory_space<smem>>
    %241 = vector.extract_strided_slice %235 {offsets = [1, 0], sizes = [1, 256], strides = [1, 1]} : vector<2x256xf32> to vector<1x256xf32>
    %242 = vector.broadcast %240 : f32 to vector<1x256xf32>
    %243 = arith.mulf %242, %241 : vector<1x256xf32>
    %244 = arith.addf %239, %243 : vector<1x256xf32>
    %245 = vector.extract_strided_slice %2 {offsets = [0, 0], sizes = [1, 256], strides = [1, 1]} : vector<7x256xf32> to vector<1x256xf32>
    %246 = arith.mulf %244, %245 : vector<1x256xf32>
    %247 = arith.addf %234, %246 : vector<1x256xf32>
    %248 = vector.extract_strided_slice %55 {offsets = [0, 33], sizes = [2, 256], strides = [1, 1]} : vector<2x358xf32> to vector<2x256xf32>
    %c15 = arith.constant 15 : index
    %249 = memref.load %arg4[%c15] : memref<98xf32, #tpu.memory_space<smem>>
    %250 = vector.extract_strided_slice %248 {offsets = [0, 0], sizes = [1, 256], strides = [1, 1]} : vector<2x256xf32> to vector<1x256xf32>
    %251 = vector.broadcast %249 : f32 to vector<1x256xf32>
    %252 = arith.mulf %251, %250 : vector<1x256xf32>
    %c64 = arith.constant 64 : index
    %253 = memref.load %arg4[%c64] : memref<98xf32, #tpu.memory_space<smem>>
    %254 = vector.extract_strided_slice %248 {offsets = [1, 0], sizes = [1, 256], strides = [1, 1]} : vector<2x256xf32> to vector<1x256xf32>
    %255 = vector.broadcast %253 : f32 to vector<1x256xf32>
    %256 = arith.mulf %255, %254 : vector<1x256xf32>
    %257 = arith.addf %252, %256 : vector<1x256xf32>
    %258 = vector.extract_strided_slice %2 {offsets = [1, 0], sizes = [1, 256], strides = [1, 1]} : vector<7x256xf32> to vector<1x256xf32>
    %259 = arith.mulf %257, %258 : vector<1x256xf32>
    %260 = arith.addf %247, %259 : vector<1x256xf32>
    %261 = vector.extract_strided_slice %55 {offsets = [0, 34], sizes = [2, 256], strides = [1, 1]} : vector<2x358xf32> to vector<2x256xf32>
    %c16 = arith.constant 16 : index
    %262 = memref.load %arg4[%c16] : memref<98xf32, #tpu.memory_space<smem>>
    %263 = vector.extract_strided_slice %261 {offsets = [0, 0], sizes = [1, 256], strides = [1, 1]} : vector<2x256xf32> to vector<1x256xf32>
    %264 = vector.broadcast %262 : f32 to vector<1x256xf32>
    %265 = arith.mulf %264, %263 : vector<1x256xf32>
    %c65 = arith.constant 65 : index
    %266 = memref.load %arg4[%c65] : memref<98xf32, #tpu.memory_space<smem>>
    %267 = vector.extract_strided_slice %261 {offsets = [1, 0], sizes = [1, 256], strides = [1, 1]} : vector<2x256xf32> to vector<1x256xf32>
    %268 = vector.broadcast %266 : f32 to vector<1x256xf32>
    %269 = arith.mulf %268, %267 : vector<1x256xf32>
    %270 = arith.addf %265, %269 : vector<1x256xf32>
    %271 = vector.extract_strided_slice %2 {offsets = [2, 0], sizes = [1, 256], strides = [1, 1]} : vector<7x256xf32> to vector<1x256xf32>
    %272 = arith.mulf %270, %271 : vector<1x256xf32>
    %273 = arith.addf %260, %272 : vector<1x256xf32>
    %274 = vector.extract_strided_slice %55 {offsets = [0, 35], sizes = [2, 256], strides = [1, 1]} : vector<2x358xf32> to vector<2x256xf32>
    %c17 = arith.constant 17 : index
    %275 = memref.load %arg4[%c17] : memref<98xf32, #tpu.memory_space<smem>>
    %276 = vector.extract_strided_slice %274 {offsets = [0, 0], sizes = [1, 256], strides = [1, 1]} : vector<2x256xf32> to vector<1x256xf32>
    %277 = vector.broadcast %275 : f32 to vector<1x256xf32>
    %278 = arith.mulf %277, %276 : vector<1x256xf32>
    %c66 = arith.constant 66 : index
    %279 = memref.load %arg4[%c66] : memref<98xf32, #tpu.memory_space<smem>>
    %280 = vector.extract_strided_slice %274 {offsets = [1, 0], sizes = [1, 256], strides = [1, 1]} : vector<2x256xf32> to vector<1x256xf32>
    %281 = vector.broadcast %279 : f32 to vector<1x256xf32>
    %282 = arith.mulf %281, %280 : vector<1x256xf32>
    %283 = arith.addf %278, %282 : vector<1x256xf32>
    %284 = arith.addf %273, %283 : vector<1x256xf32>
    %285 = vector.extract_strided_slice %55 {offsets = [0, 36], sizes = [2, 256], strides = [1, 1]} : vector<2x358xf32> to vector<2x256xf32>
    %c18 = arith.constant 18 : index
    %286 = memref.load %arg4[%c18] : memref<98xf32, #tpu.memory_space<smem>>
    %287 = vector.extract_strided_slice %285 {offsets = [0, 0], sizes = [1, 256], strides = [1, 1]} : vector<2x256xf32> to vector<1x256xf32>
    %288 = vector.broadcast %286 : f32 to vector<1x256xf32>
    %289 = arith.mulf %288, %287 : vector<1x256xf32>
    %c67 = arith.constant 67 : index
    %290 = memref.load %arg4[%c67] : memref<98xf32, #tpu.memory_space<smem>>
    %291 = vector.extract_strided_slice %285 {offsets = [1, 0], sizes = [1, 256], strides = [1, 1]} : vector<2x256xf32> to vector<1x256xf32>
    %292 = vector.broadcast %290 : f32 to vector<1x256xf32>
    %293 = arith.mulf %292, %291 : vector<1x256xf32>
    %294 = arith.addf %289, %293 : vector<1x256xf32>
    %295 = vector.extract_strided_slice %2 {offsets = [4, 0], sizes = [1, 256], strides = [1, 1]} : vector<7x256xf32> to vector<1x256xf32>
    %296 = arith.mulf %294, %295 : vector<1x256xf32>
    %297 = arith.addf %284, %296 : vector<1x256xf32>
    %298 = vector.extract_strided_slice %55 {offsets = [0, 37], sizes = [2, 256], strides = [1, 1]} : vector<2x358xf32> to vector<2x256xf32>
    %c19 = arith.constant 19 : index
    %299 = memref.load %arg4[%c19] : memref<98xf32, #tpu.memory_space<smem>>
    %300 = vector.extract_strided_slice %298 {offsets = [0, 0], sizes = [1, 256], strides = [1, 1]} : vector<2x256xf32> to vector<1x256xf32>
    %301 = vector.broadcast %299 : f32 to vector<1x256xf32>
    %302 = arith.mulf %301, %300 : vector<1x256xf32>
    %c68 = arith.constant 68 : index
    %303 = memref.load %arg4[%c68] : memref<98xf32, #tpu.memory_space<smem>>
    %304 = vector.extract_strided_slice %298 {offsets = [1, 0], sizes = [1, 256], strides = [1, 1]} : vector<2x256xf32> to vector<1x256xf32>
    %305 = vector.broadcast %303 : f32 to vector<1x256xf32>
    %306 = arith.mulf %305, %304 : vector<1x256xf32>
    %307 = arith.addf %302, %306 : vector<1x256xf32>
    %308 = vector.extract_strided_slice %2 {offsets = [5, 0], sizes = [1, 256], strides = [1, 1]} : vector<7x256xf32> to vector<1x256xf32>
    %309 = arith.mulf %307, %308 : vector<1x256xf32>
    %310 = arith.addf %297, %309 : vector<1x256xf32>
    %311 = vector.extract_strided_slice %55 {offsets = [0, 38], sizes = [2, 256], strides = [1, 1]} : vector<2x358xf32> to vector<2x256xf32>
    %c20 = arith.constant 20 : index
    %312 = memref.load %arg4[%c20] : memref<98xf32, #tpu.memory_space<smem>>
    %313 = vector.extract_strided_slice %311 {offsets = [0, 0], sizes = [1, 256], strides = [1, 1]} : vector<2x256xf32> to vector<1x256xf32>
    %314 = vector.broadcast %312 : f32 to vector<1x256xf32>
    %315 = arith.mulf %314, %313 : vector<1x256xf32>
    %c69 = arith.constant 69 : index
    %316 = memref.load %arg4[%c69] : memref<98xf32, #tpu.memory_space<smem>>
    %317 = vector.extract_strided_slice %311 {offsets = [1, 0], sizes = [1, 256], strides = [1, 1]} : vector<2x256xf32> to vector<1x256xf32>
    %318 = vector.broadcast %316 : f32 to vector<1x256xf32>
    %319 = arith.mulf %318, %317 : vector<1x256xf32>
    %320 = arith.addf %315, %319 : vector<1x256xf32>
    %321 = vector.extract_strided_slice %2 {offsets = [6, 0], sizes = [1, 256], strides = [1, 1]} : vector<7x256xf32> to vector<1x256xf32>
    %322 = arith.mulf %320, %321 : vector<1x256xf32>
    %323 = arith.addf %310, %322 : vector<1x256xf32>
    %324 = vector.extract_strided_slice %55 {offsets = [0, 48], sizes = [2, 256], strides = [1, 1]} : vector<2x358xf32> to vector<2x256xf32>
    %c21 = arith.constant 21 : index
    %325 = memref.load %arg4[%c21] : memref<98xf32, #tpu.memory_space<smem>>
    %326 = vector.extract_strided_slice %324 {offsets = [0, 0], sizes = [1, 256], strides = [1, 1]} : vector<2x256xf32> to vector<1x256xf32>
    %327 = vector.broadcast %325 : f32 to vector<1x256xf32>
    %328 = arith.mulf %327, %326 : vector<1x256xf32>
    %c70 = arith.constant 70 : index
    %329 = memref.load %arg4[%c70] : memref<98xf32, #tpu.memory_space<smem>>
    %330 = vector.extract_strided_slice %324 {offsets = [1, 0], sizes = [1, 256], strides = [1, 1]} : vector<2x256xf32> to vector<1x256xf32>
    %331 = vector.broadcast %329 : f32 to vector<1x256xf32>
    %332 = arith.mulf %331, %330 : vector<1x256xf32>
    %333 = arith.addf %328, %332 : vector<1x256xf32>
    %334 = vector.extract_strided_slice %2 {offsets = [0, 0], sizes = [1, 256], strides = [1, 1]} : vector<7x256xf32> to vector<1x256xf32>
    %335 = arith.mulf %333, %334 : vector<1x256xf32>
    %336 = arith.addf %323, %335 : vector<1x256xf32>
    %337 = vector.extract_strided_slice %55 {offsets = [0, 49], sizes = [2, 256], strides = [1, 1]} : vector<2x358xf32> to vector<2x256xf32>
    %c22 = arith.constant 22 : index
    %338 = memref.load %arg4[%c22] : memref<98xf32, #tpu.memory_space<smem>>
    %339 = vector.extract_strided_slice %337 {offsets = [0, 0], sizes = [1, 256], strides = [1, 1]} : vector<2x256xf32> to vector<1x256xf32>
    %340 = vector.broadcast %338 : f32 to vector<1x256xf32>
    %341 = arith.mulf %340, %339 : vector<1x256xf32>
    %c71 = arith.constant 71 : index
    %342 = memref.load %arg4[%c71] : memref<98xf32, #tpu.memory_space<smem>>
    %343 = vector.extract_strided_slice %337 {offsets = [1, 0], sizes = [1, 256], strides = [1, 1]} : vector<2x256xf32> to vector<1x256xf32>
    %344 = vector.broadcast %342 : f32 to vector<1x256xf32>
    %345 = arith.mulf %344, %343 : vector<1x256xf32>
    %346 = arith.addf %341, %345 : vector<1x256xf32>
    %347 = vector.extract_strided_slice %2 {offsets = [1, 0], sizes = [1, 256], strides = [1, 1]} : vector<7x256xf32> to vector<1x256xf32>
    %348 = arith.mulf %346, %347 : vector<1x256xf32>
    %349 = arith.addf %336, %348 : vector<1x256xf32>
    %350 = vector.extract_strided_slice %55 {offsets = [0, 50], sizes = [2, 256], strides = [1, 1]} : vector<2x358xf32> to vector<2x256xf32>
    %c23 = arith.constant 23 : index
    %351 = memref.load %arg4[%c23] : memref<98xf32, #tpu.memory_space<smem>>
    %352 = vector.extract_strided_slice %350 {offsets = [0, 0], sizes = [1, 256], strides = [1, 1]} : vector<2x256xf32> to vector<1x256xf32>
    %353 = vector.broadcast %351 : f32 to vector<1x256xf32>
    %354 = arith.mulf %353, %352 : vector<1x256xf32>
    %c72 = arith.constant 72 : index
    %355 = memref.load %arg4[%c72] : memref<98xf32, #tpu.memory_space<smem>>
    %356 = vector.extract_strided_slice %350 {offsets = [1, 0], sizes = [1, 256], strides = [1, 1]} : vector<2x256xf32> to vector<1x256xf32>
    %357 = vector.broadcast %355 : f32 to vector<1x256xf32>
    %358 = arith.mulf %357, %356 : vector<1x256xf32>
    %359 = arith.addf %354, %358 : vector<1x256xf32>
    %360 = vector.extract_strided_slice %2 {offsets = [2, 0], sizes = [1, 256], strides = [1, 1]} : vector<7x256xf32> to vector<1x256xf32>
    %361 = arith.mulf %359, %360 : vector<1x256xf32>
    %362 = arith.addf %349, %361 : vector<1x256xf32>
    %363 = vector.extract_strided_slice %55 {offsets = [0, 51], sizes = [2, 256], strides = [1, 1]} : vector<2x358xf32> to vector<2x256xf32>
    %c24 = arith.constant 24 : index
    %364 = memref.load %arg4[%c24] : memref<98xf32, #tpu.memory_space<smem>>
    %365 = vector.extract_strided_slice %363 {offsets = [0, 0], sizes = [1, 256], strides = [1, 1]} : vector<2x256xf32> to vector<1x256xf32>
    %366 = vector.broadcast %364 : f32 to vector<1x256xf32>
    %367 = arith.mulf %366, %365 : vector<1x256xf32>
    %c73 = arith.constant 73 : index
    %368 = memref.load %arg4[%c73] : memref<98xf32, #tpu.memory_space<smem>>
    %369 = vector.extract_strided_slice %363 {offsets = [1, 0], sizes = [1, 256], strides = [1, 1]} : vector<2x256xf32> to vector<1x256xf32>
    %370 = vector.broadcast %368 : f32 to vector<1x256xf32>
    %371 = arith.mulf %370, %369 : vector<1x256xf32>
    %372 = arith.addf %367, %371 : vector<1x256xf32>
    %373 = arith.addf %362, %372 : vector<1x256xf32>
    %374 = vector.extract_strided_slice %55 {offsets = [0, 52], sizes = [2, 256], strides = [1, 1]} : vector<2x358xf32> to vector<2x256xf32>
    %c25 = arith.constant 25 : index
    %375 = memref.load %arg4[%c25] : memref<98xf32, #tpu.memory_space<smem>>
    %376 = vector.extract_strided_slice %374 {offsets = [0, 0], sizes = [1, 256], strides = [1, 1]} : vector<2x256xf32> to vector<1x256xf32>
    %377 = vector.broadcast %375 : f32 to vector<1x256xf32>
    %378 = arith.mulf %377, %376 : vector<1x256xf32>
    %c74 = arith.constant 74 : index
    %379 = memref.load %arg4[%c74] : memref<98xf32, #tpu.memory_space<smem>>
    %380 = vector.extract_strided_slice %374 {offsets = [1, 0], sizes = [1, 256], strides = [1, 1]} : vector<2x256xf32> to vector<1x256xf32>
    %381 = vector.broadcast %379 : f32 to vector<1x256xf32>
    %382 = arith.mulf %381, %380 : vector<1x256xf32>
    %383 = arith.addf %378, %382 : vector<1x256xf32>
    %384 = vector.extract_strided_slice %2 {offsets = [4, 0], sizes = [1, 256], strides = [1, 1]} : vector<7x256xf32> to vector<1x256xf32>
    %385 = arith.mulf %383, %384 : vector<1x256xf32>
    %386 = arith.addf %373, %385 : vector<1x256xf32>
    %387 = vector.extract_strided_slice %55 {offsets = [0, 53], sizes = [2, 256], strides = [1, 1]} : vector<2x358xf32> to vector<2x256xf32>
    %c26 = arith.constant 26 : index
    %388 = memref.load %arg4[%c26] : memref<98xf32, #tpu.memory_space<smem>>
    %389 = vector.extract_strided_slice %387 {offsets = [0, 0], sizes = [1, 256], strides = [1, 1]} : vector<2x256xf32> to vector<1x256xf32>
    %390 = vector.broadcast %388 : f32 to vector<1x256xf32>
    %391 = arith.mulf %390, %389 : vector<1x256xf32>
    %c75 = arith.constant 75 : index
    %392 = memref.load %arg4[%c75] : memref<98xf32, #tpu.memory_space<smem>>
    %393 = vector.extract_strided_slice %387 {offsets = [1, 0], sizes = [1, 256], strides = [1, 1]} : vector<2x256xf32> to vector<1x256xf32>
    %394 = vector.broadcast %392 : f32 to vector<1x256xf32>
    %395 = arith.mulf %394, %393 : vector<1x256xf32>
    %396 = arith.addf %391, %395 : vector<1x256xf32>
    %397 = vector.extract_strided_slice %2 {offsets = [5, 0], sizes = [1, 256], strides = [1, 1]} : vector<7x256xf32> to vector<1x256xf32>
    %398 = arith.mulf %396, %397 : vector<1x256xf32>
    %399 = arith.addf %386, %398 : vector<1x256xf32>
    %400 = vector.extract_strided_slice %55 {offsets = [0, 54], sizes = [2, 256], strides = [1, 1]} : vector<2x358xf32> to vector<2x256xf32>
    %c27 = arith.constant 27 : index
    %401 = memref.load %arg4[%c27] : memref<98xf32, #tpu.memory_space<smem>>
    %402 = vector.extract_strided_slice %400 {offsets = [0, 0], sizes = [1, 256], strides = [1, 1]} : vector<2x256xf32> to vector<1x256xf32>
    %403 = vector.broadcast %401 : f32 to vector<1x256xf32>
    %404 = arith.mulf %403, %402 : vector<1x256xf32>
    %c76 = arith.constant 76 : index
    %405 = memref.load %arg4[%c76] : memref<98xf32, #tpu.memory_space<smem>>
    %406 = vector.extract_strided_slice %400 {offsets = [1, 0], sizes = [1, 256], strides = [1, 1]} : vector<2x256xf32> to vector<1x256xf32>
    %407 = vector.broadcast %405 : f32 to vector<1x256xf32>
    %408 = arith.mulf %407, %406 : vector<1x256xf32>
    %409 = arith.addf %404, %408 : vector<1x256xf32>
    %410 = vector.extract_strided_slice %2 {offsets = [6, 0], sizes = [1, 256], strides = [1, 1]} : vector<7x256xf32> to vector<1x256xf32>
    %411 = arith.mulf %409, %410 : vector<1x256xf32>
    %412 = arith.addf %399, %411 : vector<1x256xf32>
    %413 = vector.extract_strided_slice %55 {offsets = [0, 64], sizes = [2, 256], strides = [1, 1]} : vector<2x358xf32> to vector<2x256xf32>
    %c28 = arith.constant 28 : index
    %414 = memref.load %arg4[%c28] : memref<98xf32, #tpu.memory_space<smem>>
    %415 = vector.extract_strided_slice %413 {offsets = [0, 0], sizes = [1, 256], strides = [1, 1]} : vector<2x256xf32> to vector<1x256xf32>
    %416 = vector.broadcast %414 : f32 to vector<1x256xf32>
    %417 = arith.mulf %416, %415 : vector<1x256xf32>
    %c77 = arith.constant 77 : index
    %418 = memref.load %arg4[%c77] : memref<98xf32, #tpu.memory_space<smem>>
    %419 = vector.extract_strided_slice %413 {offsets = [1, 0], sizes = [1, 256], strides = [1, 1]} : vector<2x256xf32> to vector<1x256xf32>
    %420 = vector.broadcast %418 : f32 to vector<1x256xf32>
    %421 = arith.mulf %420, %419 : vector<1x256xf32>
    %422 = arith.addf %417, %421 : vector<1x256xf32>
    %423 = vector.extract_strided_slice %2 {offsets = [0, 0], sizes = [1, 256], strides = [1, 1]} : vector<7x256xf32> to vector<1x256xf32>
    %424 = arith.mulf %422, %423 : vector<1x256xf32>
    %425 = arith.addf %412, %424 : vector<1x256xf32>
    %426 = vector.extract_strided_slice %55 {offsets = [0, 65], sizes = [2, 256], strides = [1, 1]} : vector<2x358xf32> to vector<2x256xf32>
    %c29 = arith.constant 29 : index
    %427 = memref.load %arg4[%c29] : memref<98xf32, #tpu.memory_space<smem>>
    %428 = vector.extract_strided_slice %426 {offsets = [0, 0], sizes = [1, 256], strides = [1, 1]} : vector<2x256xf32> to vector<1x256xf32>
    %429 = vector.broadcast %427 : f32 to vector<1x256xf32>
    %430 = arith.mulf %429, %428 : vector<1x256xf32>
    %c78 = arith.constant 78 : index
    %431 = memref.load %arg4[%c78] : memref<98xf32, #tpu.memory_space<smem>>
    %432 = vector.extract_strided_slice %426 {offsets = [1, 0], sizes = [1, 256], strides = [1, 1]} : vector<2x256xf32> to vector<1x256xf32>
    %433 = vector.broadcast %431 : f32 to vector<1x256xf32>
    %434 = arith.mulf %433, %432 : vector<1x256xf32>
    %435 = arith.addf %430, %434 : vector<1x256xf32>
    %436 = vector.extract_strided_slice %2 {offsets = [1, 0], sizes = [1, 256], strides = [1, 1]} : vector<7x256xf32> to vector<1x256xf32>
    %437 = arith.mulf %435, %436 : vector<1x256xf32>
    %438 = arith.addf %425, %437 : vector<1x256xf32>
    %439 = vector.extract_strided_slice %55 {offsets = [0, 66], sizes = [2, 256], strides = [1, 1]} : vector<2x358xf32> to vector<2x256xf32>
    %c30 = arith.constant 30 : index
    %440 = memref.load %arg4[%c30] : memref<98xf32, #tpu.memory_space<smem>>
    %441 = vector.extract_strided_slice %439 {offsets = [0, 0], sizes = [1, 256], strides = [1, 1]} : vector<2x256xf32> to vector<1x256xf32>
    %442 = vector.broadcast %440 : f32 to vector<1x256xf32>
    %443 = arith.mulf %442, %441 : vector<1x256xf32>
    %c79 = arith.constant 79 : index
    %444 = memref.load %arg4[%c79] : memref<98xf32, #tpu.memory_space<smem>>
    %445 = vector.extract_strided_slice %439 {offsets = [1, 0], sizes = [1, 256], strides = [1, 1]} : vector<2x256xf32> to vector<1x256xf32>
    %446 = vector.broadcast %444 : f32 to vector<1x256xf32>
    %447 = arith.mulf %446, %445 : vector<1x256xf32>
    %448 = arith.addf %443, %447 : vector<1x256xf32>
    %449 = vector.extract_strided_slice %2 {offsets = [2, 0], sizes = [1, 256], strides = [1, 1]} : vector<7x256xf32> to vector<1x256xf32>
    %450 = arith.mulf %448, %449 : vector<1x256xf32>
    %451 = arith.addf %438, %450 : vector<1x256xf32>
    %452 = vector.extract_strided_slice %55 {offsets = [0, 67], sizes = [2, 256], strides = [1, 1]} : vector<2x358xf32> to vector<2x256xf32>
    %c31 = arith.constant 31 : index
    %453 = memref.load %arg4[%c31] : memref<98xf32, #tpu.memory_space<smem>>
    %454 = vector.extract_strided_slice %452 {offsets = [0, 0], sizes = [1, 256], strides = [1, 1]} : vector<2x256xf32> to vector<1x256xf32>
    %455 = vector.broadcast %453 : f32 to vector<1x256xf32>
    %456 = arith.mulf %455, %454 : vector<1x256xf32>
    %c80 = arith.constant 80 : index
    %457 = memref.load %arg4[%c80] : memref<98xf32, #tpu.memory_space<smem>>
    %458 = vector.extract_strided_slice %452 {offsets = [1, 0], sizes = [1, 256], strides = [1, 1]} : vector<2x256xf32> to vector<1x256xf32>
    %459 = vector.broadcast %457 : f32 to vector<1x256xf32>
    %460 = arith.mulf %459, %458 : vector<1x256xf32>
    %461 = arith.addf %456, %460 : vector<1x256xf32>
    %462 = arith.addf %451, %461 : vector<1x256xf32>
    %463 = vector.extract_strided_slice %55 {offsets = [0, 68], sizes = [2, 256], strides = [1, 1]} : vector<2x358xf32> to vector<2x256xf32>
    %c32 = arith.constant 32 : index
    %464 = memref.load %arg4[%c32] : memref<98xf32, #tpu.memory_space<smem>>
    %465 = vector.extract_strided_slice %463 {offsets = [0, 0], sizes = [1, 256], strides = [1, 1]} : vector<2x256xf32> to vector<1x256xf32>
    %466 = vector.broadcast %464 : f32 to vector<1x256xf32>
    %467 = arith.mulf %466, %465 : vector<1x256xf32>
    %c81 = arith.constant 81 : index
    %468 = memref.load %arg4[%c81] : memref<98xf32, #tpu.memory_space<smem>>
    %469 = vector.extract_strided_slice %463 {offsets = [1, 0], sizes = [1, 256], strides = [1, 1]} : vector<2x256xf32> to vector<1x256xf32>
    %470 = vector.broadcast %468 : f32 to vector<1x256xf32>
    %471 = arith.mulf %470, %469 : vector<1x256xf32>
    %472 = arith.addf %467, %471 : vector<1x256xf32>
    %473 = vector.extract_strided_slice %2 {offsets = [4, 0], sizes = [1, 256], strides = [1, 1]} : vector<7x256xf32> to vector<1x256xf32>
    %474 = arith.mulf %472, %473 : vector<1x256xf32>
    %475 = arith.addf %462, %474 : vector<1x256xf32>
    %476 = vector.extract_strided_slice %55 {offsets = [0, 69], sizes = [2, 256], strides = [1, 1]} : vector<2x358xf32> to vector<2x256xf32>
    %c33 = arith.constant 33 : index
    %477 = memref.load %arg4[%c33] : memref<98xf32, #tpu.memory_space<smem>>
    %478 = vector.extract_strided_slice %476 {offsets = [0, 0], sizes = [1, 256], strides = [1, 1]} : vector<2x256xf32> to vector<1x256xf32>
    %479 = vector.broadcast %477 : f32 to vector<1x256xf32>
    %480 = arith.mulf %479, %478 : vector<1x256xf32>
    %c82 = arith.constant 82 : index
    %481 = memref.load %arg4[%c82] : memref<98xf32, #tpu.memory_space<smem>>
    %482 = vector.extract_strided_slice %476 {offsets = [1, 0], sizes = [1, 256], strides = [1, 1]} : vector<2x256xf32> to vector<1x256xf32>
    %483 = vector.broadcast %481 : f32 to vector<1x256xf32>
    %484 = arith.mulf %483, %482 : vector<1x256xf32>
    %485 = arith.addf %480, %484 : vector<1x256xf32>
    %486 = vector.extract_strided_slice %2 {offsets = [5, 0], sizes = [1, 256], strides = [1, 1]} : vector<7x256xf32> to vector<1x256xf32>
    %487 = arith.mulf %485, %486 : vector<1x256xf32>
    %488 = arith.addf %475, %487 : vector<1x256xf32>
    %489 = vector.extract_strided_slice %55 {offsets = [0, 70], sizes = [2, 256], strides = [1, 1]} : vector<2x358xf32> to vector<2x256xf32>
    %c34 = arith.constant 34 : index
    %490 = memref.load %arg4[%c34] : memref<98xf32, #tpu.memory_space<smem>>
    %491 = vector.extract_strided_slice %489 {offsets = [0, 0], sizes = [1, 256], strides = [1, 1]} : vector<2x256xf32> to vector<1x256xf32>
    %492 = vector.broadcast %490 : f32 to vector<1x256xf32>
    %493 = arith.mulf %492, %491 : vector<1x256xf32>
    %c83 = arith.constant 83 : index
    %494 = memref.load %arg4[%c83] : memref<98xf32, #tpu.memory_space<smem>>
    %495 = vector.extract_strided_slice %489 {offsets = [1, 0], sizes = [1, 256], strides = [1, 1]} : vector<2x256xf32> to vector<1x256xf32>
    %496 = vector.broadcast %494 : f32 to vector<1x256xf32>
    %497 = arith.mulf %496, %495 : vector<1x256xf32>
    %498 = arith.addf %493, %497 : vector<1x256xf32>
    %499 = vector.extract_strided_slice %2 {offsets = [6, 0], sizes = [1, 256], strides = [1, 1]} : vector<7x256xf32> to vector<1x256xf32>
    %500 = arith.mulf %498, %499 : vector<1x256xf32>
    %501 = arith.addf %488, %500 : vector<1x256xf32>
    %502 = vector.extract_strided_slice %55 {offsets = [0, 80], sizes = [2, 256], strides = [1, 1]} : vector<2x358xf32> to vector<2x256xf32>
    %c35 = arith.constant 35 : index
    %503 = memref.load %arg4[%c35] : memref<98xf32, #tpu.memory_space<smem>>
    %504 = vector.extract_strided_slice %502 {offsets = [0, 0], sizes = [1, 256], strides = [1, 1]} : vector<2x256xf32> to vector<1x256xf32>
    %505 = vector.broadcast %503 : f32 to vector<1x256xf32>
    %506 = arith.mulf %505, %504 : vector<1x256xf32>
    %c84 = arith.constant 84 : index
    %507 = memref.load %arg4[%c84] : memref<98xf32, #tpu.memory_space<smem>>
    %508 = vector.extract_strided_slice %502 {offsets = [1, 0], sizes = [1, 256], strides = [1, 1]} : vector<2x256xf32> to vector<1x256xf32>
    %509 = vector.broadcast %507 : f32 to vector<1x256xf32>
    %510 = arith.mulf %509, %508 : vector<1x256xf32>
    %511 = arith.addf %506, %510 : vector<1x256xf32>
    %512 = vector.extract_strided_slice %2 {offsets = [0, 0], sizes = [1, 256], strides = [1, 1]} : vector<7x256xf32> to vector<1x256xf32>
    %513 = arith.mulf %511, %512 : vector<1x256xf32>
    %514 = arith.addf %501, %513 : vector<1x256xf32>
    %515 = vector.extract_strided_slice %55 {offsets = [0, 81], sizes = [2, 256], strides = [1, 1]} : vector<2x358xf32> to vector<2x256xf32>
    %c36 = arith.constant 36 : index
    %516 = memref.load %arg4[%c36] : memref<98xf32, #tpu.memory_space<smem>>
    %517 = vector.extract_strided_slice %515 {offsets = [0, 0], sizes = [1, 256], strides = [1, 1]} : vector<2x256xf32> to vector<1x256xf32>
    %518 = vector.broadcast %516 : f32 to vector<1x256xf32>
    %519 = arith.mulf %518, %517 : vector<1x256xf32>
    %c85 = arith.constant 85 : index
    %520 = memref.load %arg4[%c85] : memref<98xf32, #tpu.memory_space<smem>>
    %521 = vector.extract_strided_slice %515 {offsets = [1, 0], sizes = [1, 256], strides = [1, 1]} : vector<2x256xf32> to vector<1x256xf32>
    %522 = vector.broadcast %520 : f32 to vector<1x256xf32>
    %523 = arith.mulf %522, %521 : vector<1x256xf32>
    %524 = arith.addf %519, %523 : vector<1x256xf32>
    %525 = vector.extract_strided_slice %2 {offsets = [1, 0], sizes = [1, 256], strides = [1, 1]} : vector<7x256xf32> to vector<1x256xf32>
    %526 = arith.mulf %524, %525 : vector<1x256xf32>
    %527 = arith.addf %514, %526 : vector<1x256xf32>
    %528 = vector.extract_strided_slice %55 {offsets = [0, 82], sizes = [2, 256], strides = [1, 1]} : vector<2x358xf32> to vector<2x256xf32>
    %c37 = arith.constant 37 : index
    %529 = memref.load %arg4[%c37] : memref<98xf32, #tpu.memory_space<smem>>
    %530 = vector.extract_strided_slice %528 {offsets = [0, 0], sizes = [1, 256], strides = [1, 1]} : vector<2x256xf32> to vector<1x256xf32>
    %531 = vector.broadcast %529 : f32 to vector<1x256xf32>
    %532 = arith.mulf %531, %530 : vector<1x256xf32>
    %c86 = arith.constant 86 : index
    %533 = memref.load %arg4[%c86] : memref<98xf32, #tpu.memory_space<smem>>
    %534 = vector.extract_strided_slice %528 {offsets = [1, 0], sizes = [1, 256], strides = [1, 1]} : vector<2x256xf32> to vector<1x256xf32>
    %535 = vector.broadcast %533 : f32 to vector<1x256xf32>
    %536 = arith.mulf %535, %534 : vector<1x256xf32>
    %537 = arith.addf %532, %536 : vector<1x256xf32>
    %538 = vector.extract_strided_slice %2 {offsets = [2, 0], sizes = [1, 256], strides = [1, 1]} : vector<7x256xf32> to vector<1x256xf32>
    %539 = arith.mulf %537, %538 : vector<1x256xf32>
    %540 = arith.addf %527, %539 : vector<1x256xf32>
    %541 = vector.extract_strided_slice %55 {offsets = [0, 83], sizes = [2, 256], strides = [1, 1]} : vector<2x358xf32> to vector<2x256xf32>
    %c38 = arith.constant 38 : index
    %542 = memref.load %arg4[%c38] : memref<98xf32, #tpu.memory_space<smem>>
    %543 = vector.extract_strided_slice %541 {offsets = [0, 0], sizes = [1, 256], strides = [1, 1]} : vector<2x256xf32> to vector<1x256xf32>
    %544 = vector.broadcast %542 : f32 to vector<1x256xf32>
    %545 = arith.mulf %544, %543 : vector<1x256xf32>
    %c87 = arith.constant 87 : index
    %546 = memref.load %arg4[%c87] : memref<98xf32, #tpu.memory_space<smem>>
    %547 = vector.extract_strided_slice %541 {offsets = [1, 0], sizes = [1, 256], strides = [1, 1]} : vector<2x256xf32> to vector<1x256xf32>
    %548 = vector.broadcast %546 : f32 to vector<1x256xf32>
    %549 = arith.mulf %548, %547 : vector<1x256xf32>
    %550 = arith.addf %545, %549 : vector<1x256xf32>
    %551 = arith.addf %540, %550 : vector<1x256xf32>
    %552 = vector.extract_strided_slice %55 {offsets = [0, 84], sizes = [2, 256], strides = [1, 1]} : vector<2x358xf32> to vector<2x256xf32>
    %c39 = arith.constant 39 : index
    %553 = memref.load %arg4[%c39] : memref<98xf32, #tpu.memory_space<smem>>
    %554 = vector.extract_strided_slice %552 {offsets = [0, 0], sizes = [1, 256], strides = [1, 1]} : vector<2x256xf32> to vector<1x256xf32>
    %555 = vector.broadcast %553 : f32 to vector<1x256xf32>
    %556 = arith.mulf %555, %554 : vector<1x256xf32>
    %c88 = arith.constant 88 : index
    %557 = memref.load %arg4[%c88] : memref<98xf32, #tpu.memory_space<smem>>
    %558 = vector.extract_strided_slice %552 {offsets = [1, 0], sizes = [1, 256], strides = [1, 1]} : vector<2x256xf32> to vector<1x256xf32>
    %559 = vector.broadcast %557 : f32 to vector<1x256xf32>
    %560 = arith.mulf %559, %558 : vector<1x256xf32>
    %561 = arith.addf %556, %560 : vector<1x256xf32>
    %562 = vector.extract_strided_slice %2 {offsets = [4, 0], sizes = [1, 256], strides = [1, 1]} : vector<7x256xf32> to vector<1x256xf32>
    %563 = arith.mulf %561, %562 : vector<1x256xf32>
    %564 = arith.addf %551, %563 : vector<1x256xf32>
    %565 = vector.extract_strided_slice %55 {offsets = [0, 85], sizes = [2, 256], strides = [1, 1]} : vector<2x358xf32> to vector<2x256xf32>
    %c40 = arith.constant 40 : index
    %566 = memref.load %arg4[%c40] : memref<98xf32, #tpu.memory_space<smem>>
    %567 = vector.extract_strided_slice %565 {offsets = [0, 0], sizes = [1, 256], strides = [1, 1]} : vector<2x256xf32> to vector<1x256xf32>
    %568 = vector.broadcast %566 : f32 to vector<1x256xf32>
    %569 = arith.mulf %568, %567 : vector<1x256xf32>
    %c89 = arith.constant 89 : index
    %570 = memref.load %arg4[%c89] : memref<98xf32, #tpu.memory_space<smem>>
    %571 = vector.extract_strided_slice %565 {offsets = [1, 0], sizes = [1, 256], strides = [1, 1]} : vector<2x256xf32> to vector<1x256xf32>
    %572 = vector.broadcast %570 : f32 to vector<1x256xf32>
    %573 = arith.mulf %572, %571 : vector<1x256xf32>
    %574 = arith.addf %569, %573 : vector<1x256xf32>
    %575 = vector.extract_strided_slice %2 {offsets = [5, 0], sizes = [1, 256], strides = [1, 1]} : vector<7x256xf32> to vector<1x256xf32>
    %576 = arith.mulf %574, %575 : vector<1x256xf32>
    %577 = arith.addf %564, %576 : vector<1x256xf32>
    %578 = vector.extract_strided_slice %55 {offsets = [0, 86], sizes = [2, 256], strides = [1, 1]} : vector<2x358xf32> to vector<2x256xf32>
    %c41 = arith.constant 41 : index
    %579 = memref.load %arg4[%c41] : memref<98xf32, #tpu.memory_space<smem>>
    %580 = vector.extract_strided_slice %578 {offsets = [0, 0], sizes = [1, 256], strides = [1, 1]} : vector<2x256xf32> to vector<1x256xf32>
    %581 = vector.broadcast %579 : f32 to vector<1x256xf32>
    %582 = arith.mulf %581, %580 : vector<1x256xf32>
    %c90 = arith.constant 90 : index
    %583 = memref.load %arg4[%c90] : memref<98xf32, #tpu.memory_space<smem>>
    %584 = vector.extract_strided_slice %578 {offsets = [1, 0], sizes = [1, 256], strides = [1, 1]} : vector<2x256xf32> to vector<1x256xf32>
    %585 = vector.broadcast %583 : f32 to vector<1x256xf32>
    %586 = arith.mulf %585, %584 : vector<1x256xf32>
    %587 = arith.addf %582, %586 : vector<1x256xf32>
    %588 = vector.extract_strided_slice %2 {offsets = [6, 0], sizes = [1, 256], strides = [1, 1]} : vector<7x256xf32> to vector<1x256xf32>
    %589 = arith.mulf %587, %588 : vector<1x256xf32>
    %590 = arith.addf %577, %589 : vector<1x256xf32>
    %591 = vector.extract_strided_slice %55 {offsets = [0, 96], sizes = [2, 256], strides = [1, 1]} : vector<2x358xf32> to vector<2x256xf32>
    %c42 = arith.constant 42 : index
    %592 = memref.load %arg4[%c42] : memref<98xf32, #tpu.memory_space<smem>>
    %593 = vector.extract_strided_slice %591 {offsets = [0, 0], sizes = [1, 256], strides = [1, 1]} : vector<2x256xf32> to vector<1x256xf32>
    %594 = vector.broadcast %592 : f32 to vector<1x256xf32>
    %595 = arith.mulf %594, %593 : vector<1x256xf32>
    %c91 = arith.constant 91 : index
    %596 = memref.load %arg4[%c91] : memref<98xf32, #tpu.memory_space<smem>>
    %597 = vector.extract_strided_slice %591 {offsets = [1, 0], sizes = [1, 256], strides = [1, 1]} : vector<2x256xf32> to vector<1x256xf32>
    %598 = vector.broadcast %596 : f32 to vector<1x256xf32>
    %599 = arith.mulf %598, %597 : vector<1x256xf32>
    %600 = arith.addf %595, %599 : vector<1x256xf32>
    %601 = vector.extract_strided_slice %2 {offsets = [0, 0], sizes = [1, 256], strides = [1, 1]} : vector<7x256xf32> to vector<1x256xf32>
    %602 = arith.mulf %600, %601 : vector<1x256xf32>
    %603 = arith.addf %590, %602 : vector<1x256xf32>
    %604 = vector.extract_strided_slice %55 {offsets = [0, 97], sizes = [2, 256], strides = [1, 1]} : vector<2x358xf32> to vector<2x256xf32>
    %c43 = arith.constant 43 : index
    %605 = memref.load %arg4[%c43] : memref<98xf32, #tpu.memory_space<smem>>
    %606 = vector.extract_strided_slice %604 {offsets = [0, 0], sizes = [1, 256], strides = [1, 1]} : vector<2x256xf32> to vector<1x256xf32>
    %607 = vector.broadcast %605 : f32 to vector<1x256xf32>
    %608 = arith.mulf %607, %606 : vector<1x256xf32>
    %c92 = arith.constant 92 : index
    %609 = memref.load %arg4[%c92] : memref<98xf32, #tpu.memory_space<smem>>
    %610 = vector.extract_strided_slice %604 {offsets = [1, 0], sizes = [1, 256], strides = [1, 1]} : vector<2x256xf32> to vector<1x256xf32>
    %611 = vector.broadcast %609 : f32 to vector<1x256xf32>
    %612 = arith.mulf %611, %610 : vector<1x256xf32>
    %613 = arith.addf %608, %612 : vector<1x256xf32>
    %614 = vector.extract_strided_slice %2 {offsets = [1, 0], sizes = [1, 256], strides = [1, 1]} : vector<7x256xf32> to vector<1x256xf32>
    %615 = arith.mulf %613, %614 : vector<1x256xf32>
    %616 = arith.addf %603, %615 : vector<1x256xf32>
    %617 = vector.extract_strided_slice %55 {offsets = [0, 98], sizes = [2, 256], strides = [1, 1]} : vector<2x358xf32> to vector<2x256xf32>
    %c44 = arith.constant 44 : index
    %618 = memref.load %arg4[%c44] : memref<98xf32, #tpu.memory_space<smem>>
    %619 = vector.extract_strided_slice %617 {offsets = [0, 0], sizes = [1, 256], strides = [1, 1]} : vector<2x256xf32> to vector<1x256xf32>
    %620 = vector.broadcast %618 : f32 to vector<1x256xf32>
    %621 = arith.mulf %620, %619 : vector<1x256xf32>
    %c93 = arith.constant 93 : index
    %622 = memref.load %arg4[%c93] : memref<98xf32, #tpu.memory_space<smem>>
    %623 = vector.extract_strided_slice %617 {offsets = [1, 0], sizes = [1, 256], strides = [1, 1]} : vector<2x256xf32> to vector<1x256xf32>
    %624 = vector.broadcast %622 : f32 to vector<1x256xf32>
    %625 = arith.mulf %624, %623 : vector<1x256xf32>
    %626 = arith.addf %621, %625 : vector<1x256xf32>
    %627 = vector.extract_strided_slice %2 {offsets = [2, 0], sizes = [1, 256], strides = [1, 1]} : vector<7x256xf32> to vector<1x256xf32>
    %628 = arith.mulf %626, %627 : vector<1x256xf32>
    %629 = arith.addf %616, %628 : vector<1x256xf32>
    %630 = vector.extract_strided_slice %55 {offsets = [0, 99], sizes = [2, 256], strides = [1, 1]} : vector<2x358xf32> to vector<2x256xf32>
    %c45 = arith.constant 45 : index
    %631 = memref.load %arg4[%c45] : memref<98xf32, #tpu.memory_space<smem>>
    %632 = vector.extract_strided_slice %630 {offsets = [0, 0], sizes = [1, 256], strides = [1, 1]} : vector<2x256xf32> to vector<1x256xf32>
    %633 = vector.broadcast %631 : f32 to vector<1x256xf32>
    %634 = arith.mulf %633, %632 : vector<1x256xf32>
    %c94 = arith.constant 94 : index
    %635 = memref.load %arg4[%c94] : memref<98xf32, #tpu.memory_space<smem>>
    %636 = vector.extract_strided_slice %630 {offsets = [1, 0], sizes = [1, 256], strides = [1, 1]} : vector<2x256xf32> to vector<1x256xf32>
    %637 = vector.broadcast %635 : f32 to vector<1x256xf32>
    %638 = arith.mulf %637, %636 : vector<1x256xf32>
    %639 = arith.addf %634, %638 : vector<1x256xf32>
    %640 = arith.addf %629, %639 : vector<1x256xf32>
    %641 = vector.extract_strided_slice %55 {offsets = [0, 100], sizes = [2, 256], strides = [1, 1]} : vector<2x358xf32> to vector<2x256xf32>
    %c46 = arith.constant 46 : index
    %642 = memref.load %arg4[%c46] : memref<98xf32, #tpu.memory_space<smem>>
    %643 = vector.extract_strided_slice %641 {offsets = [0, 0], sizes = [1, 256], strides = [1, 1]} : vector<2x256xf32> to vector<1x256xf32>
    %644 = vector.broadcast %642 : f32 to vector<1x256xf32>
    %645 = arith.mulf %644, %643 : vector<1x256xf32>
    %c95 = arith.constant 95 : index
    %646 = memref.load %arg4[%c95] : memref<98xf32, #tpu.memory_space<smem>>
    %647 = vector.extract_strided_slice %641 {offsets = [1, 0], sizes = [1, 256], strides = [1, 1]} : vector<2x256xf32> to vector<1x256xf32>
    %648 = vector.broadcast %646 : f32 to vector<1x256xf32>
    %649 = arith.mulf %648, %647 : vector<1x256xf32>
    %650 = arith.addf %645, %649 : vector<1x256xf32>
    %651 = vector.extract_strided_slice %2 {offsets = [4, 0], sizes = [1, 256], strides = [1, 1]} : vector<7x256xf32> to vector<1x256xf32>
    %652 = arith.mulf %650, %651 : vector<1x256xf32>
    %653 = arith.addf %640, %652 : vector<1x256xf32>
    %654 = vector.extract_strided_slice %55 {offsets = [0, 101], sizes = [2, 256], strides = [1, 1]} : vector<2x358xf32> to vector<2x256xf32>
    %c47 = arith.constant 47 : index
    %655 = memref.load %arg4[%c47] : memref<98xf32, #tpu.memory_space<smem>>
    %656 = vector.extract_strided_slice %654 {offsets = [0, 0], sizes = [1, 256], strides = [1, 1]} : vector<2x256xf32> to vector<1x256xf32>
    %657 = vector.broadcast %655 : f32 to vector<1x256xf32>
    %658 = arith.mulf %657, %656 : vector<1x256xf32>
    %c96 = arith.constant 96 : index
    %659 = memref.load %arg4[%c96] : memref<98xf32, #tpu.memory_space<smem>>
    %660 = vector.extract_strided_slice %654 {offsets = [1, 0], sizes = [1, 256], strides = [1, 1]} : vector<2x256xf32> to vector<1x256xf32>
    %661 = vector.broadcast %659 : f32 to vector<1x256xf32>
    %662 = arith.mulf %661, %660 : vector<1x256xf32>
    %663 = arith.addf %658, %662 : vector<1x256xf32>
    %664 = vector.extract_strided_slice %2 {offsets = [5, 0], sizes = [1, 256], strides = [1, 1]} : vector<7x256xf32> to vector<1x256xf32>
    %665 = arith.mulf %663, %664 : vector<1x256xf32>
    %666 = arith.addf %653, %665 : vector<1x256xf32>
    %667 = vector.extract_strided_slice %55 {offsets = [0, 102], sizes = [2, 256], strides = [1, 1]} : vector<2x358xf32> to vector<2x256xf32>
    %c48 = arith.constant 48 : index
    %668 = memref.load %arg4[%c48] : memref<98xf32, #tpu.memory_space<smem>>
    %669 = vector.extract_strided_slice %667 {offsets = [0, 0], sizes = [1, 256], strides = [1, 1]} : vector<2x256xf32> to vector<1x256xf32>
    %670 = vector.broadcast %668 : f32 to vector<1x256xf32>
    %671 = arith.mulf %670, %669 : vector<1x256xf32>
    %c97 = arith.constant 97 : index
    %672 = memref.load %arg4[%c97] : memref<98xf32, #tpu.memory_space<smem>>
    %673 = vector.extract_strided_slice %667 {offsets = [1, 0], sizes = [1, 256], strides = [1, 1]} : vector<2x256xf32> to vector<1x256xf32>
    %674 = vector.broadcast %672 : f32 to vector<1x256xf32>
    %675 = arith.mulf %674, %673 : vector<1x256xf32>
    %676 = arith.addf %671, %675 : vector<1x256xf32>
    %677 = vector.extract_strided_slice %2 {offsets = [6, 0], sizes = [1, 256], strides = [1, 1]} : vector<7x256xf32> to vector<1x256xf32>
    %678 = arith.mulf %676, %677 : vector<1x256xf32>
    %679 = arith.addf %666, %678 : vector<1x256xf32>
    %680 = arith.negf %679 : vector<1x256xf32>
    %681 = math.exp %680 : vector<1x256xf32>
    %cst_22 = arith.constant 1.000000e+00 : f32
    %682 = vector.broadcast %cst_22 : f32 to vector<1x256xf32>
    %683 = arith.addf %682, %681 : vector<1x256xf32>
    %684 = arith.divf %682, %683 : vector<1x256xf32>
    %685 = vector.broadcast %684 : vector<1x256xf32> to vector<32x256xf32>
    %686 = arith.mulf %46, %685 : vector<32x256xf32>
    %c0_23 = arith.constant 0 : index
    %c0_24 = arith.constant 0 : index
    %c0_25 = arith.constant 0 : index
    %687 = vector.load %arg6[%c0_23, %c0_24, %c0_25] : memref<1x32x256xf32, #tpu.memory_space<vmem>>, vector<1x32x256xf32>
    %688 = vector.shape_cast %687 : vector<1x32x256xf32> to vector<32x256xf32>
    %689 = vector.shape_cast %686 : vector<32x256xf32> to vector<1x32x256xf32>
    tpu.vector_store %arg6[%c0_23, %c0_24, %c0_25], %689 {strides = array<i32>} : memref<1x32x256xf32, #tpu.memory_space<vmem>>, vector<1x32x256xf32>,
    return
  }
  func.func @transform_0(%arg0: i32) -> (i32, i32, i32) {
    %c0_i32 = arith.constant 0 : i32
    %c0_i32_0 = arith.constant 0 : i32
    %c0_i32_1 = arith.constant 0 : i32
    return %arg0, %c0_i32, %c0_i32_0 : i32, i32, i32
  }
  func.func @transform_1(%arg0: i32) -> (i32, i32) {
    %c0_i32 = arith.constant 0 : i32
    %c0_i32_0 = arith.constant 0 : i32
    %c0_i32_1 = arith.constant 0 : i32
    return %c0_i32, %c0_i32_0 : i32, i32
  }
  func.func @transform_2(%arg0: i32) -> (i32, i32) {
    %c0_i32 = arith.constant 0 : i32
    %c0_i32_0 = arith.constant 0 : i32
    %c0_i32_1 = arith.constant 0 : i32
    return %c0_i32, %c0_i32_0 : i32, i32
  }
  func.func @transform_3(%arg0: i32) -> i32 {
    %c0_i32 = arith.constant 0 : i32
    %c0_i32_0 = arith.constant 0 : i32
    return %c0_i32 : i32
  }
  func.func @transform_4(%arg0: i32) -> (i32, i32) {
    %c0_i32 = arith.constant 0 : i32
    %c0_i32_0 = arith.constant 0 : i32
    %c0_i32_1 = arith.constant 0 : i32
    return %c0_i32, %c0_i32_0 : i32, i32
  }
  func.func @transform_5(%arg0: i32) -> (i32, i32, i32) {
    %c0_i32 = arith.constant 0 : i32
    %c0_i32_0 = arith.constant 0 : i32
    %c0_i32_1 = arith.constant 0 : i32
    return %arg0, %c0_i32, %c0_i32_0 : i32, i32, i32
  }
}

</mosaic_0001>

<bundles_post_ra>
// kernel: _lambda_.1
= control target key start
LH: loop header
LB: loop body
LE: loop exit
PB: predicated region body
PF: predicated region fallthrough
CT: control target
= control target key end

     0   :  { %10 = vsyncpa [#allocation3], 0  ;;  %s3484_s18 = smov 0   ;;  %s5186_s0 = inlined_call_operand.vmem [shape: f32[2,32,256], index: 0, kind: input, shape index: {}]   ;;  %s5187_s1 = inlined_call_operand.vmem [shape: f32[32,2], index: 1, kind: input, shape index: {}]   ;;  %s5188_s2 = inlined_call_operand.vmem [shape: f32[32,2], index: 2, kind: input, shape index: {}]   ;;  %s5189_s3 = inlined_call_operand.vmem [shape: f32[98], index: 3, kind: input, shape index: {}]   ;;  %s5190_s4 = inlined_call_operand.vmem [shape: f32[7,256], index: 4, kind: input, shape index: {}]   ;;  %s5191_s5 = inlined_call_operand.vmem [shape: f32[2,32,256], index: 5, kind: output, shape index: {}]  }
   0x1 LB: > { %s3071_s19 = sadd.s32 4294967295, %s3362_s18   ;;  %p3073_p0 = scmp.ge.s32.totalorder %s3362_s18, 1  ;;  %s3362_s18 = sphi %s3484_s18, %s16_s18  }
   0x2   : > { %p157_p1 = scmp.lt.s32.totalorder %s3362_s18, 3  ;;  %s175_s22 = sshll.u32 %s5189_s3, 4  ;;  %s176_s22 = int_to_ptr.vmem [resolvable:$true] %s175_s22 }
   0x3   : > { %p3197_p3 = scmp.eq.s32.totalorder %s3071_s19, 0  ;;  %s3364_s23 = smov [#allocation2]  }
   0x4   : > { %p158_p2 = pnand %p3073_p0, %p157_p1 }
   0x6   : > { %p3193_p4 = pneg %p158_p2  ;;  %199 = sbr.rel (%p158_p2) target bundleno = 1489 (0x5d1), region = 40 }
   0x8   : > { %p3194_p5 = pnand %p3197_p3, %p3193_p4 }
   0xa   : > { %3196 = dma.vmem_to_smem (!%p3194_p5), %s176_s22, 16, %s3364_s23, [#allocation3]  }
   0xb   : > { %3357 = dma.done.wait (%p3197_p3), [#allocation3], 16  }
   0xc   : > { %3359 = vsyncadd (%p3197_p3), [#allocation3], 4294967280 }
   0xd   : > { %206 = sfence }
   0xe   : > { %p229_p6 = scmp.lt.s32.totalorder %s3071_s19, 1  ;;  %v3365_v0 = vmov 0   ;;  %v3366_v12 = vmov 1   ;;  %v239_v18 = vld [vmem:[%s5187_s1] sm:$0xff]  ;;  %v242_v19 = vld [vmem:[%s5187_s1 + $0x18] sm:$0xff]  ;;  %v241_v20 = vld [vmem:[%s5187_s1 + $0x10] sm:$0xff] }
   0xf   : > { %3297 = vset.pattern.permute.xlu2 %v3365_v0  ;;  %3298 = vset.pattern.permute.xlu1 %v3365_v0  ;;  %v244_v21 = vld [vmem:[%s5188_s2 + $0x8] sm:$0xff]  ;;  %v243_v22 = vld [vmem:[%s5188_s2] sm:$0xff]  ;;  %v245_v24 = vld [vmem:[%s5188_s2 + $0x10] sm:$0xff]  ;;  %s3367_s26 = smov 1   ;;  %s3369_s28 = smov 4   ;;  %v3373_v44 = vmov 256.0  }
  0x10   : > { %s5336_s19 = smov (!%p229_p6, %s3071_s19), 1  ;;  %3299 = vset.pattern.permute.xlu0 %v3366_v12  ;;  %v240_v23 = vld [vmem:[%s5187_s1 + $0x8] sm:$0xff]  ;;  %v246_v25 = vld [vmem:[%s5188_s2 + $0x18] sm:$0xff]  ;;  %v3562_v26 = vld [vmem:[%s5190_s4] sm:$0x7f]  ;;  %s3370_s29 = smov 5   ;;  %3305 = vrcp.f32 %v3373_v44 }
  0x11   : > { %s3187_s24 = sshll.u32 %s5336_s19, 6  ;;  %v3565_v27 = vrot.slane %v3562_v26, 1  ;;  %v3570_v28 = vld [vmem:[%s5190_s4 + $0x8] sm:$0x7f]  ;;  %v3583_v32 = vrot.slane %v3562_v26, 2  ;;  %v3586_v33 = vrot.slane %v3562_v26, 4 }
  0x12   : > { %s233_s27 = scalar_lea.vmem %s5186_s0, %s3187_s24  ;;  %v3574_v29 = vrot.slane %v3570_v28, 1  ;;  %v3578_v30 = vrot.slane %v3570_v28, 2  ;;  %v3592_v35 = vrot.slane %v3562_v26, 5  ;;  %v3598_v37 = vrot.slane %v3570_v28, 4  ;;  %s3371_s30 = smov 6  }
  0x13   : > { %v3503_v1 = vld [vmem:[%s233_s27 + $0x20] sm:$0xff]  ;;  %v3505_v2 = vld [vmem:[%s233_s27 + $0x28] sm:$0xff]  ;;  %v3517_v8 = vld [vmem:[%s233_s27 + $0x30] sm:$0xff]  ;;  %5245 = vst [vmem:[#allocation5_spill] sm:$0xff] %v3565_v27  ;;  %v3601_v38 = vrot.slane %v3570_v28, 5  ;;  %v3606_v40 = vrot.slane %v3570_v28, 6 }
  0x14   : > { %v3507_v3 = vld [vmem:[%s233_s27] sm:$0xff]  ;;  %v263_v4 = vadd.f32 %v3505_v2, %v3503_v1  ;;  %v3511_v5 = vld [vmem:[%s233_s27 + $0x8] sm:$0xff]  ;;  %v3519_v9 = vld [vmem:[%s233_s27 + $0x38] sm:$0xff]  ;;  %v286_v17 = vmax.f32 %v3503_v1, %v3505_v2  ;;  %5246 = vst [vmem:[#allocation6_spill] sm:$0xff] %v3574_v29  ;;  %v3610_v43 = vrot.slane %v3562_v26, 6  ;;  %s3372_s6 = smov 16  }
  0x15   : > { %v280_v6 = vmax.f32 %v3507_v3, %v3511_v5  ;;  %v257_v7 = vadd.f32 %v3511_v5, %v3507_v3  ;;  %v3521_v10 = vld [vmem:[%s233_s27 + $0x10] sm:$0xff]  ;;  %v3523_v11 = vld [vmem:[%s233_s27 + $0x18] sm:$0xff]  ;;  %v266_v13 = vadd.f32 %v3519_v9, %v3517_v8  ;;  %v289_v16 = vmax.f32 %v3517_v8, %v3519_v9  ;;  %5247 = vst [vmem:[#allocation7_spill] sm:$0xff] %v3578_v30  ;;  %s3368_s27 = smov 2   ;;  %s3374_s7 = smov 17  }
  0x16   : > { %264 = vadd.xlane.f32.xlu1 %v263_v4  ;;  %v283_v14 = vmax.f32 %v3521_v10, %v3523_v11  ;;  %v260_v15 = vadd.f32 %v3523_v11, %v3521_v10  ;;  %5248 = vst [vmem:[#allocation8_spill] sm:$0xff] %v3583_v32  ;;  %v3306_v47 = vpop.eup %3305  ;;  %s3375_s8 = smov 18   ;;  %s3376_s9 = smov 20   ;;  %vm292_vm1 = vcmask 7168   ;;  %vm321_vm2 = vcmask 15360  }
  0x17   : > { %281 = vmax.xlane.f32.xlu2 %v280_v6  ;;  %258 = vadd.xlane.f32.xlu0 %v257_v7  ;;  %5249 = vst [vmem:[#allocation9_spill] sm:$0xff] %v3586_v33  ;;  %v270_v49 = vmul.f32 256.0, %v3306_v47  ;;  %s3377_s10 = smov 21   ;;  %vm274_vm0 = vweird.f32 %v3306_v47  ;;  %s3378_s11 = smov 22  }
  0x18   : > { %5250 = vst [vmem:[#allocation10_spill] sm:$0xff] %v3592_v35  ;;  %s3379_s12 = smov 127   ;;  %s3380_s13 = smov 33  }
  0x19   : > { %5251 = vst [vmem:[#allocation11_spill] sm:$0xff] %v3598_v37  ;;  %v271_v52 = vsub.f32 1.0, %v270_v49  ;;  %s3381_s14 = smov 32   ;;  %s3382_s15 = smov 34  }
  0x1a   : > { %5252 = vst [vmem:[#allocation12_spill] sm:$0xff] %v3601_v38  ;;  %s3383_s16 = smov 37   ;;  %s3384_s17 = smov 36  }
  0x1b   : > { %5253 = vst [vmem:[#allocation13_spill] sm:$0xff] %v3606_v40  ;;  %v272_v54 = vmul.f32 %v3306_v47, %v271_v52  ;;  %s3385_s20 = smov 38   ;;  %s3386_s21 = smov 49  }
  0x1c   : > { %5254 = vst [vmem:[#allocation14_spill] sm:$0xff] %v3610_v43  ;;  %s3387_s22 = smov 48   ;;  %s3388_s23 = smov 50  }
  0x1d   : > { %v273_v56 = vadd.f32 %v3306_v47, %v272_v54  ;;  %s3389_s25 = smov 53  }
  0x1e   : > { %267 = vadd.xlane.f32.xlu1 %v266_v13 }
  0x1f   : > { %284 = vmax.xlane.f32.xlu2 %v283_v14  ;;  %261 = vadd.xlane.f32.xlu0 %v260_v15  ;;  %v275_v59 = vsel %vm274_vm0, %v3306_v47, %v273_v56 }
  0x26   : > { %290 = vmax.xlane.f32.xlu1 %v289_v16 }
  0x27   : > { %287 = vmax.xlane.f32.xlu0 %v286_v17 }
  0x37   : > { %299 = vperm.xlu2 %3297, %v239_v18  }
  0x3b   : > { %365 = vperm.xlu0 %3299, %v239_v18  }
  0x3f   : > { %314 = vperm.xlu2 %3297, %v242_v19   ;;  %309 = vperm.xlu1 %3298, %v241_v20  }
  0x43   : > { %403 = vperm.xlu0 %3299, %v244_v21  }
  0x47   : > { %338 = vperm.xlu2 %3297, %v243_v22   ;;  %343 = vperm.xlu1 %3298, %v244_v21  }
  0x4b   : > { %3302 = vset.pattern.permute.xlu0 %v3365_v0 }
  0x4c   : > { %304 = vperm.xlu0 %3302, %v240_v23  }
  0x4f   : > { %348 = vperm.xlu2 %3297, %v245_v24   ;;  %353 = vperm.xlu1 %3298, %v246_v25  }
  0x54   : > { %655 = vrot.lane.b32.xlu0 %v3574_v29, %s3367_s26 }
  0x57   : > { %3301 = vset.pattern.permute.xlu1 %v3366_v12  ;;  %3300 = vset.pattern.permute.xlu2 %v3366_v12 }
  0x58   : > { %373 = vperm.xlu1 %3301, %v241_v20   ;;  %369 = vperm.xlu2 %3300, %v240_v23  }
  0x5c   : > { %793 = vrot.lane.b32.xlu0 %v3586_v33, %s3369_s28 }
  0x60   : > { %399 = vperm.xlu1 %3301, %v243_v22   ;;  %377 = vperm.xlu2 %3300, %v242_v19  }
  0x64   : > { %847 = vrot.lane.b32.xlu0 %v3601_v38, %s3370_s29 }
  0x68   : > { %411 = vperm.xlu1 %3301, %v246_v25   ;;  %407 = vperm.xlu2 %3300, %v245_v24  }
  0x6c   : > { %947 = vrot.lane.b32.xlu0 %v3562_v26, %s3372_s6 }
  0x70   : > { %3304 = vset.pattern.permute.xlu1 %v3365_v0  ;;  %3303 = vset.pattern.permute.xlu2 %v3365_v0 }
  0x71   : > { %653 = vrot.lane.b32.xlu1 %v3565_v27, %s3367_s26  ;;  %704 = vrot.lane.b32.xlu2 %v3583_v32, %s3368_s27  ;;  %s3390_s26 = smov 52  }
  0x74   : > { %999 = vrot.lane.b32.xlu0 %v3574_v29, %s3374_s7 }
  0x79   : > { %706 = vrot.lane.b32.xlu1 %v3578_v30, %s3368_s27  ;;  %795 = vrot.lane.b32.xlu2 %v3598_v37, %s3369_s28  ;;  %s3391_s27 = smov 54   ;;  %s3392_s28 = smov 65  }
  0x7c   : > { %1135 = vrot.lane.b32.xlu0 %v3586_v33, %s3376_s9 }
  0x81   : > { %845 = vrot.lane.b32.xlu1 %v3592_v35, %s3370_s29  ;;  %897 = vrot.lane.b32.xlu2 %v3610_v43, %s3371_s30  ;;  %s3393_s29 = smov 64  }
  0x84   : > { %1187 = vrot.lane.b32.xlu0 %v3601_v38, %s3377_s10 }
  0x89   : > { %v265_v39 = vpop.xlane.xlu1 %264  ;;  %899 = vrot.lane.b32.xlu1 %v3606_v40, %s3371_s30  ;;  %949 = vrot.lane.b32.xlu2 %v3570_v28, %s3372_s6  ;;  %s3394_s30 = smov 66   ;;  %s3395_s6 = smov 69  }
  0x8a   : > { %v3580_v31 = vpop.xlane.xlu2 %281  ;;  %v259_v34 = vpop.xlane.xlu0 %258  ;;  %v278_v63 = vmul.f32 %v275_v59, %v265_v39 }
  0x8b   : > { %v276_v60 = vmul.f32 %v275_v59, %v259_v34 }
  0x8d   : > { %v293_v0 = vsel %vm292_vm1, %v276_v60, %v3580_v31 }
  0x91   : > { %v268_v45 = vpop.xlane.xlu1 %267  ;;  %997 = vrot.lane.b32.xlu1 %v3565_v27, %s3374_s7  ;;  %1047 = vrot.lane.b32.xlu2 %v3583_v32, %s3375_s8  ;;  %s3396_s7 = smov 68  }
  0x92   : > { %v3594_v36 = vpop.xlane.xlu2 %284  ;;  %v262_v42 = vpop.xlane.xlu0 %261  ;;  %v279_v6 = vmul.f32 %v275_v59, %v268_v45 }
  0x93   : > { %v277_v62 = vmul.f32 %v275_v59, %v262_v42 }
  0x95   : > { %v294_v13 = vsel %vm292_vm1, %v277_v62, %v3594_v36 }
  0x99   : > { %v291_v50 = vpop.xlane.xlu1 %290  ;;  %1049 = vrot.lane.b32.xlu1 %v3578_v30, %s3375_s8  ;;  %1137 = vrot.lane.b32.xlu2 %v3598_v37, %s3376_s9  ;;  %s3397_s8 = smov 70   ;;  %s3398_s9 = smov 81  }
  0x9a   : > { %v300_v41 = vpop.permute.xlu2 %299  ;;  %v288_v48 = vpop.xlane.xlu0 %287  ;;  %v296_v17 = vsel %vm292_vm1, %v279_v6, %v291_v50 }
  0x9b   : > { %v317_v4 = vmul.f32 %v300_v41, %v293_v0  ;;  %v295_v7 = vsel %vm292_vm1, %v278_v63, %v288_v48 }
  0x9d   : > { %v322_v18 = vsel %vm321_vm2, %v317_v4, 0.0 }
  0xa1   : > { %1185 = vrot.lane.b32.xlu1 %v3592_v35, %s3377_s10  ;;  %1235 = vrot.lane.b32.xlu2 %v3610_v43, %s3378_s11  ;;  %s3399_s10 = smov 80  }
  0xa2   : > { %v315_v46 = vpop.permute.xlu2 %314 }
  0xa3   : > { %v320_v19 = vmul.f32 %v315_v46, %v296_v17 }
  0xa5   : > { %v327_v25 = vsel %vm321_vm2, %v320_v19, 0.0 }
  0xa9   : > { %1237 = vrot.lane.b32.xlu1 %v3606_v40, %s3378_s11  ;;  %s3401_s11 = smov 51  }
  0xaa   : > { %v3617_v51 = vpop.permute.xlu2 %338 }
  0xad   : > { %v366_v53 = vpop.permute.xlu0 %365 }
  0xae   : > { %v380_v36 = vmul.f32 %v366_v53, %v293_v0 }
  0xb0   : > { %v384_v46 = vsel %vm321_vm2, %v380_v36, 0.0 }
  0xb1   : > { %v310_v55 = vpop.permute.xlu1 %309 }
  0xb2   : > { %v3623_v57 = vpop.permute.xlu2 %348  ;;  %v319_v15 = vmul.f32 %v310_v55, %v295_v7 }
  0xb4   : > { %v325_v23 = vsel %vm321_vm2, %v319_v15, 0.0 }
  0xb5   : > { %v3625_v58 = vpop.permute.xlu0 %403 }
  0xb9   : > { %v344_v61 = vpop.permute.xlu1 %343 }
  0xba   : > { %v370_v12 = vpop.permute.xlu2 %369 }
  0xbb   : > { %v381_v31 = vmul.f32 %v370_v12, %v294_v13 }
  0xbd   : > { %v385_v42 = vsel %vm321_vm2, %v381_v31, 0.0 }
  0xbe   : > { %v305_v14 = vpop.permute.xlu0 %304  ;;  %v386_v49 = vadd.f32 %v385_v42, %v384_v46 }
  0xbf   : > { %v318_v16 = vmul.f32 %v305_v14, %v294_v13 }
  0xc1   : > { %v323_v20 = vsel %vm321_vm2, %v318_v16, 0.0  ;;  %v354_v21 = vpop.permute.xlu1 %353 }
  0xc2   : > { %v324_v22 = vadd.f32 %v323_v20, %v322_v18  ;;  %v378_v41 = vpop.permute.xlu2 %377 }
  0xc3   : > { %v383_v47 = vmul.f32 %v378_v41, %v296_v17 }
  0xc4   : > { %v326_v24 = vadd.f32 %v325_v23, %v324_v22 }
  0xc5   : > { %v389_v56 = vsel %vm321_vm2, %v383_v47, 0.0 }
  0xc6   : > { %v328_v34 = vadd.f32 %v327_v25, %v326_v24  ;;  %v3691_v41 = vpop.permute.xlu0 %655 }
  0xc8   : > { %v329_v39 = vrot.slane %v328_v34, 4 }
  0xca   : > { %v330_v44 = vadd.f32 %v329_v39, %v328_v34  ;;  %v374_v45 = vpop.permute.xlu1 %373  ;;  %v408_v15 = vpop.permute.xlu2 %407 }
  0xcb   : > { %v382_v48 = vmul.f32 %v374_v45, %v295_v7 }
  0xcc   : > { %v331_v50 = vrot.slane %v330_v44, 2 }
  0xcd   : > { %v387_v52 = vsel %vm321_vm2, %v382_v48, 0.0 }
  0xce   : > { %v388_v54 = vadd.f32 %v387_v52, %v386_v49  ;;  %v332_v55 = vadd.f32 %v331_v50, %v330_v44  ;;  %v3703_v45 = vpop.permute.xlu0 %793 }
  0xd0   : > { %v390_v59 = vadd.f32 %v389_v56, %v388_v54  ;;  %v333_v60 = vrot.slane %v332_v55, 1 }
  0xd2   : > { %v391_v53 = vrot.slane %v390_v59, 4  ;;  %v334_v0 = vadd.f32 %v333_v60, %v332_v55  ;;  %v400_v13 = vpop.permute.xlu1 %399 }
  0xd4   : > { %v392_v62 = vadd.f32 %v391_v53, %v390_v59  ;;  %v335_v12 = vmax.f32 %v334_v0, 0.0 }
  0xd6   : > { %v393_v63 = vrot.slane %v392_v62, 2  ;;  %v356_v16 = vmul.f32 %v3617_v51, %v335_v12  ;;  %v358_v17 = vmul.f32 %v3623_v57, %v335_v12  ;;  %v357_v20 = vmul.f32 %v344_v61, %v335_v12  ;;  %v3713_v48 = vpop.permute.xlu0 %847 }
  0xd7   : > { %v359_v61 = vmul.f32 %v354_v21, %v335_v12  ;;  %v3671_v21 = vpop.permute.xlu2 %704 }
  0xd8   : > { %v394_v4 = vadd.f32 %v393_v63, %v392_v62 }
  0xda   : > { %v395_v6 = vrot.slane %v394_v4, 1  ;;  %v412_v51 = vpop.permute.xlu1 %411 }
  0xdc   : > { %v396_v14 = vadd.f32 %v395_v6, %v394_v4 }
  0xde   : > { %v397_v7 = vmax.f32 %v396_v14, 0.0  ;;  %v3723_v52 = vpop.permute.xlu0 %947 }
  0xdf   : > { %v3676_v31 = vpop.permute.xlu2 %795 }
  0xe0   : > { %v414_v18 = vmul.f32 %v400_v13, %v397_v7  ;;  %v416_v19 = vmul.f32 %v408_v15, %v397_v7  ;;  %v415_v22 = vmul.f32 %v3625_v58, %v397_v7  ;;  %v417_v57 = vmul.f32 %v412_v51, %v397_v7 }
  0xe2   : > { %v3648_v23 = vadd.f32 %v414_v18, %v356_v16  ;;  %v3650_v24 = vadd.f32 %v416_v19, %v358_v17  ;;  %v3652_v25 = vadd.f32 %v415_v22, %v357_v20  ;;  %v3660_v58 = vadd.f32 %v417_v57, %v359_v61 }
  0xe3   : > { %v3681_v34 = vpop.permute.xlu1 %653 }
  0xe4   : > { %430 = vrot.lane.b32.xlu1 %v3650_v24, %s3379_s12  ;;  %428 = vrot.lane.b32.xlu2 %v3652_v25, %s3379_s12 }
  0xe5   : > { %426 = vrot.lane.b32.xlu0 %v3648_v23, %s3379_s12 }
  0xe6   : > { %v3733_v56 = vpop.permute.xlu0 %999 }
  0xe7   : > { %v3684_v36 = vpop.permute.xlu2 %897 }
  0xeb   : > { %v3689_v39 = vpop.permute.xlu1 %706 }
  0xec   : > { %1335 = vrot.lane.b32.xlu1 %v3565_v27, %s3380_s13  ;;  %1287 = vrot.lane.b32.xlu2 %v3570_v28, %s3381_s14 }
  0xed   : > { %432 = vrot.lane.b32.xlu0 %v3660_v58, %s3379_s12 }
  0xee   : > { %v3743_v63 = vpop.permute.xlu0 %1135 }
  0xef   : > { %v3697_v42 = vpop.permute.xlu2 %949 }
  0xf3   : > { %v3699_v44 = vpop.permute.xlu1 %845 }
  0xf4   : > { %1387 = vrot.lane.b32.xlu1 %v3578_v30, %s3382_s15  ;;  %1385 = vrot.lane.b32.xlu2 %v3583_v32, %s3382_s15  ;;  %s3091_s15 = sld [smem:[#allocation2 + $0x3]] }
  0xf5   : > { %1285 = vrot.lane.b32.xlu0 %v3562_v26, %s3381_s14 }
  0xf6   : > { %v3753_v12 = vpop.permute.xlu0 %1187 }
  0xf7   : > { %v3706_v46 = vpop.permute.xlu2 %1047 }
  0xfb   : > { %v3711_v47 = vpop.permute.xlu1 %899 }
  0xfc   : > { %1523 = vrot.lane.b32.xlu1 %v3592_v35, %s3383_s16  ;;  %1475 = vrot.lane.b32.xlu2 %v3598_v37, %s3384_s17 }
  0xfd   : > { %1337 = vrot.lane.b32.xlu0 %v3574_v29, %s3380_s13  ;;  %s3092_s13 = sld [smem:[#allocation2 + $0x34]] }
  0xff   : > { %v3715_v49 = vpop.permute.xlu2 %1137 }
 0x103   : > { %v3721_v50 = vpop.permute.xlu1 %997 }
 0x104   : > { %1575 = vrot.lane.b32.xlu1 %v3606_v40, %s3385_s20  ;;  %1573 = vrot.lane.b32.xlu2 %v3610_v43, %s3385_s20  ;;  %s3402_s20 = smov 125  }
 0x105   : > { %1473 = vrot.lane.b32.xlu0 %v3586_v33, %s3384_s17  ;;  %s3105_s17 = sld [smem:[#allocation2 + $0xa]] }
 0x107   : > { %v3725_v54 = vpop.permute.xlu2 %1235 }
 0x10b   : > { %v3731_v55 = vpop.permute.xlu1 %1049 }
 0x10c   : > { %1673 = vrot.lane.b32.xlu1 %v3565_v27, %s3386_s21  ;;  %1625 = vrot.lane.b32.xlu2 %v3570_v28, %s3387_s22 }
 0x10d   : > { %1525 = vrot.lane.b32.xlu0 %v3601_v38, %s3383_s16  ;;  %s3106_s16 = sld [smem:[#allocation2 + $0x3b]] }
 0x113   : > { %v3739_v62 = vpop.permute.xlu1 %1185 }
 0x114   : > { %1725 = vrot.lane.b32.xlu1 %v3578_v30, %s3388_s23  ;;  %1723 = vrot.lane.b32.xlu2 %v3583_v32, %s3388_s23  ;;  %s3120_s23 = sld [smem:[#allocation2 + $0x42]] }
 0x115   : > { %1623 = vrot.lane.b32.xlu0 %v3562_v26, %s3387_s22 }
 0x11b   : > { %v3751_v6 = vpop.permute.xlu1 %1237 }
 0x11c   : > { %1861 = vrot.lane.b32.xlu1 %v3592_v35, %s3389_s25  ;;  %1813 = vrot.lane.b32.xlu2 %v3598_v37, %s3390_s26 }
 0x11d   : > { %1675 = vrot.lane.b32.xlu0 %v3574_v29, %s3386_s21  ;;  %s3119_s21 = sld [smem:[#allocation2 + $0x11]] }
 0x124   : > { %1913 = vrot.lane.b32.xlu1 %v3606_v40, %s3391_s27  ;;  %1911 = vrot.lane.b32.xlu2 %v3610_v43, %s3391_s27  ;;  %s3134_s27 = sld [smem:[#allocation2 + $0x49]] }
 0x125   : > { %1811 = vrot.lane.b32.xlu0 %v3586_v33, %s3390_s26  ;;  %s3404_s26 = smov 93  }
 0x12c   : > { %2010 = vrot.lane.b32.xlu1 %v3565_v27, %s3392_s28  ;;  %1963 = vrot.lane.b32.xlu2 %v3570_v28, %s3393_s29 }
 0x12d   : > { %1863 = vrot.lane.b32.xlu0 %v3601_v38, %s3389_s25  ;;  %s3403_s25 = smov 109  }
 0x134   : > { %2062 = vrot.lane.b32.xlu1 %v3578_v30, %s3394_s30  ;;  %2060 = vrot.lane.b32.xlu2 %v3583_v32, %s3394_s30  ;;  %s3405_s30 = smov 77  }
 0x135   : > { %1961 = vrot.lane.b32.xlu0 %v3562_v26, %s3393_s29 }
 0x13c   : > { %2198 = vrot.lane.b32.xlu1 %v3592_v35, %s3395_s6  ;;  %2150 = vrot.lane.b32.xlu2 %v3598_v37, %s3396_s7 }
 0x13d   : > { %2012 = vrot.lane.b32.xlu0 %v3574_v29, %s3392_s28  ;;  %s3133_s28 = sld [smem:[#allocation2 + $0x18]] }
 0x13e   : > { %v429_v59 = vpop.permute.xlu2 %428 }
 0x13f   : > { %v439_v53 = vadd.f32 %v429_v59, %v3652_v25 }
 0x141   : > { %v3083_v60 = vmul.f32 -1.442695, %v439_v53 }
 0x143   : > { %3307 = vpow2.f32 %v3083_v60 }
 0x144   : > { %2250 = vrot.lane.b32.xlu1 %v3606_v40, %s3397_s8  ;;  %2248 = vrot.lane.b32.xlu2 %v3610_v43, %s3397_s8  ;;  %s3088_s8 = sld [smem:[#allocation2 + $0x32]] }
 0x145   : > { %2148 = vrot.lane.b32.xlu0 %v3586_v33, %s3396_s7  ;;  %s3148_s7 = sld [smem:[#allocation2 + $0x50]] }
 0x146   : > { %v3757_v17 = vpop.permute.xlu2 %1287 }
 0x149   : > { %v3308_v0 = vpop.eup %3307 }
 0x14a   : > { %v455_v4 = vadd.f32 1.0, %v3308_v0 }
 0x14c   : > { %3309 = vrcp.f32 %v455_v4  ;;  %2346 = vrot.lane.b32.xlu1 %v3565_v27, %s3398_s9  ;;  %2300 = vrot.lane.b32.xlu2 %v3570_v28, %s3399_s10  ;;  %v484_v16 = vand.u32 2147483648, %v455_v4  ;;  %v482_v20 = vand.u32 2147483647, %v455_v4  ;;  %vm478_vm4 = vweird.f32 %v455_v4 }
 0x14d   : > { %2200 = vrot.lane.b32.xlu0 %v3601_v38, %s3395_s6  ;;  %s3147_s6 = sld [smem:[#allocation2 + $0x1f]] }
 0x14e   : > { %v485_v61 = vor.u32 1.1754944e-38, %v484_v16  ;;  %vm483_vm6 = vcmp.eq.f32.partialorder %v482_v20, 8.507059e+37  ;;  %v3766_v60 = vpop.permute.xlu2 %1385 }
 0x152   : > { %v3310_v13 = vpop.eup %3309 }
 0x153   : > { %v474_v14 = vmul.f32 %v3310_v13, %v455_v4  ;;  %vm479_vm3 = vweird.f32 %v3310_v13 }
 0x154   : > { %vm480_vm5 = vmor %vm478_vm4, %vm479_vm3 }
 0x155   : > { %v475_v7 = vsub.f32 1.0, %v474_v14  ;;  %2298 = vrot.lane.b32.xlu0 %v3562_v26, %s3399_s10 }
 0x156   : > { %v431_v15 = vpop.permute.xlu1 %430 }
 0x157   : > { %v440_v18 = vadd.f32 %v431_v15, %v3650_v24  ;;  %v427_v19 = vpop.permute.xlu0 %426  ;;  %v476_v28 = vmul.f32 %v3310_v13, %v475_v7 }
 0x158   : > { %v438_v22 = vadd.f32 %v427_v19, %v3648_v23  ;;  %v3772_v19 = vpop.permute.xlu2 %1475 }
 0x159   : > { %v3084_v25 = vmul.f32 -1.442695, %v440_v18  ;;  %v477_v51 = vadd.f32 %v3310_v13, %v476_v28 }
 0x15a   : > { %v3082_v57 = vmul.f32 -1.442695, %v438_v22 }
 0x15b   : > { %3311 = vpow2.f32 %v3084_v25  ;;  %v481_v26 = vsel %vm480_vm5, %v3310_v13, %v477_v51 }
 0x15c   : > { %3313 = vpow2.f32 %v3082_v57  ;;  %v486_v59 = vsel %vm483_vm6, %v485_v61, %v481_v26  ;;  %vm591_vm6 = vcmask 1040384  }
 0x15d   : > { %525 = vperm.xlu1 %3304, %v486_v59   ;;  %2348 = vrot.lane.b32.xlu0 %v3574_v29, %s3398_s9  ;;  %s3090_s9 = sld [smem:[#allocation2 + $0x33]] }
 0x15e   : > { %v3763_v53 = vpop.permute.xlu1 %1335 }
 0x15f   : > { %v433_v24 = vpop.permute.xlu0 %432 }
 0x160   : > { %v441_v23 = vadd.f32 %v433_v24, %v3660_v58  ;;  %v3778_v27 = vpop.permute.xlu2 %1573 }
 0x161   : > { %v3312_v0 = vpop.eup %3311  ;;  %5255 = vst [vmem:[#allocation15_spill] sm:$0xff] %v3778_v27 }
 0x162   : > { %v3314_v4 = vpop.eup %3313  ;;  %v456_v14 = vadd.f32 1.0, %v3312_v0  ;;  %v3085_v7 = vmul.f32 -1.442695, %v441_v23 }
 0x163   : > { %v454_v15 = vadd.f32 1.0, %v3314_v4 }
 0x164   : > { %3315 = vrcp.f32 %v456_v14  ;;  %v497_v57 = vand.u32 2147483647, %v456_v14  ;;  %v499_v61 = vand.u32 2147483648, %v456_v14  ;;  %vm493_vm9 = vweird.f32 %v456_v14 }
 0x165   : > { %3317 = vrcp.f32 %v454_v15  ;;  %v469_v24 = vand.u32 2147483648, %v454_v15  ;;  %v467_v4 = vand.u32 2147483647, %v454_v15  ;;  %vm463_vm11 = vweird.f32 %v454_v15 }
 0x166   : > { %3319 = vpow2.f32 %v3085_v7  ;;  %v3770_v16 = vpop.permute.xlu1 %1387  ;;  %v500_v29 = vor.u32 1.1754944e-38, %v499_v61  ;;  %vm498_vm12 = vcmp.eq.f32.partialorder %v497_v57, 8.507059e+37 }
 0x167   : > { %v3768_v13 = vpop.permute.xlu0 %1285  ;;  %vm468_vm14 = vcmp.eq.f32.partialorder %v467_v4, 8.507059e+37 }
 0x16a   : > { %v3316_v18 = vpop.eup %3315 }
 0x16b   : > { %v3318_v28 = vpop.eup %3317  ;;  %v489_v20 = vmul.f32 %v3316_v18, %v456_v14  ;;  %vm494_vm7 = vweird.f32 %v3316_v18 }
 0x16c   : > { %v3320_v58 = vpop.eup %3319  ;;  %v459_v22 = vmul.f32 %v3318_v28, %v454_v15  ;;  %vm464_vm8 = vweird.f32 %v3318_v28  ;;  %vm495_vm10 = vmor %vm493_vm9, %vm494_vm7  ;;  %vm600_vm7 = vcmask 416768   ;;  %vm901_vm9 = vcmask 48128  }
 0x16d   : > { %v457_v25 = vadd.f32 1.0, %v3320_v58  ;;  %v490_v51 = vsub.f32 1.0, %v489_v20  ;;  %vm465_vm13 = vmor %vm463_vm11, %vm464_vm8  ;;  %v470_v20 = vor.u32 1.1754944e-38, %v469_v24  ;;  %vm797_vm8 = vcmask 31744  }
 0x16e   : > { %v460_v26 = vsub.f32 1.0, %v459_v22  ;;  %v3776_v22 = vpop.permute.xlu1 %1523  ;;  %vm1189_vm11 = vcmask 171008  }
 0x16f   : > { %3321 = vrcp.f32 %v457_v25  ;;  %v491_v59 = vmul.f32 %v3316_v18, %v490_v51  ;;  %v3774_v23 = vpop.permute.xlu0 %1337  ;;  %v514_v15 = vand.u32 2147483648, %v457_v25  ;;  %v512_v57 = vand.u32 2147483647, %v457_v25 }
 0x170   : > { %v461_v0 = vmul.f32 %v3318_v28, %v460_v26  ;;  %vm508_vm0 = vweird.f32 %v457_v25 }
 0x171   : > { %v492_v7 = vadd.f32 %v3316_v18, %v491_v59  ;;  %vm513_vm4 = vcmp.eq.f32.partialorder %v512_v57, 8.507059e+37 }
 0x172   : > { %v462_v43 = vadd.f32 %v3318_v28, %v461_v0  ;;  %v3784_v0 = vpop.permute.xlu2 %1625 }
 0x173   : > { %v496_v58 = vsel %vm495_vm10, %v3316_v18, %v492_v7  ;;  %5256 = vst [vmem:[#allocation16_spill] sm:$0xff] %v3784_v0  ;;  %vm951_vm10 = vcmask 130048  }
 0x174   : > { %v501_v51 = vsel %vm498_vm12, %v500_v29, %v496_v58  ;;  %v466_v38 = vsel %vm465_vm13, %v3318_v28, %v462_v43  ;;  %v515_v29 = vor.u32 1.1754944e-38, %v514_v15  ;;  %vm1051_vm12 = vcmask 146432  }
 0x175   : > { %v3322_v26 = vpop.eup %3321  ;;  %530 = vperm.xlu0 %3302, %v501_v51   ;;  %v471_v40 = vsel %vm468_vm14, %v470_v20, %v466_v38  ;;  %vm1139_vm13 = vcmask 162816   ;;  %vm1339_vm14 = vcmask 269312  }
 0x176   : > { %520 = vperm.xlu2 %3303, %v471_v40   ;;  %v504_v14 = vmul.f32 %v3322_v26, %v457_v25  ;;  %vm509_vm15 = vweird.f32 %v3322_v26  ;;  %v3782_v43 = vpop.permute.xlu1 %1575 }
 0x177   : > { %v3780_v59 = vpop.permute.xlu0 %1473  ;;  %vm510_vm3 = vmor %vm508_vm0, %vm509_vm15  ;;  %vm1239_vm15 = vcmask 179200   ;;  %vm1289_vm0 = vcmask 261120  }
 0x178   : > { %v505_v61 = vsub.f32 1.0, %v504_v14 }
 0x17a   : > { %v506_v18 = vmul.f32 %v3322_v26, %v505_v61  ;;  %v3792_v58 = vpop.permute.xlu2 %1723 }
 0x17b   : > { %5258 = vst [vmem:[#allocation18_spill] sm:$0xff] %v3792_v58 }
 0x17c   : > { %v507_v24 = vadd.f32 %v3322_v26, %v506_v18 }
 0x17e   : > { %v511_v28 = vsel %vm510_vm3, %v3322_v26, %v507_v24  ;;  %v3788_v4 = vpop.permute.xlu1 %1673  ;;  %vm1527_vm3 = vcmask 302080  }
 0x17f   : > { %v516_v38 = vsel %vm513_vm4, %v515_v29, %v511_v28  ;;  %v3786_v40 = vpop.permute.xlu0 %1525  ;;  %5257 = vst [vmem:[#allocation17_spill] sm:$0xff] %v3788_v4  ;;  %vm724_vm4 = vcmask 1031168  }
 0x180   : > { %535 = vperm.xlu2 %3303, %v516_v38  }
 0x182   : > { %v3798_v51 = vpop.permute.xlu2 %1813 }
 0x183   : > { %5260 = vst [vmem:[#allocation20_spill] sm:$0xff] %v3798_v51 }
 0x186   : > { %v3796_v25 = vpop.permute.xlu1 %1725 }
 0x187   : > { %v3790_v7 = vpop.permute.xlu0 %1623  ;;  %5259 = vst [vmem:[#allocation19_spill] sm:$0xff] %v3796_v25 }
 0x18a   : > { %v3804_v61 = vpop.permute.xlu2 %1911 }
 0x18b   : > { %5263 = vst [vmem:[#allocation23_spill] sm:$0xff] %v3804_v61 }
 0x18e   : > { %v3802_v14 = vpop.permute.xlu1 %1861 }
 0x18f   : > { %v3794_v20 = vpop.permute.xlu0 %1675  ;;  %5262 = vst [vmem:[#allocation22_spill] sm:$0xff] %v3802_v14 }
 0x192   : > { %v3810_v57 = vpop.permute.xlu2 %1963 }
 0x193   : > { %5266 = vst [vmem:[#allocation26_spill] sm:$0xff] %v3810_v57 }
 0x196   : > { %v3808_v18 = vpop.permute.xlu1 %1913 }
 0x197   : > { %v3800_v26 = vpop.permute.xlu0 %1811  ;;  %5265 = vst [vmem:[#allocation25_spill] sm:$0xff] %v3808_v18 }
 0x198   : > { %5261 = vst [vmem:[#allocation21_spill] sm:$0xff] %v3800_v26 }
 0x19a   : > { %v3816_v28 = vpop.permute.xlu2 %2060 }
 0x19b   : > { %5269 = vst [vmem:[#allocation29_spill] sm:$0xff] %v3816_v28 }
 0x19e   : > { %v3814_v29 = vpop.permute.xlu1 %2010 }
 0x19f   : > { %v3806_v15 = vpop.permute.xlu0 %1863  ;;  %5268 = vst [vmem:[#allocation28_spill] sm:$0xff] %v3814_v29 }
 0x1a0   : > { %5264 = vst [vmem:[#allocation24_spill] sm:$0xff] %v3806_v15 }
 0x1a2   : > { %v3822_v37 = vpop.permute.xlu2 %2150 }
 0x1a3   : > { %5272 = vst [vmem:[#allocation32_spill] sm:$0xff] %v3822_v37 }
 0x1a6   : > { %v3820_v35 = vpop.permute.xlu1 %2062 }
 0x1a7   : > { %v3812_v24 = vpop.permute.xlu0 %1961  ;;  %5271 = vst [vmem:[#allocation31_spill] sm:$0xff] %v3820_v35  ;;  %v3400_v35 = vmov 32.0  }
 0x1a8   : > { %5267 = vst [vmem:[#allocation27_spill] sm:$0xff] %v3812_v24  ;;  %3323 = vrcp.f32 %v3400_v35 }
 0x1aa   : > { %v3828_v30 = vpop.permute.xlu2 %2248 }
 0x1ab   : > { %5275 = vst [vmem:[#allocation35_spill] sm:$0xff] %v3828_v30 }
 0x1ae   : > { %v3826_v32 = vpop.permute.xlu1 %2198 }
 0x1af   : > { %v3818_v38 = vpop.permute.xlu0 %2012  ;;  %5274 = vst [vmem:[#allocation34_spill] sm:$0xff] %v3826_v32  ;;  %v3324_v32 = vpop.eup %3323 }
 0x1b0   : > { %5270 = vst [vmem:[#allocation30_spill] sm:$0xff] %v3818_v38  ;;  %vm569_vm5 = vweird.f32 %v3324_v32 }
 0x1b2   : > { %v3834_v24 = vpop.permute.xlu2 %2300 }
 0x1b3   : > { %5278 = vst [vmem:[#allocation38_spill] sm:$0xff] %v3834_v24 }
 0x1b6   : > { %v3832_v57 = vpop.permute.xlu1 %2250 }
 0x1b7   : > { %v3824_v33 = vpop.permute.xlu0 %2148  ;;  %5277 = vst [vmem:[#allocation37_spill] sm:$0xff] %v3832_v57  ;;  %v565_v57 = vmul.f32 32.0, %v3324_v32 }
 0x1b8   : > { %5273 = vst [vmem:[#allocation33_spill] sm:$0xff] %v3824_v33 }
 0x1b9   : > { %v566_v18 = vsub.f32 1.0, %v565_v57 }
 0x1be   : > { %v3838_v28 = vpop.permute.xlu1 %2346 }
 0x1bf   : > { %v3830_v61 = vpop.permute.xlu0 %2200  ;;  %5280 = vst [vmem:[#allocation40_spill] sm:$0xff] %v3838_v28 }
 0x1c0   : > { %5276 = vst [vmem:[#allocation36_spill] sm:$0xff] %v3830_v61 }
 0x1c7   : > { %v3836_v29 = vpop.permute.xlu0 %2298 }
 0x1c8   : > { %5279 = vst [vmem:[#allocation39_spill] sm:$0xff] %v3836_v29 }
 0x1cf   : > { %v3840_v37 = vpop.permute.xlu0 %2348  ;;  %v526_v33 = vpop.permute.xlu1 %525 }
 0x1d0   : > { %v521_v38 = vpop.permute.xlu2 %520  ;;  %5281 = vst [vmem:[#allocation41_spill] sm:$0xff] %v3840_v37  ;;  %v3843_v30 = vmul.f32 %v526_v33, %v3521_v10  ;;  %v3846_v61 = vmul.f32 %v526_v33, %v3523_v11 }
 0x1d1   : > { %v3849_v24 = vmul.f32 %v521_v38, %v3507_v3  ;;  %v3852_v29 = vmul.f32 %v521_v38, %v3511_v5 }
 0x1d2   : > { %5282 = vst [vmem:[#allocation42_spill] sm:$0xff] %v3843_v30 }
 0x1d3   : > { %5283 = vst [vmem:[#allocation43_spill] sm:$0xff] %v3846_v61  ;;  %v546_v10 = vadd.f32 %v3843_v30, %v3849_v24  ;;  %v555_v11 = vadd.f32 %v3846_v61, %v3852_v29 }
 0x1d4   : > { %5284 = vst [vmem:[#allocation44_spill] sm:$0xff] %v3849_v24 }
 0x1d5   : > { %5285 = vst [vmem:[#allocation45_spill] sm:$0xff] %v3852_v29 }
 0x1da   : > { %v536_v51 = vpop.permute.xlu2 %535 }
 0x1db   : > { %v3855_v28 = vmul.f32 %v536_v51, %v3517_v8  ;;  %v3858_v35 = vmul.f32 %v536_v51, %v3519_v9 }
 0x1dd   : > { %5286 = vst [vmem:[#allocation46_spill] sm:$0xff] %v3855_v28  ;;  %v574_v8 = vmax.f32 %v3843_v30, %v3855_v28  ;;  %v583_v9 = vmax.f32 %v3846_v61, %v3858_v35 }
 0x1de   : > { %5287 = vst [vmem:[#allocation47_spill] sm:$0xff] %v3858_v35 }
 0x1e7   : > { %v531_v37 = vpop.permute.xlu0 %530 }
 0x1e8   : > { %v3865_v3 = vmul.f32 %v531_v37, %v3503_v1  ;;  %v3868_v5 = vmul.f32 %v531_v37, %v3505_v2 }
 0x1ea   : > { %5288 = vst [vmem:[#allocation48_spill] sm:$0xff] %v3865_v3  ;;  %v547_v33 = vadd.f32 %v546_v10, %v3865_v3  ;;  %v556_v51 = vadd.f32 %v555_v11, %v3868_v5  ;;  %v573_v38 = vmax.f32 %v3849_v24, %v3865_v3  ;;  %v582_v1 = vmax.f32 %v3852_v29, %v3868_v5 }
 0x1eb   : > { %5289 = vst [vmem:[#allocation49_spill] sm:$0xff] %v3868_v5  ;;  %v567_v10 = vmul.f32 %v3324_v32, %v566_v18 }
 0x1ec   : > { %v548_v2 = vadd.f32 %v547_v33, %v3855_v28  ;;  %v557_v37 = vadd.f32 %v556_v51, %v3858_v35  ;;  %v575_v58 = vmax.f32 %v573_v38, %v574_v8  ;;  %v584_v30 = vmax.f32 %v582_v1, %v583_v9 }
 0x1ed   : > { %v568_v57 = vadd.f32 %v3324_v32, %v567_v10 }
 0x1ee   : > { %v549_v14 = vrot.slane %v548_v2, 4  ;;  %v558_v15 = vrot.slane %v557_v37, 4  ;;  %v576_v61 = vrot.slane %v575_v58, 4  ;;  %v585_v26 = vrot.slane %v584_v30, 4 }
 0x1ef   : > { %v570_v28 = vsel %vm569_vm5, %v3324_v32, %v568_v57  ;;  %v737_v32 = vstv %s3092_s13  ;;  %v3891_v57 = vstv %s3119_s21  ;;  %s3089_s13 = sld [smem:[#allocation2 + $0x2]]  ;;  %vm1389_vm5 = vcmask 277504  }
 0x1f0   : > { %v550_v0 = vadd.f32 %v549_v14, %v548_v2  ;;  %v559_v11 = vadd.f32 %v558_v15, %v557_v37  ;;  %v586_v25 = vmax.f32 %v584_v30, %v585_v26  ;;  %v577_v27 = vmax.f32 %v575_v58, %v576_v61  ;;  %s3098_s21 = sld [smem:[#allocation2 + $0x37]] }
 0x1f2   : > { %v560_v3 = vrot.slane %v559_v11, 2  ;;  %v587_v24 = vrot.slane %v586_v25, 2  ;;  %v551_v4 = vrot.slane %v550_v0, 2  ;;  %v578_v5 = vrot.slane %v577_v27, 2 }
 0x1f4   : > { %v561_v33 = vadd.f32 %v560_v3, %v559_v11  ;;  %v588_v29 = vmax.f32 %v586_v25, %v587_v24  ;;  %v552_v51 = vadd.f32 %v551_v4, %v550_v0  ;;  %v579_v8 = vmax.f32 %v577_v27, %v578_v5 }
 0x1f5   : > { %v732_v4 = vstv %s3091_s15  ;;  %v1076_v3 = vstv %s3105_s17  ;;  %s3406_s15 = smov 61   ;;  %s3093_s17 = sld [smem:[#allocation2 + $0x4]] }
 0x1f6   : > { %v562_v9 = vrot.slane %v561_v33, 1  ;;  %v589_v38 = vrot.slane %v588_v29, 1  ;;  %v553_v1 = vrot.slane %v552_v51, 1  ;;  %v580_v35 = vrot.slane %v579_v8, 1 }
 0x1f8   : > { %v563_v18 = vadd.f32 %v562_v9, %v561_v33  ;;  %v554_v14 = vadd.f32 %v553_v1, %v552_v51  ;;  %v590_v58 = vmax.f32 %v588_v29, %v589_v38  ;;  %v581_v61 = vmax.f32 %v579_v8, %v580_v35 }
 0x1f9   : > { %v1081_v35 = vstv %s3106_s16  ;;  %v1419_v33 = vstv %s3120_s23  ;;  %v3897_v1 = vstv %s3134_s27  ;;  %s3094_s16 = sld [smem:[#allocation2 + $0x35]] }
 0x1fa   : > { %v572_v30 = vmul.f32 %v570_v28, %v563_v18  ;;  %v571_v26 = vmul.f32 %v570_v28, %v554_v14  ;;  %v3899_v18 = vstv %s3133_s28  ;;  %s3095_s23 = sld [smem:[#allocation2 + $0x5]]  ;;  %s3408_s28 = smov 124  }
 0x1fb   : > { %s3100_s27 = sld [smem:[#allocation2 + $0x38]] }
 0x1fc   : > { %v593_v15 = vsel %vm591_vm6, %v572_v30, %v590_v58  ;;  %v592_v2 = vsel %vm591_vm6, %v571_v26, %v581_v61  ;;  %vm1477_vm6 = vcmask 293888  }
 0x1fd   : > { %598 = vrot.lane.b32.xlu2 %v593_v15, %s3401_s11  ;;  %596 = vrot.lane.b32.xlu1 %v592_v2, %s3401_s11  ;;  %s3087_s11 = sld [smem:[#allocation2 + $0x1]] }
 0x257   : > { %v599_v27 = vpop.permute.xlu2 %598 }
 0x258   : > { %v3883_v0 = vsel %vm600_vm7, %v599_v27, 0.0 }
 0x259   : > { %v740_v25 = vmul.f32 %v737_v32, %v3883_v0  ;;  %v735_v24 = vmul.f32 %v732_v4, %v3883_v0  ;;  %v1084_v5 = vmul.f32 %v1081_v35, %v3883_v0  ;;  %v1079_v37 = vmul.f32 %v1076_v3, %v3883_v0 }
 0x25a   : > { %v1422_v51 = vmul.f32 %v1419_v33, %v3883_v0  ;;  %v1417_v8 = vmul.f32 %v3891_v57, %v3883_v0  ;;  %v1760_v14 = vmul.f32 %v3897_v1, %v3883_v0  ;;  %v1755_v30 = vmul.f32 %v3899_v18, %v3883_v0 }
 0x25b   : > { %v746_v29 = vrot.slane %v740_v25, 1  ;;  %v1090_v10 = vrot.slane %v1084_v5, 1 }
 0x25c   : > { %v1428_v9 = vrot.slane %v1422_v51, 1  ;;  %v1766_v58 = vrot.slane %v1760_v14, 1  ;;  %v3918_v51 = vstv %s3147_s6  ;;  %s3166_s6 = sld [smem:[#allocation2 + $0x59]] }
 0x25d   : > { %v752_v28 = vadd.f32 %v746_v29, %v735_v24  ;;  %v1096_v11 = vadd.f32 %v1090_v10, %v1079_v37 }
 0x25e   : > { %v1434_v38 = vadd.f32 %v1428_v9, %v1417_v8  ;;  %v1772_v26 = vadd.f32 %v1766_v58, %v1755_v30  ;;  %v2094_v8 = vstv %s3148_s7  ;;  %s3165_s7 = sld [smem:[#allocation2 + $0x28]] }
 0x25f   : > { %760 = vrot.lane.b32.xlu1 %v752_v28, %s3402_s20  ;;  %v2097_v9 = vmul.f32 %v2094_v8, %v3883_v0 }
 0x261   : > { %v2103_v14 = vrot.slane %v2097_v9, 1 }
 0x267   : > { %1104 = vrot.lane.b32.xlu1 %v1096_v11, %s3403_s25 }
 0x26f   : > { %1442 = vrot.lane.b32.xlu1 %v1434_v38, %s3404_s26  ;;  %v597_v61 = vpop.permute.xlu1 %596  ;;  %v3922_v38 = vstv %s3088_s8  ;;  %s3102_s8 = sld [smem:[#allocation2 + $0x39]] }
 0x270   : > { %v3907_v15 = vsel %vm600_vm7, 0.0, %v597_v61  ;;  %v3913_v28 = vsel %vm600_vm7, %v597_v61, %v599_v27  ;;  %vm1677_vm7 = vcmask 400384  }
 0x271   : > { %v738_v2 = vmul.f32 %v737_v32, %v3907_v15  ;;  %v733_v25 = vmul.f32 %v732_v4, %v3907_v15  ;;  %v739_v5 = vmul.f32 %v737_v32, %v3913_v28  ;;  %v734_v37 = vmul.f32 %v732_v4, %v3913_v28 }
 0x272   : > { %v1082_v27 = vmul.f32 %v1081_v35, %v3907_v15  ;;  %v1083_v32 = vmul.f32 %v1081_v35, %v3913_v28  ;;  %v2092_v4 = vmul.f32 %v3918_v51, %v3883_v0  ;;  %v1077_v30 = vmul.f32 %v1076_v3, %v3907_v15 }
 0x273   : > { %v744_v24 = vrot.slane %v738_v2, 1  ;;  %v745_v10 = vrot.slane %v739_v5, 1  ;;  %v635_v2 = vmul.f32 %v3922_v38, %v3913_v28  ;;  %v1420_v35 = vmul.f32 %v1419_v33, %v3907_v15 }
 0x274   : > { %v1088_v58 = vrot.slane %v1082_v27, 1  ;;  %v1089_v61 = vrot.slane %v1083_v32, 1  ;;  %v3934_v5 = vstv %s3087_s11  ;;  %s4046_s11 = sld [smem:[#allocation2 + $0x8]] }
 0x275   : > { %v750_v29 = vadd.f32 %v744_v24, %v733_v25  ;;  %v751_v11 = vadd.f32 %v745_v10, %v734_v37  ;;  %v3931_v25 = vstv %s3090_s9  ;;  %v2109_v24 = vadd.f32 %v2103_v14, %v2092_v4  ;;  %s3409_s9 = smov 123  }
 0x276   : > { %v1421_v10 = vmul.f32 %v1419_v33, %v3913_v28  ;;  %v689_v9 = vmul.f32 %v3931_v25, %v3883_v0  ;;  %v1426_v27 = vrot.slane %v1420_v35, 1  ;;  %v1415_v33 = vmul.f32 %v3891_v57, %v3907_v15 }
 0x277   : > { %1780 = vrot.lane.b32.xlu1 %v1772_v26, %s3405_s30  ;;  %756 = vrot.lane.b32.xlu0 %v750_v29, %s3402_s20  ;;  %v1078_v26 = vmul.f32 %v1076_v3, %v3913_v28  ;;  %v1094_v29 = vadd.f32 %v1088_v58, %v1077_v30  ;;  %v630_v3 = vmul.f32 %v3934_v5, %v3913_v28  ;;  %v3946_v14 = vstv %s3089_s13  ;;  %s3410_s13 = smov 122  }
 0x278   : > { %758 = vrot.lane.b32.xlu2 %v751_v11, %s3402_s20  ;;  %v641_v11 = vrot.slane %v635_v2, 1  ;;  %v1427_v4 = vrot.slane %v1421_v10, 1  ;;  %v657_v30 = vsel %vm292_vm1, %v3681_v34, %v3691_v41  ;;  %v1416_v58 = vmul.f32 %v3891_v57, %v3913_v28  ;;  %s3096_s20 = sld [smem:[#allocation2 + $0x36]] }
 0x279   : > { %v1095_v37 = vadd.f32 %v1089_v61, %v1078_v26  ;;  %v695_v26 = vrot.slane %v689_v9, 1  ;;  %v1432_v61 = vadd.f32 %v1426_v27, %v1415_v33  ;;  %v1759_v35 = vmul.f32 %v3897_v1, %v3913_v28 }
 0x27a   : > { %v647_v32 = vadd.f32 %v641_v11, %v630_v3  ;;  %v3961_v10 = vstv %s3094_s16  ;;  %v1754_v27 = vmul.f32 %v3899_v18, %v3913_v28  ;;  %vm849_vm1 = vcmask 39936   ;;  %s3411_s16 = smov 112  }
 0x27b   : > { %v776_v11 = vmul.f32 %v3961_v10, %v3907_v15  ;;  %v1765_v9 = vrot.slane %v1759_v35, 1 }
 0x27c   : > { %v662_v2 = vmul.f32 %v657_v30, %v647_v32  ;;  %v2095_v30 = vmul.f32 %v2094_v8, %v3907_v15 }
 0x27e   : > { %v2101_v35 = vrot.slane %v2095_v30, 1 }
 0x27f   : > { %2117 = vrot.lane.b32.xlu1 %v2109_v24, %s3406_s15  ;;  %1100 = vrot.lane.b32.xlu0 %v1094_v29, %s3403_s25  ;;  %v1758_v24 = vmul.f32 %v3897_v1, %v3907_v15  ;;  %v1433_v29 = vadd.f32 %v1427_v4, %v1416_v58  ;;  %v1753_v1 = vmul.f32 %v3899_v18, %v3907_v15  ;;  %v782_v4 = vrot.slane %v776_v11, 1 }
 0x280   : > { %1102 = vrot.lane.b32.xlu2 %v1095_v37, %s3403_s25  ;;  %v684_v37 = vmul.f32 %v3946_v14, %v3883_v0  ;;  %v3972_v58 = vstv %s3093_s17  ;;  %s3407_s25 = smov 126   ;;  %v3979_v18 = vstv %s3096_s20  ;;  %v2090_v11 = vmul.f32 %v3918_v51, %v3907_v15  ;;  %s3108_s17 = sld [smem:[#allocation2 + $0x3c]] }
 0x281   : > { %v1764_v3 = vrot.slane %v1758_v24, 1  ;;  %v636_v24 = vmul.f32 %v3922_v38, %v3883_v0  ;;  %s3107_s20 = sld [smem:[#allocation2 + $0xb]] }
 0x282   : > { %v701_v57 = vadd.f32 %v695_v26, %v684_v37  ;;  %v1771_v26 = vadd.f32 %v1765_v9, %v1754_v27  ;;  %v634_v37 = vmul.f32 %v3922_v38, %v3907_v15  ;;  %v2107_v27 = vadd.f32 %v2101_v35, %v2090_v11 }
 0x283   : > { %v1770_v33 = vadd.f32 %v1764_v3, %v1753_v1  ;;  %v2091_v3 = vmul.f32 %v3918_v51, %v3913_v28  ;;  %v642_v9 = vrot.slane %v636_v24, 1  ;;  %v631_v38 = vmul.f32 %v3934_v5, %v3883_v0 }
 0x284   : > { %v714_v32 = vmul.f32 %v3689_v39, %v701_v57  ;;  %v640_v30 = vrot.slane %v634_v37, 1  ;;  %v688_v37 = vmul.f32 %v3931_v25, %v3913_v28 }
 0x285   : > { %v648_v24 = vadd.f32 %v642_v9, %v631_v38  ;;  %v778_v38 = vmul.f32 %v3961_v10, %v3883_v0 }
 0x287   : > { %1438 = vrot.lane.b32.xlu0 %v1432_v61, %s3404_s26  ;;  %669 = vrot.lane.b32.xlu1 %v662_v2, %s3379_s12  ;;  %v2096_v61 = vmul.f32 %v2094_v8, %v3913_v28  ;;  %v771_v2 = vmul.f32 %v3972_v58, %v3907_v15  ;;  %v829_v8 = vmul.f32 %v3979_v18, %v3913_v28 }
 0x288   : > { %1440 = vrot.lane.b32.xlu2 %v1433_v29, %s3404_s26  ;;  %s3097_s26 = sld [smem:[#allocation2 + $0x6]] }
 0x289   : > { %v788_v29 = vadd.f32 %v782_v4, %v771_v2  ;;  %v2102_v57 = vrot.slane %v2096_v61, 1  ;;  %v3993_v4 = vstv %s3098_s21  ;;  %v629_v61 = vmul.f32 %v3934_v5, %v3907_v15  ;;  %s3412_s21 = smov 111  }
 0x28a   : > { %v882_v2 = vmul.f32 %v3993_v4, %v3883_v0  ;;  %v850_v5 = vsel %vm849_vm1, %v3699_v44, %v3713_v48  ;;  %vm866_vm1 = vcmask 1006592  }
 0x28b   : > { %v802_v1 = vmul.f32 %v3703_v45, %v788_v29  ;;  %v687_v29 = vmul.f32 %v3931_v25, %v3907_v15 }
 0x28c   : > { %v888_v11 = vrot.slane %v882_v2, 1  ;;  %v777_v2 = vmul.f32 %v3961_v10, %v3913_v28 }
 0x28f   : > { %1776 = vrot.lane.b32.xlu0 %v1770_v33, %s3405_s30  ;;  %722 = vrot.lane.b32.xlu1 %v714_v32, %s3407_s25  ;;  %v835_v32 = vrot.slane %v829_v8, 1  ;;  %v3995_v33 = vstv %s3095_s23  ;;  %v646_v8 = vadd.f32 %v640_v30, %v629_v61  ;;  %v682_v30 = vmul.f32 %v3946_v14, %v3907_v15  ;;  %s3110_s23 = sld [smem:[#allocation2 + $0x3d]] }
 0x290   : > { %1778 = vrot.lane.b32.xlu2 %v1771_v26, %s3405_s30  ;;  %v2108_v26 = vadd.f32 %v2102_v57, %v2091_v3  ;;  %v824_v51 = vmul.f32 %v3995_v33, %v3913_v28  ;;  %s3099_s30 = sld [smem:[#allocation2 + $0x7]]  ;;  %v4012_v57 = vstv %s3097_s26  ;;  %v663_v3 = vmul.f32 %v3691_v41, %v648_v24 }
 0x291   : > { %v877_v25 = vmul.f32 %v4012_v57, %v3883_v0  ;;  %s3109_s26 = sld [smem:[#allocation2 + $0xc]] }
 0x292   : > { %v841_v35 = vadd.f32 %v835_v32, %v824_v51  ;;  %v4018_v32 = vstv %s3100_s27  ;;  %s3413_s27 = smov 110  }
 0x293   : > { %v932_v41 = vmul.f32 %v4018_v32, %v3907_v15  ;;  %v894_v51 = vadd.f32 %v888_v11, %v877_v25 }
 0x294   : > { %v855_v9 = vmul.f32 %v850_v5, %v841_v35  ;;  %v708_v35 = vsel %vm321_vm2, %v3671_v21, %v3689_v39  ;;  %vm1001_vm2 = vcmask 138240  }
 0x295   : > { %v908_v5 = vmul.f32 %v3711_v47, %v894_v51 }
 0x297   : > { %2113 = vrot.lane.b32.xlu0 %v2107_v27, %s3406_s15  ;;  %808 = vrot.lane.b32.xlu1 %v802_v1, %s3408_s28  ;;  %v693_v1 = vrot.slane %v687_v29, 1  ;;  %v661_v27 = vmul.f32 %v3681_v34, %v646_v8  ;;  %v683_v34 = vmul.f32 %v3946_v14, %v3913_v28  ;;  %v4035_v29 = vstv %s3099_s30  ;;  %s3414_s30 = smov 108  }
 0x298   : > { %2115 = vrot.lane.b32.xlu2 %v2108_v26, %s3406_s15  ;;  %v694_v26 = vrot.slane %v688_v37, 1  ;;  %v938_v8 = vrot.slane %v932_v41, 1  ;;  %v4040_v37 = vstv %s3166_s6  ;;  %v784_v14 = vrot.slane %v778_v38, 1  ;;  %s3103_s15 = sld [smem:[#allocation2 + $0x9]] }
 0x299   : > { %v699_v61 = vadd.f32 %v693_v1, %v682_v30  ;;  %v927_v10 = vmul.f32 %v4035_v29, %v3907_v15  ;;  %v2520_v39 = vmul.f32 %v4040_v37, %v3913_v28  ;;  %v2521_v25 = vmul.f32 %v4040_v37, %v3883_v0  ;;  %s3114_s6 = sld [smem:[#allocation2 + $0x3f]] }
 0x29a   : > { %v700_v24 = vadd.f32 %v694_v26, %v683_v34  ;;  %v773_v26 = vmul.f32 %v3972_v58, %v3883_v0  ;;  %v830_v30 = vmul.f32 %v3979_v18, %v3883_v0 }
 0x29b   : > { %v712_v11 = vmul.f32 %v3671_v21, %v699_v61  ;;  %v772_v21 = vmul.f32 %v3972_v58, %v3913_v28  ;;  %v944_v41 = vadd.f32 %v938_v8, %v927_v10  ;;  %v2526_v38 = vrot.slane %v2520_v39, 1 }
 0x29c   : > { %v713_v1 = vmul.f32 %v708_v35, %v700_v24  ;;  %v790_v24 = vadd.f32 %v784_v14, %v773_v26  ;;  %v828_v35 = vmul.f32 %v3979_v18, %v3907_v15  ;;  %v4087_v14 = vstv %s4046_s11  ;;  %s3118_s11 = sld [smem:[#allocation2 + $0x41]] }
 0x29d   : > { %v956_v10 = vmul.f32 %v3723_v52, %v944_v41 }
 0x29e   : > { %v804_v18 = vmul.f32 %v3676_v31, %v790_v24  ;;  %v834_v26 = vrot.slane %v828_v35, 1 }
 0x29f   : > { %671 = vrot.lane.b32.xlu0 %v663_v3, %s3379_s12  ;;  %862 = vrot.lane.b32.xlu1 %v855_v9, %s3409_s9  ;;  %v783_v3 = vrot.slane %v777_v2, 1  ;;  %v4050_v9 = vstv %s3165_s7  ;;  %v2527_v2 = vrot.slane %v2521_v25, 1  ;;  %v825_v25 = vmul.f32 %v3995_v33, %v3883_v0  ;;  %s3113_s7 = sld [smem:[#allocation2 + $0xe]] }
 0x2a0   : > { %667 = vrot.lane.b32.xlu2 %v661_v27, %s3379_s12  ;;  %s4042_s12 = sld [smem:[#allocation2 + $0x3a]]  ;;  %v4054_v27 = vstv %s3102_s8  ;;  %v2515_v34 = vmul.f32 %v4050_v9, %v3913_v28  ;;  %v2516_v58 = vmul.f32 %v4050_v9, %v3883_v0  ;;  %s3415_s8 = smov 107  }
 0x2a1   : > { %v789_v51 = vadd.f32 %v783_v3, %v772_v21  ;;  %v983_v61 = vmul.f32 %v4054_v27, %v3913_v28  ;;  %v836_v3 = vrot.slane %v830_v30, 1  ;;  %v823_v30 = vmul.f32 %v3995_v33, %v3907_v15 }
 0x2a2   : > { %v4075_v8 = vadd.f32 %v2526_v38, %v2515_v34  ;;  %v880_v34 = vmul.f32 %v3993_v4, %v3907_v15 }
 0x2a3   : > { %v989_v39 = vrot.slane %v983_v61, 1  ;;  %v842_v41 = vadd.f32 %v836_v3, %v825_v25  ;;  %v881_v61 = vmul.f32 %v3993_v4, %v3913_v28  ;;  %v875_v4 = vmul.f32 %v4012_v57, %v3907_v15 }
 0x2a4   : > { %v886_v35 = vrot.slane %v880_v34, 1  ;;  %v933_v25 = vmul.f32 %v4018_v32, %v3913_v28 }
 0x2a5   : > { %v856_v24 = vmul.f32 %v3713_v48, %v842_v41 }
 0x2a6   : > { %v4084_v21 = vstv %s4042_s12  ;;  %s4205_s12 = sld [smem:[#allocation2 + $0xf]] }
 0x2a7   : > { %718 = vrot.lane.b32.xlu0 %v712_v11, %s3407_s25  ;;  %916 = vrot.lane.b32.xlu1 %v908_v5, %s3410_s13  ;;  %v4077_v5 = vadd.f32 %v2527_v2, %v2516_v58  ;;  %v798_v11 = vsel %vm797_vm8, %v3703_v45, %v3676_v31  ;;  %v978_v45 = vmul.f32 %v4087_v14, %v3913_v28  ;;  %v4105_v58 = vstv %s3103_s15  ;;  %s3117_s15 = sld [smem:[#allocation2 + $0x10]] }
 0x2a8   : > { %720 = vrot.lane.b32.xlu2 %v713_v1, %s3407_s25  ;;  %v803_v1 = vmul.f32 %v798_v11, %v789_v51  ;;  %v1034_v31 = vmul.f32 %v4084_v21, %v3883_v0  ;;  %v840_v51 = vadd.f32 %v834_v26, %v823_v30  ;;  %v1002_v2 = vsel %vm1001_vm2, %v3721_v50, %v3733_v56  ;;  %s3112_s25 = sld [smem:[#allocation2 + $0x3e]] }
 0x2a9   : > { %v995_v38 = vadd.f32 %v989_v39, %v978_v45  ;;  %v4117_v39 = vstv %s3108_s17  ;;  %v892_v26 = vadd.f32 %v886_v35, %v875_v4  ;;  %v934_v45 = vmul.f32 %v4018_v32, %v3883_v0  ;;  %s3122_s17 = sld [smem:[#allocation2 + $0x43]] }
 0x2aa   : > { %v1040_v33 = vrot.slane %v1034_v31, 1  ;;  %v854_v3 = vmul.f32 %v3699_v44, %v840_v51  ;;  %v876_v44 = vmul.f32 %v4012_v57, %v3913_v28  ;;  %v902_v31 = vsel %vm901_vm9, %v3684_v36, %v3711_v47 }
 0x2ab   : > { %v1007_v11 = vmul.f32 %v1002_v2, %v995_v38  ;;  %v906_v57 = vmul.f32 %v3684_v36, %v892_v26  ;;  %v939_v38 = vrot.slane %v933_v25, 1  ;;  %v4132_v51 = vstv %s3107_s20  ;;  %s3121_s20 = sld [smem:[#allocation2 + $0x12]] }
 0x2ac   : > { %v928_v47 = vmul.f32 %v4035_v29, %v3913_v28  ;;  %v4140_v32 = vstv %s3110_s23  ;;  %v929_v36 = vmul.f32 %v4035_v29, %v3883_v0  ;;  %v952_v4 = vsel %vm951_vm10, %v3723_v52, %v3697_v42  ;;  %s3124_s23 = sld [smem:[#allocation2 + $0x44]] }
 0x2ad   : > { %v4156_v25 = vstv %s3109_s26  ;;  %s3123_s26 = sld [smem:[#allocation2 + $0x13]]  ;;  %vm673_vm8 = vcmask 1039360   ;;  %vm918_vm2 = vcmask 998400   ;;  %vm1577_vm9 = vcmask 310272  }
 0x2ae   : > { %v4154_v26 = vstv %s3112_s25  ;;  %v1166_v52 = vmul.f32 %v4156_v25, %v3913_v28  ;;  %s3126_s25 = sld [smem:[#allocation2 + $0x45]]  ;;  %vm1627_vm10 = vcmask 392192  }
 0x2af   : > { %810 = vrot.lane.b32.xlu0 %v803_v1, %s3408_s28  ;;  %962 = vrot.lane.b32.xlu1 %v956_v10, %s3411_s16  ;;  %v887_v10 = vrot.slane %v881_v61, 1  ;;  %v1029_v1 = vmul.f32 %v4105_v58, %v3883_v0  ;;  %v940_v61 = vrot.slane %v934_v45, 1 }
 0x2b0   : > { %812 = vrot.lane.b32.xlu2 %v804_v18, %s3408_s28  ;;  %v1120_v18 = vmul.f32 %v4117_v39, %v3907_v15  ;;  %s3111_s28 = sld [smem:[#allocation2 + $0xd]] }
 0x2b1   : > { %v1046_v48 = vadd.f32 %v1040_v33, %v1029_v1  ;;  %v893_v30 = vadd.f32 %v887_v10, %v876_v44  ;;  %v1115_v33 = vmul.f32 %v4132_v51, %v3907_v15  ;;  %v946_v10 = vadd.f32 %v940_v61, %v929_v36 }
 0x2b2   : > { %v1126_v34 = vrot.slane %v1120_v18, 1  ;;  %v982_v1 = vmul.f32 %v4054_v27, %v3907_v15 }
 0x2b3   : > { %v1058_v41 = vmul.f32 %v3731_v55, %v1046_v48  ;;  %v907_v2 = vmul.f32 %v902_v31, %v893_v30  ;;  %v958_v45 = vmul.f32 %v3697_v42, %v946_v10  ;;  %v979_v31 = vmul.f32 %v4087_v14, %v3883_v0 }
 0x2b4   : > { %v1132_v35 = vadd.f32 %v1126_v34, %v1115_v33  ;;  %v988_v30 = vrot.slane %v982_v1, 1  ;;  %v1222_v42 = vmul.f32 %v4154_v26, %v3883_v0  ;;  %v1032_v34 = vmul.f32 %v4084_v21, %v3907_v15 }
 0x2b6   : > { %v1144_v29 = vmul.f32 %v3743_v63, %v1132_v35  ;;  %v4176_v33 = vstv %s3111_s28  ;;  %s3125_s28 = sld [smem:[#allocation2 + $0x14]] }
 0x2b7   : > { %864 = vrot.lane.b32.xlu0 %v856_v24, %s3409_s9  ;;  %1014 = vrot.lane.b32.xlu1 %v1007_v11, %s3412_s21  ;;  %v984_v24 = vmul.f32 %v4054_v27, %v3883_v0  ;;  %v945_v11 = vadd.f32 %v939_v38, %v928_v47  ;;  %v977_v27 = vmul.f32 %v4087_v14, %v3907_v15  ;;  %v1228_v47 = vrot.slane %v1222_v42, 1 }
 0x2b8   : > { %860 = vrot.lane.b32.xlu2 %v854_v3, %s3409_s9  ;;  %v1171_v3 = vmul.f32 %v4140_v32, %v3913_v28  ;;  %v1190_v14 = vsel %vm1189_vm11, %v3739_v62, %v3753_v12  ;;  %v1217_v10 = vmul.f32 %v4176_v33, %v3883_v0  ;;  %s3116_s9 = sld [smem:[#allocation2 + $0x40]]  ;;  %vm762_vm11 = vcmask 1022976  }
 0x2b9   : > { %v990_v44 = vrot.slane %v984_v24, 1  ;;  %v957_v48 = vmul.f32 %v952_v4, %v945_v11  ;;  %v994_v61 = vadd.f32 %v988_v30, %v977_v27  ;;  %v1038_v24 = vrot.slane %v1032_v34, 1 }
 0x2ba   : > { %v1177_v18 = vrot.slane %v1171_v3, 1  ;;  %v1234_v4 = vadd.f32 %v1228_v47, %v1217_v10 }
 0x2bb   : > { %v1006_v11 = vmul.f32 %v3721_v50, %v994_v61  ;;  %v1028_v50 = vmul.f32 %v4105_v58, %v3913_v28 }
 0x2be   : > { %v4217_v61 = vstv %s3116_s9  ;;  %s4358_s9 = sld [smem:[#allocation2 + $0x47]] }
 0x2bf   : > { %912 = vrot.lane.b32.xlu0 %v906_v57, %s3410_s13  ;;  %1066 = vrot.lane.b32.xlu1 %v1058_v41, %s3413_s27  ;;  %v996_v41 = vadd.f32 %v990_v44, %v979_v31  ;;  %v1183_v57 = vadd.f32 %v1177_v18, %v1166_v52  ;;  %v1122_v18 = vmul.f32 %v4117_v39, %v3883_v0 }
 0x2c0   : > { %914 = vrot.lane.b32.xlu2 %v907_v2, %s3410_s13  ;;  %v1033_v2 = vmul.f32 %v4084_v21, %v3913_v28  ;;  %v1027_v21 = vmul.f32 %v4105_v58, %v3907_v15  ;;  %v1052_v31 = vsel %vm1051_vm12, %v3706_v46, %v3731_v55  ;;  %v1246_v58 = vmul.f32 %v3751_v6, %v1234_v4  ;;  %s3416_s13 = smov 106  }
 0x2c1   : > { %v1008_v36 = vmul.f32 %v3733_v56, %v996_v41  ;;  %v1195_v35 = vmul.f32 %v1190_v14, %v1183_v57  ;;  %v4188_v56 = vstv %s3114_s6  ;;  %v4209_v41 = vstv %s3113_s7  ;;  %s3128_s6 = sld [smem:[#allocation2 + $0x46]] }
 0x2c2   : > { %v1039_v3 = vrot.slane %v1033_v2, 1  ;;  %v1270_v44 = vmul.f32 %v4188_v56, %v3907_v15  ;;  %v1128_v34 = vrot.slane %v1122_v18, 1  ;;  %v1116_v55 = vmul.f32 %v4132_v51, %v3913_v28  ;;  %s4346_s7 = sld [smem:[#allocation2 + $0x31]] }
 0x2c3   : > { %v1172_v2 = vmul.f32 %v4140_v32, %v3883_v0  ;;  %v1321_v14 = vmul.f32 %v4217_v61, %v3913_v28  ;;  %v1167_v18 = vmul.f32 %v4156_v25, %v3883_v0  ;;  %vm814_vm12 = vcmask 1014784  }
 0x2c4   : > { %v1276_v52 = vrot.slane %v1270_v44, 1  ;;  %v4236_v44 = vstv %s4205_s12  ;;  %s3421_s12 = smov 91  }
 0x2c5   : > { %v1327_v10 = vrot.slane %v1321_v14, 1 }
 0x2c7   : > { %964 = vrot.lane.b32.xlu0 %v957_v48, %s3411_s16  ;;  %1150 = vrot.lane.b32.xlu1 %v1144_v29, %s3414_s30  ;;  %v1044_v29 = vadd.f32 %v1038_v24, %v1027_v21  ;;  %v1121_v48 = vmul.f32 %v4117_v39, %v3913_v28  ;;  %v1265_v39 = vmul.f32 %v4209_v41, %v3907_v15 }
 0x2c8   : > { %966 = vrot.lane.b32.xlu2 %v958_v45, %s3411_s16  ;;  %v1045_v45 = vadd.f32 %v1039_v3, %v1028_v50  ;;  %v1178_v3 = vrot.slane %v1172_v2, 1  ;;  %s3417_s16 = smov 96  }
 0x2c9   : > { %v1056_v27 = vmul.f32 %v3706_v46, %v1044_v29  ;;  %v1127_v42 = vrot.slane %v1121_v48, 1  ;;  %v1117_v46 = vmul.f32 %v4132_v51, %v3883_v0  ;;  %v1282_v47 = vadd.f32 %v1276_v52, %v1265_v39 }
 0x2ca   : > { %v1057_v57 = vmul.f32 %v1052_v31, %v1045_v45  ;;  %v1140_v51 = vsel %vm1139_vm13, %v3743_v63, %v3715_v49  ;;  %v4238_v29 = vstv %s3118_s11  ;;  %v1316_v63 = vmul.f32 %v4236_v44, %v3913_v28  ;;  %s4368_s11 = sld [smem:[#allocation2]] }
 0x2cb   : > { %v1134_v24 = vadd.f32 %v1128_v34, %v1117_v46  ;;  %v1294_v21 = vmul.f32 %v3768_v13, %v1282_v47  ;;  %v1165_v45 = vmul.f32 %v4156_v25, %v3907_v15  ;;  %v1184_v31 = vadd.f32 %v1178_v3, %v1167_v18 }
 0x2cc   : > { %v1333_v52 = vadd.f32 %v1327_v10, %v1316_v63  ;;  %v1221_v34 = vmul.f32 %v4154_v26, %v3913_v28  ;;  %v1340_v25 = vsel %vm1339_vm14, %v3763_v53, %v3774_v23  ;;  %v1240_v18 = vsel %vm1239_vm15, %v3725_v54, %v3751_v6 }
 0x2cd   : > { %v1146_v48 = vmul.f32 %v3715_v49, %v1134_v24  ;;  %v1372_v49 = vmul.f32 %v4238_v29, %v3883_v0  ;;  %v1266_v6 = vmul.f32 %v4209_v41, %v3913_v28  ;;  %vm1018_vm13 = vcmask 908288  }
 0x2ce   : > { %v1345_v2 = vmul.f32 %v1340_v25, %v1333_v52  ;;  %v1227_v47 = vrot.slane %v1221_v34, 1  ;;  %v1322_v34 = vmul.f32 %v4217_v61, %v3883_v0  ;;  %vm1865_vm14 = vcmask 433152  }
 0x2cf   : > { %1016 = vrot.lane.b32.xlu0 %v1008_v36, %s3412_s21  ;;  %1202 = vrot.lane.b32.xlu1 %v1195_v35, %s3415_s8  ;;  %v1133_v36 = vadd.f32 %v1127_v42, %v1116_v55  ;;  %v1170_v35 = vmul.f32 %v4140_v32, %v3907_v15  ;;  %v1378_v39 = vrot.slane %v1372_v49, 1  ;;  %v1196_v55 = vmul.f32 %v3753_v12, %v1184_v31 }
 0x2d0   : > { %1012 = vrot.lane.b32.xlu2 %v1006_v11, %s3412_s21  ;;  %s3418_s21 = smov 95   ;;  %v4291_v31 = vstv %s3121_s20  ;;  %s3422_s20 = smov 90   ;;  %vm1727_vm15 = vcmask 408576  }
 0x2d1   : > { %v4172_v38 = vpop.permute.xlu1 %760  ;;  %v1145_v50 = vmul.f32 %v1140_v51, %v1133_v36  ;;  %v1176_v32 = vrot.slane %v1170_v35, 1  ;;  %v4274_v35 = vstv %s3122_s17  ;;  %s4401_s17 = sld [smem:[#allocation2 + $0x17]] }
 0x2d2   : > { %v4191_v1 = vpop.permute.xlu2 %758  ;;  %v1458_v3 = vmul.f32 %v4274_v35, %v3907_v15 }
 0x2d4   : > { %v1464_v63 = vrot.slane %v1458_v3, 1 }
 0x2d7   : > { %1062 = vrot.lane.b32.xlu0 %v1056_v27, %s3413_s27  ;;  %1254 = vrot.lane.b32.xlu1 %v1246_v58, %s3416_s13  ;;  %v1220_v58 = vmul.f32 %v4154_v26, %v3907_v15  ;;  %v1182_v27 = vadd.f32 %v1176_v32, %v1165_v45  ;;  %v1215_v26 = vmul.f32 %v4176_v33, %v3907_v15 }
 0x2d8   : > { %1064 = vrot.lane.b32.xlu2 %v1057_v57, %s3413_s27  ;;  %v4258_v57 = vstv %s3117_s15  ;;  %s3419_s27 = smov 94   ;;  %s4393_s15 = sld [smem:[#allocation2 + $0x16]] }
 0x2d9   : > { %v4201_v30 = vpop.permute.xlu1 %1104  ;;  %v1226_v46 = vrot.slane %v1220_v58, 1  ;;  %v1194_v14 = vmul.f32 %v3739_v62, %v1182_v27  ;;  %v1367_v36 = vmul.f32 %v4258_v57, %v3883_v0  ;;  %v1216_v62 = vmul.f32 %v4176_v33, %v3913_v28 }
 0x2da   : > { %v4228_v11 = vpop.permute.xlu2 %1102  ;;  %v4299_v27 = vstv %s3124_s23  ;;  %s3427_s23 = smov 74  }
 0x2db   : > { %v1384_v51 = vadd.f32 %v1378_v39, %v1367_v36  ;;  %v1232_v10 = vadd.f32 %v1226_v46, %v1215_v26  ;;  %v1233_v32 = vadd.f32 %v1227_v47, %v1216_v62  ;;  %v1509_v25 = vmul.f32 %v4299_v27, %v3913_v28 }
 0x2dc   : > { %v1320_v47 = vmul.f32 %v4217_v61, %v3907_v15  ;;  %v4319_v26 = vstv %s3126_s25  ;;  %v1328_v62 = vrot.slane %v1322_v34, 1  ;;  %v1317_v61 = vmul.f32 %v4236_v44, %v3883_v0  ;;  %s4665_s25 = sld [smem:[#allocation2 + $0x1e]] }
 0x2dd   : > { %v1396_v33 = vmul.f32 %v3770_v16, %v1384_v51  ;;  %v1244_v45 = vmul.f32 %v3725_v54, %v1232_v10  ;;  %v1245_v52 = vmul.f32 %v1240_v18, %v1233_v32  ;;  %v1267_v54 = vmul.f32 %v4209_v41, %v3883_v0 }
 0x2de   : > { %v1290_v41 = vsel %vm1289_vm0, %v3768_v13, %v3757_v17  ;;  %v1515_v51 = vrot.slane %v1509_v25, 1  ;;  %v1326_v32 = vrot.slane %v1320_v47, 1  ;;  %v1560_v13 = vmul.f32 %v4319_v26, %v3883_v0 }
 0x2df   : > { %1152 = vrot.lane.b32.xlu0 %v1145_v50, %s3414_s30  ;;  %1300 = vrot.lane.b32.xlu1 %v1294_v21, %s3417_s16  ;;  %v1271_v21 = vmul.f32 %v4188_v56, %v3913_v28  ;;  %v1272_v50 = vmul.f32 %v4188_v56, %v3883_v0  ;;  %v1453_v56 = vmul.f32 %v4291_v31, %v3907_v15 }
 0x2e0   : > { %1154 = vrot.lane.b32.xlu2 %v1146_v48, %s3414_s30  ;;  %s3420_s30 = smov 92   ;;  %v1566_v34 = vrot.slane %v1560_v13, 1 }
 0x2e1   : > { %v4233_v4 = vpop.permute.xlu1 %1442  ;;  %v1277_v49 = vrot.slane %v1271_v21, 1  ;;  %v1278_v58 = vrot.slane %v1272_v50, 1  ;;  %v1470_v39 = vadd.f32 %v1464_v63, %v1453_v56  ;;  %v4322_v21 = vstv %s3123_s26  ;;  %s4475_s26 = sld [smem:[#allocation2 + $0x4b]] }
 0x2e2   : > { %v4254_v42 = vpop.permute.xlu2 %1440  ;;  %v1504_v18 = vmul.f32 %v4322_v21, %v3913_v28  ;;  %v1370_v63 = vmul.f32 %v4238_v29, %v3907_v15 }
 0x2e3   : > { %v1482_v3 = vmul.f32 %v3780_v59, %v1470_v39 }
 0x2e4   : > { %v1376_v39 = vrot.slane %v1370_v63, 1 }
 0x2e7   : > { %1204 = vrot.lane.b32.xlu0 %v1196_v55, %s3415_s8  ;;  %1352 = vrot.lane.b32.xlu1 %v1345_v2, %s3418_s21  ;;  %v1283_v2 = vadd.f32 %v1277_v49, %v1266_v6 }
 0x2e8   : > { %1200 = vrot.lane.b32.xlu2 %v1194_v14, %s3415_s8  ;;  %v1284_v14 = vadd.f32 %v1278_v58, %v1267_v54  ;;  %v1528_v54 = vsel %vm1527_vm3, %v3776_v22, %v3786_v40  ;;  %s4353_s8 = sld [smem:[#allocation2 + $0x15]]  ;;  %vm1068_vm3 = vcmask 900096  }
 0x2e9   : > { %v4270_v24 = vpop.permute.xlu0 %756  ;;  %v4272_v12 = vpop.permute.xlu1 %1780  ;;  %v1295_v10 = vmul.f32 %v1290_v41, %v1283_v2  ;;  %v1365_v41 = vmul.f32 %v4258_v57, %v3907_v15 }
 0x2ea   : > { %v4285_v48 = vpop.permute.xlu2 %1778  ;;  %v1296_v50 = vmul.f32 %v3757_v17, %v1284_v14  ;;  %v1334_v17 = vadd.f32 %v1328_v62, %v1317_v61 }
 0x2ec   : > { %v1346_v25 = vmul.f32 %v3774_v23, %v1334_v17  ;;  %v4364_v23 = vstv %s3128_s6  ;;  %v1390_v17 = vsel %vm1389_vm5, %v3766_v60, %v3770_v16  ;;  %v1454_v16 = vmul.f32 %v4291_v31, %v3913_v28  ;;  %s4743_s6 = sld [smem:[#allocation2 + $0x53]] }
 0x2ed   : > { %vm1815_vm5 = vcmask 424960  }
 0x2ef   : > { %1250 = vrot.lane.b32.xlu0 %v1244_v45, %s3416_s13  ;;  %1404 = vrot.lane.b32.xlu1 %v1396_v33, %s3419_s27  ;;  %v1315_v33 = vmul.f32 %v4236_v44, %v3907_v15  ;;  %v1521_v45 = vadd.f32 %v1515_v51, %v1504_v18  ;;  %v4348_v44 = vstv %s3125_s28  ;;  %v1366_v51 = vmul.f32 %v4258_v57, %v3913_v28  ;;  %s3423_s28 = smov 79  }
 0x2f0   : > { %1252 = vrot.lane.b32.xlu2 %v1245_v52, %s3416_s13  ;;  %v1371_v52 = vmul.f32 %v4238_v29, %v3913_v28  ;;  %v1555_v29 = vmul.f32 %v4348_v44, %v3883_v0  ;;  %v1460_v57 = vmul.f32 %v4274_v35, %v3883_v0  ;;  %v612_v18 = vstv %s4346_s7  ;;  %s4388_s13 = sld [smem:[#allocation2 + $0x48]] }
 0x2f1   : > { %v4308_v55 = vpop.permute.xlu0 %1100  ;;  %v4310_v46 = vpop.permute.xlu1 %2117  ;;  %v1332_v56 = vadd.f32 %v1326_v32, %v1315_v33  ;;  %v1533_v2 = vmul.f32 %v1528_v54, %v1521_v45  ;;  %v4396_v54 = vstv %s4353_s8  ;;  %s4513_s7 = sld [smem:[#allocation2 + $0x4c]] }
 0x2f2   : > { %v4314_v36 = vpop.permute.xlu2 %2115  ;;  %v1377_v14 = vrot.slane %v1371_v52, 1  ;;  %v1572_v62 = vadd.f32 %v1566_v34, %v1555_v29  ;;  %v1466_v34 = vrot.slane %v1460_v57, 1  ;;  %v1510_v29 = vmul.f32 %v4299_v27, %v3883_v0  ;;  %s4517_s8 = sld [smem:[#allocation2 + $0x1a]] }
 0x2f3   : > { %v1344_v47 = vmul.f32 %v3763_v53, %v1332_v56  ;;  %v1459_v53 = vmul.f32 %v4274_v35, %v3913_v28  ;;  %v614_v56 = vmul.f32 %v612_v18, %v3913_v28 }
 0x2f4   : > { %v1383_v61 = vadd.f32 %v1377_v14, %v1366_v51  ;;  %v1584_v63 = vmul.f32 %v3782_v43, %v1572_v62 }
 0x2f5   : > { %v1465_v45 = vrot.slane %v1459_v53, 1 }
 0x2f7   : > { %1302 = vrot.lane.b32.xlu0 %v1295_v10, %s3417_s16  ;;  %1488 = vrot.lane.b32.xlu1 %v1482_v3, %s3420_s30  ;;  %v1608_v3 = vmul.f32 %v4364_v23, %v3907_v15  ;;  %v1382_v10 = vadd.f32 %v1376_v39, %v1365_v41  ;;  %v4399_v39 = vstv %s4358_s9  ;;  %v1471_v41 = vadd.f32 %v1465_v45, %v1454_v16  ;;  %s3424_s9 = smov 78  }
 0x2f8   : > { %1304 = vrot.lane.b32.xlu2 %v1296_v50, %s3417_s16  ;;  %v1659_v14 = vmul.f32 %v4399_v39, %v3913_v28 }
 0x2f9   : > { %v4338_v49 = vpop.permute.xlu0 %1438  ;;  %v4340_v58 = vpop.permute.xlu1 %669  ;;  %v1614_v52 = vrot.slane %v1608_v3, 1  ;;  %v1394_v35 = vmul.f32 %v3766_v60, %v1382_v10  ;;  %v1455_v60 = vmul.f32 %v4291_v31, %v3883_v0  ;;  %v618_v3 = vrot.slane %v614_v56, 1 }
 0x2fa   : > { %v4344_v6 = vpop.permute.xlu2 %667  ;;  %v1508_v10 = vmul.f32 %v4299_v27, %v3907_v15  ;;  %v1665_v45 = vrot.slane %v1659_v14, 1  ;;  %v613_v56 = vmul.f32 %v612_v18, %v3907_v15  ;;  %v1505_v27 = vmul.f32 %v4322_v21, %v3883_v0 }
 0x2fb   : > { %v1472_v31 = vadd.f32 %v1466_v34, %v1455_v60  ;;  %v4440_v60 = vstv %s4401_s17  ;;  %v1558_v14 = vmul.f32 %v4319_v26, %v3907_v15  ;;  %s4607_s17 = sld [smem:[#allocation2 + $0x4e]] }
 0x2fd   : > { %v1484_v16 = vmul.f32 %v3772_v19, %v1472_v31  ;;  %v3333_v31 = vld [vmem:[%s5190_s4 + $0x8] sm:$0x7f] }
 0x2ff   : > { %1354 = vrot.lane.b32.xlu0 %v1346_v25, %s3418_s21  ;;  %1540 = vrot.lane.b32.xlu1 %v1533_v2, %s3421_s12  ;;  %v1395_v25 = vmul.f32 %v1390_v17, %v1383_v61  ;;  %v1603_v2 = vmul.f32 %v4396_v54, %v3907_v15  ;;  %v1478_v61 = vsel %vm1477_vm6, %v3780_v59, %v3772_v19  ;;  %v4429_v17 = vstv %s4388_s13  ;;  %s4572_s13 = sld [smem:[#allocation2 + $0x4d]] }
 0x300   : > { %1350 = vrot.lane.b32.xlu2 %v1344_v47, %s3418_s21  ;;  %v608_v47 = vstv %s4368_s11  ;;  %s4442_s21 = sld [smem:[#allocation2 + $0x4a]]  ;;  %v1710_v59 = vmul.f32 %v4429_v17, %v3883_v0  ;;  %v1503_v19 = vmul.f32 %v4322_v21, %v3907_v15  ;;  %v1559_v21 = vmul.f32 %v4319_v26, %v3913_v28  ;;  %s3425_s11 = smov 76  }
 0x301   : > { %v4375_v50 = vpop.permute.xlu0 %1776  ;;  %v723_v32 = vpop.permute.xlu1 %722  ;;  %v1620_v62 = vadd.f32 %v1614_v52, %v1603_v2  ;;  %v610_v57 = vmul.f32 %v608_v47, %v3913_v28  ;;  %v1483_v52 = vmul.f32 %v1478_v61, %v1471_v41  ;;  %v1514_v2 = vrot.slane %v1508_v10, 1 }
 0x302   : > { %v4380_v13 = vpop.permute.xlu2 %720  ;;  %v1705_v26 = vmul.f32 %v4440_v60, %v3883_v0  ;;  %vm1206_vm6 = vcmask 875520  }
 0x303   : > { %v4384_v33 = vsel %vm724_vm4, %v4380_v13, %v723_v32  ;;  %v622_v34 = vadd.f32 %v618_v3, %v610_v57  ;;  %v1520_v61 = vadd.f32 %v1514_v2, %v1503_v19 }
 0x305   : > { %v624_v10 = vmul.f32 %v3333_v31, %v622_v34  ;;  %v5290_v34 = vld [vmem:[#allocation17_spill] sm:$0xff]  ;;  %v1532_v31 = vmul.f32 %v3776_v22, %v1520_v61  ;;  %v674_v22 = vsel %vm673_vm8, %v4344_v6, %v4340_v58  ;;  %v1610_v61 = vmul.f32 %v4364_v23, %v3883_v0 }
 0x307   : > { %1400 = vrot.lane.b32.xlu0 %v1394_v35, %s3419_s27  ;;  %1592 = vrot.lane.b32.xlu1 %v1584_v63, %s3422_s20  ;;  %v1516_v63 = vrot.slane %v1510_v29, 1  ;;  %v1632_v35 = vmul.f32 %v3790_v7, %v1620_v62  ;;  %v617_v62 = vrot.slane %v613_v56, 1 }
 0x308   : > { %1402 = vrot.lane.b32.xlu2 %v1395_v25, %s3419_s27  ;;  %v4434_v25 = vstv %s4393_s15  ;;  %s4478_s27 = sld [smem:[#allocation2 + $0x19]]  ;;  %s3426_s15 = smov 75  }
 0x309   : > { %v4417_v51 = vpop.permute.xlu0 %2113  ;;  %v4419_v53 = vpop.permute.xlu1 %808  ;;  %v1654_v18 = vmul.f32 %v4434_v25, %v3913_v28  ;;  %v1522_v29 = vadd.f32 %v1516_v63, %v1505_v27 }
 0x30a   : > { %v4423_v32 = vpop.permute.xlu2 %812 }
 0x30b   : > { %v1671_v41 = vadd.f32 %v1665_v45, %v1654_v18  ;;  %v1716_v45 = vrot.slane %v1710_v59, 1  ;;  %v1534_v2 = vmul.f32 %v3786_v40, %v1522_v29  ;;  %v1564_v18 = vrot.slane %v1558_v14, 1 }
 0x30c   : > { %v1554_v40 = vmul.f32 %v4348_v44, %v3913_v28 }
 0x30f   : > { %1490 = vrot.lane.b32.xlu0 %v1483_v52, %s3420_s30  ;;  %1638 = vrot.lane.b32.xlu1 %v1632_v35, %s3399_s10  ;;  %v609_v35 = vmul.f32 %v608_v47, %v3907_v15 }
 0x310   : > { %1492 = vrot.lane.b32.xlu2 %v1484_v16, %s3420_s30  ;;  %v1678_v16 = vsel %vm1677_vm7, %v5290_v34, %v3794_v20  ;;  %vm2014_vm7 = vcmask 531456   ;;  %s3428_s30 = smov 63  }
 0x311   : > { %v672_v3 = vpop.permute.xlu0 %671  ;;  %v4458_v57 = vpop.permute.xlu1 %862  ;;  %v1683_v59 = vmul.f32 %v1678_v16, %v1671_v41  ;;  %v621_v19 = vadd.f32 %v617_v62, %v609_v35  ;;  %v3334_v41 = vld [vmem:[%s5190_s4] sm:$0x7f]  ;;  %v5291_v16 = vld [vmem:[#allocation15_spill] sm:$0xff] }
 0x312   : > { %v675_v63 = vsel %vm673_vm8, %v4340_v58, %v672_v3  ;;  %v861_v52 = vpop.permute.xlu2 %860  ;;  %v1565_v3 = vrot.slane %v1559_v21, 1  ;;  %vm1915_vm8 = vcmask 441344  }
 0x313   : > { %v679_v56 = vadd.f32 %v675_v63, %v624_v10  ;;  %v4467_v27 = vsel %vm866_vm1, %v861_v52, %v4458_v57  ;;  %v4482_v10 = vstv %s4442_s21  ;;  %v1722_v63 = vadd.f32 %v1716_v45, %v1705_v26  ;;  %s4636_s21 = sld [smem:[#allocation2 + $0x1d]] }
 0x314   : > { %v1553_v52 = vmul.f32 %v4348_v44, %v3907_v15  ;;  %v1796_v29 = vmul.f32 %v4482_v10, %v3907_v15  ;;  %v623_v44 = vmul.f32 %v3334_v41, %v621_v19  ;;  %v1571_v58 = vadd.f32 %v1565_v3, %v1554_v40 }
 0x315   : > { %v730_v47 = vadd.f32 %v4384_v33, %v679_v56  ;;  %v1609_v33 = vmul.f32 %v4364_v23, %v3913_v28  ;;  %v1578_v26 = vsel %vm1577_vm9, %v5291_v16, %v3782_v43  ;;  %v5292_v23 = vld [vmem:[#allocation19_spill] sm:$0xff]  ;;  %v4520_v3 = vstv %s4475_s26  ;;  %s4684_s26 = sld [smem:[#allocation2 + $0x51]] }
 0x316   : > { %v1570_v14 = vadd.f32 %v1564_v18, %v1553_v52  ;;  %v678_v35 = vadd.f32 %v674_v22, %v623_v44  ;;  %v1616_v52 = vrot.slane %v1610_v61, 1  ;;  %v1583_v40 = vmul.f32 %v1578_v26, %v1571_v58 }
 0x317   : > { %1542 = vrot.lane.b32.xlu0 %v1534_v2, %s3421_s12  ;;  %1690 = vrot.lane.b32.xlu1 %v1683_v59, %s3423_s28  ;;  %v1734_v2 = vmul.f32 %v5292_v23, %v1722_v63  ;;  %v1615_v18 = vrot.slane %v1609_v33, 1  ;;  %v1802_v59 = vrot.slane %v1796_v29, 1  ;;  %v1605_v43 = vmul.f32 %v4396_v54, %v3883_v0 }
 0x318   : > { %1538 = vrot.lane.b32.xlu2 %v1532_v31, %s3421_s12  ;;  %v1582_v19 = vmul.f32 %v5291_v16, %v1570_v14  ;;  %v4523_v31 = vstv %s4478_s27  ;;  %v1604_v63 = vmul.f32 %v4396_v54, %v3913_v28  ;;  %v1660_v22 = vmul.f32 %v4399_v39, %v3883_v0  ;;  %s4555_s12 = sld [smem:[#allocation2 + $0x1b]] }
 0x319   : > { %v719_v62 = vpop.permute.xlu0 %718  ;;  %v917_v21 = vpop.permute.xlu1 %916  ;;  %v1791_v33 = vmul.f32 %v4523_v31, %v3907_v15  ;;  %v1847_v29 = vmul.f32 %v4520_v3, %v3913_v28  ;;  %v764_v14 = vsel %vm762_vm11, %v4191_v1, %v4172_v38  ;;  %v763_v54 = vsel %vm762_vm11, %v4270_v24, %v4191_v1  ;;  %s4708_s27 = sld [smem:[#allocation2 + $0x52]] }
 0x31a   : > { %v725_v6 = vsel %vm724_vm4, %v719_v62, %v4380_v13  ;;  %v4505_v45 = vpop.permute.xlu2 %914  ;;  %v1621_v41 = vadd.f32 %v1615_v18, %v1604_v63  ;;  %v768_v62 = vadd.f32 %v764_v14, %v730_v47  ;;  %v4558_v18 = vstv %s4513_s7  ;;  %s4747_s7 = sld [smem:[#allocation2 + $0x21]] }
 0x31b   : > { %v4509_v56 = vsel %vm918_vm2, %v4505_v45, %v917_v21  ;;  %v729_v13 = vadd.f32 %v725_v6, %v678_v35  ;;  %v1808_v44 = vadd.f32 %v1802_v59, %v1791_v33  ;;  %v1622_v6 = vadd.f32 %v1616_v52, %v1605_v43 }
 0x31c   : > { %v1658_v35 = vmul.f32 %v4399_v39, %v3907_v15  ;;  %v1666_v59 = vrot.slane %v1660_v22, 1  ;;  %v5294_v39 = vld [vmem:[#allocation21_spill] sm:$0xff]  ;;  %v1655_v63 = vmul.f32 %v4434_v25, %v3883_v0  ;;  %v1653_v33 = vmul.f32 %v4434_v25, %v3907_v15 }
 0x31d   : > { %v767_v21 = vadd.f32 %v763_v54, %v729_v13  ;;  %v1820_v52 = vmul.f32 %v5294_v39, %v1808_v44  ;;  %v1709_v44 = vmul.f32 %v4429_v17, %v3913_v28  ;;  %vm968_vm4 = vcmask 916480  }
 0x31e   : > { %v1664_v43 = vrot.slane %v1658_v35, 1  ;;  %v1672_v22 = vadd.f32 %v1666_v59, %v1655_v63  ;;  %v4592_v35 = vstv %s4555_s12  ;;  %vm1106_vm9 = vcmask 891904   ;;  %s3430_s12 = smov 60  }
 0x31f   : > { %1588 = vrot.lane.b32.xlu0 %v1582_v19, %s3422_s20  ;;  %1742 = vrot.lane.b32.xlu1 %v1734_v2, %s3424_s9  ;;  %v5293_v2 = vld [vmem:[#allocation16_spill] sm:$0xff]  ;;  %v1853_v19 = vrot.slane %v1847_v29, 1  ;;  %v1708_v29 = vmul.f32 %v4429_v17, %v3907_v15  ;;  %vm1156_vm11 = vcmask 883712  }
 0x320   : > { %1590 = vrot.lane.b32.xlu2 %v1583_v40, %s3422_s20  ;;  %v1628_v47 = vsel %vm1627_vm10, %v3790_v7, %v5293_v2  ;;  %v1634_v40 = vmul.f32 %v5293_v2, %v1622_v6  ;;  %s4632_s20 = sld [smem:[#allocation2 + $0x4f]] }
 0x321   : > { %v811_v61 = vpop.permute.xlu0 %810  ;;  %v4544_v58 = vpop.permute.xlu1 %962  ;;  %v1633_v13 = vmul.f32 %v1628_v47, %v1621_v41  ;;  %v1684_v47 = vmul.f32 %v3794_v20, %v1672_v22  ;;  %v1714_v17 = vrot.slane %v1708_v29, 1  ;;  %v4610_v20 = vstv %s4572_s13  ;;  %s3431_s13 = smov 59  }
 0x322   : > { %v815_v38 = vsel %vm814_vm12, %v4419_v53, %v811_v61  ;;  %v816_v16 = vsel %vm814_vm12, %v811_v61, %v4423_v32  ;;  %v4550_v1 = vpop.permute.xlu2 %966  ;;  %v4563_v32 = vstv %s4517_s8  ;;  %s3429_s8 = smov 62   ;;  %vm1356_vm12 = vcmask 777216  }
 0x323   : > { %v819_v24 = vadd.f32 %v815_v38, %v767_v21  ;;  %v820_v26 = vadd.f32 %v816_v16, %v768_v62  ;;  %v1842_v7 = vmul.f32 %v4563_v32, %v3913_v28  ;;  %v1670_v62 = vadd.f32 %v1664_v43, %v1653_v33  ;;  %v5295_v38 = vld [vmem:[#allocation24_spill] sm:$0xff]  ;;  %v5296_v16 = vld [vmem:[#allocation22_spill] sm:$0xff] }
 0x324   : > { %v1946_v43 = vmul.f32 %v4610_v20, %v3907_v15  ;;  %v1798_v33 = vmul.f32 %v4482_v10, %v3883_v0 }
 0x325   : > { %v871_v53 = vadd.f32 %v4467_v27, %v819_v24  ;;  %v1898_v27 = vmul.f32 %v4558_v18, %v3883_v0  ;;  %v1859_v14 = vadd.f32 %v1853_v19, %v1842_v7  ;;  %v1866_v24 = vsel %vm1865_vm14, %v5296_v16, %v5295_v38 }
 0x326   : > { %vm2064_vm14 = vcmask 539648  }
 0x327   : > { %1640 = vrot.lane.b32.xlu0 %v1633_v13, %s3399_s10  ;;  %1826 = vrot.lane.b32.xlu1 %v1820_v52, %s3425_s11  ;;  %v1904_v2 = vrot.slane %v1898_v27, 1  ;;  %v1871_v59 = vmul.f32 %v1866_v24, %v1859_v14  ;;  %v1893_v13 = vmul.f32 %v4592_v35, %v3883_v0  ;;  %v1703_v52 = vmul.f32 %v4440_v60, %v3907_v15 }
 0x328   : > { %1642 = vrot.lane.b32.xlu2 %v1634_v40, %s3399_s10  ;;  %s4598_s10 = sld [smem:[#allocation2 + $0x1c]]  ;;  %v1797_v40 = vmul.f32 %v4482_v10, %v3913_v28  ;;  %v1804_v24 = vrot.slane %v1798_v33, 1 }
 0x329   : > { %v865_v54 = vpop.permute.xlu0 %864  ;;  %v4581_v41 = vpop.permute.xlu1 %1014  ;;  %v1720_v63 = vadd.f32 %v1714_v17, %v1703_v52  ;;  %v4648_v17 = vstv %s4607_s17  ;;  %s3432_s17 = smov 58  }
 0x32a   : > { %v868_v21 = vsel %vm866_vm1, %v4458_v57, %v865_v54  ;;  %v1013_v25 = vpop.permute.xlu2 %1012  ;;  %v1715_v57 = vrot.slane %v1709_v44, 1  ;;  %v5297_v44 = vld [vmem:[#allocation18_spill] sm:$0xff]  ;;  %vm1256_vm1 = vcmask 867328  }
 0x32b   : > { %v872_v61 = vadd.f32 %v868_v21, %v820_v26  ;;  %v4589_v6 = vsel %vm1018_vm13, %v1013_v25, %v4581_v41  ;;  %v1682_v26 = vmul.f32 %v5290_v34, %v1670_v62  ;;  %v1910_v34 = vadd.f32 %v1904_v2, %v1893_v13  ;;  %v5298_v21 = vld [vmem:[#allocation25_spill] sm:$0xff] }
 0x32c   : > { %v1728_v62 = vsel %vm1727_vm15, %v5297_v44, %v5292_v23  ;;  %v1803_v25 = vrot.slane %v1797_v40, 1  ;;  %vm1406_vm15 = vcmask 769024  }
 0x32d   : > { %v924_v19 = vadd.f32 %v4509_v56, %v872_v61  ;;  %v1704_v56 = vmul.f32 %v4440_v60, %v3913_v28  ;;  %v1922_v10 = vmul.f32 %v5298_v21, %v1910_v34  ;;  %v1952_v61 = vrot.slane %v1946_v43, 1 }
 0x32f   : > { %1692 = vrot.lane.b32.xlu0 %v1684_v47, %s3423_s28  ;;  %1878 = vrot.lane.b32.xlu1 %v1871_v59, %s3426_s15  ;;  %v1721_v22 = vadd.f32 %v1715_v57, %v1704_v56  ;;  %v1792_v47 = vmul.f32 %v4523_v31, %v3913_v28  ;;  %v1793_v59 = vmul.f32 %v4523_v31, %v3883_v0 }
 0x330   : > { %1688 = vrot.lane.b32.xlu2 %v1682_v26, %s3423_s28  ;;  %v1848_v57 = vmul.f32 %v4520_v3, %v3883_v0  ;;  %v1996_v26 = vmul.f32 %v4648_v17, %v3913_v28  ;;  %v1846_v31 = vmul.f32 %v4520_v3, %v3907_v15  ;;  %s4712_s28 = sld [smem:[#allocation2 + $0x20]] }
 0x331   : > { %v913_v7 = vpop.permute.xlu0 %912  ;;  %v1067_v27 = vpop.permute.xlu1 %1066  ;;  %v1733_v2 = vmul.f32 %v1728_v62, %v1721_v22  ;;  %v1809_v13 = vadd.f32 %v1803_v25, %v1792_v47  ;;  %v1810_v40 = vadd.f32 %v1804_v24, %v1793_v59  ;;  %v5299_v22 = vld [vmem:[#allocation20_spill] sm:$0xff]  ;;  %v1896_v47 = vmul.f32 %v4558_v18, %v3907_v15 }
 0x332   : > { %v919_v60 = vsel %vm918_vm2, %v913_v7, %v4505_v45  ;;  %v4623_v29 = vpop.permute.xlu2 %1064  ;;  %v1732_v45 = vmul.f32 %v5297_v44, %v1720_v63  ;;  %v4670_v44 = vstv %s4632_s20  ;;  %v1854_v62 = vrot.slane %v1848_v57, 1  ;;  %s3433_s20 = smov 47  }
 0x333   : > { %v923_v14 = vadd.f32 %v919_v60, %v871_v53  ;;  %v4627_v54 = vsel %vm1068_vm3, %v4623_v29, %v1067_v27  ;;  %v4639_v53 = vstv %s4598_s10  ;;  %v1816_v60 = vsel %vm1815_vm5, %v5294_v39, %v5299_v22  ;;  %s4837_s10 = sld [smem:[#allocation2 + $0x55]] }
 0x334   : > { %v1941_v23 = vmul.f32 %v4639_v53, %v3907_v15  ;;  %v1821_v25 = vmul.f32 %v1816_v60, %v1809_v13  ;;  %v1852_v24 = vrot.slane %v1846_v31, 1  ;;  %v1902_v60 = vrot.slane %v1896_v47, 1 }
 0x335   : > { %vm1965_vm2 = vcmask 523264   ;;  %vm1544_vm5 = vcmask 744448  }
 0x336   : > { %v1958_v52 = vadd.f32 %v1952_v61, %v1941_v23  ;;  %v5300_v61 = vld [vmem:[#allocation27_spill] sm:$0xff] }
 0x337   : > { %1738 = vrot.lane.b32.xlu0 %v1732_v45, %s3424_s9  ;;  %1930 = vrot.lane.b32.xlu1 %v1922_v10, %s3427_s23  ;;  %v2002_v10 = vrot.slane %v1996_v26, 1  ;;  %v4675_v45 = vstv %s4636_s21  ;;  %v1897_v26 = vmul.f32 %v4558_v18, %v3913_v28  ;;  %s3434_s21 = smov 82  }
 0x338   : > { %1740 = vrot.lane.b32.xlu2 %v1733_v2, %s3424_s9  ;;  %v1970_v3 = vmul.f32 %v5300_v61, %v1958_v52  ;;  %v1991_v39 = vmul.f32 %v4675_v45, %v3913_v28  ;;  %s4785_s9 = sld [smem:[#allocation2 + $0x22]] }
 0x339   : > { %v965_v56 = vpop.permute.xlu0 %964  ;;  %v4657_v34 = vpop.permute.xlu1 %1150 }
 0x33a   : > { %v969_v43 = vsel %vm968_vm4, %v4544_v58, %v965_v56  ;;  %v970_v63 = vsel %vm968_vm4, %v965_v56, %v4550_v1  ;;  %v4663_v7 = vpop.permute.xlu2 %1154  ;;  %v1822_v1 = vmul.f32 %v5299_v22, %v1810_v40  ;;  %v2008_v23 = vadd.f32 %v2002_v10, %v1991_v39 }
 0x33b   : > { %v973_v27 = vadd.f32 %v969_v43, %v923_v14  ;;  %v974_v33 = vadd.f32 %v970_v63, %v924_v19  ;;  %v1843_v19 = vmul.f32 %v4563_v32, %v3883_v0  ;;  %v1841_v14 = vmul.f32 %v4563_v32, %v3907_v15  ;;  %v5301_v43 = vld [vmem:[#allocation30_spill] sm:$0xff]  ;;  %v5302_v63 = vld [vmem:[#allocation28_spill] sm:$0xff] }
 0x33c   : > { %v4700_v56 = vstv %s4665_s25  ;;  %v1903_v10 = vrot.slane %v1897_v26, 1  ;;  %v5303_v26 = vld [vmem:[#allocation23_spill] sm:$0xff]  ;;  %vm2152_vm4 = vcmask 556032   ;;  %s3162_s25 = sld [smem:[#allocation2 + $0x57]] }
 0x33d   : > { %v1023_v58 = vadd.f32 %v4589_v6, %v973_v27  ;;  %v2047_v6 = vmul.f32 %v4670_v44, %v3883_v0  ;;  %v1860_v2 = vadd.f32 %v1854_v62, %v1843_v19  ;;  %v1858_v13 = vadd.f32 %v1852_v24, %v1841_v14 }
 0x33e   : > { %v2015_v27 = vsel %vm2014_vm7, %v5302_v63, %v5301_v43  ;;  %v1948_v14 = vmul.f32 %v4610_v20, %v3883_v0  ;;  %vm1594_vm7 = vcmask 736256  }
 0x33f   : > { %1828 = vrot.lane.b32.xlu0 %v1821_v25, %s3425_s11  ;;  %1976 = vrot.lane.b32.xlu1 %v1970_v3, %s3393_s29  ;;  %v2053_v22 = vrot.slane %v2047_v6, 1  ;;  %v1872_v18 = vmul.f32 %v5295_v38, %v1860_v2  ;;  %v2020_v62 = vmul.f32 %v2015_v27, %v2008_v23  ;;  %v1870_v25 = vmul.f32 %v5296_v16, %v1858_v13 }
 0x340   : > { %1830 = vrot.lane.b32.xlu2 %v1822_v1, %s3425_s11  ;;  %v1891_v3 = vmul.f32 %v4592_v35, %v3907_v15  ;;  %v4722_v38 = vstv %s4684_s26  ;;  %v1947_v16 = vmul.f32 %v4610_v20, %v3913_v28  ;;  %v1916_v13 = vsel %vm1915_vm8, %v5303_v26, %v5298_v21  ;;  %s4802_s11 = sld [smem:[#allocation2 + $0x54]] }
 0x341   : > { %v1017_v59 = vpop.permute.xlu0 %1016  ;;  %v4693_v57 = vpop.permute.xlu1 %1202  ;;  %v2133_v24 = vmul.f32 %v4722_v38, %v3907_v15  ;;  %v1943_v21 = vmul.f32 %v4639_v53, %v3883_v0  ;;  %vm1444_vm8 = vcmask 760832   ;;  %s3161_s26 = sld [smem:[#allocation2 + $0x26]] }
 0x342   : > { %v1020_v52 = vsel %vm1018_vm13, %v4581_v41, %v1017_v59  ;;  %v1201_v32 = vpop.permute.xlu2 %1200  ;;  %v1908_v19 = vadd.f32 %v1902_v60, %v1891_v3  ;;  %v1942_v60 = vmul.f32 %v4639_v53, %v3913_v28  ;;  %v1107_v53 = vsel %vm1106_vm9, %v4308_v55, %v4228_v11 }
 0x343   : > { %v1024_v40 = vadd.f32 %v1020_v52, %v974_v33  ;;  %v4704_v31 = vsel %vm1206_vm6, %v1201_v32, %v4693_v57  ;;  %v2042_v33 = vmul.f32 %v4700_v56, %v3883_v0  ;;  %v5304_v52 = vld [vmem:[#allocation31_spill] sm:$0xff]  ;;  %v1953_v32 = vrot.slane %v1947_v16, 1 }
 0x344   : > { %v1920_v27 = vmul.f32 %v5303_v26, %v1908_v19  ;;  %vm2202_vm13 = vcmask 564224  }
 0x345   : > { %v1074_v41 = vadd.f32 %v4627_v54, %v1024_v40  ;;  %v2059_v1 = vadd.f32 %v2053_v22, %v2042_v33  ;;  %v1892_v54 = vmul.f32 %v4592_v35, %v3913_v28  ;;  %v2139_v40 = vrot.slane %v2133_v24, 1 }
 0x346   : > { %v1954_v22 = vrot.slane %v1948_v14, 1  ;;  %v1997_v33 = vmul.f32 %v4648_v17, %v3883_v0  ;;  %v1959_v3 = vadd.f32 %v1953_v32, %v1942_v60  ;;  %v2045_v60 = vmul.f32 %v4670_v44, %v3907_v15 }
 0x347   : > { %1880 = vrot.lane.b32.xlu0 %v1872_v18, %s3426_s15  ;;  %2027 = vrot.lane.b32.xlu1 %v2020_v62, %s3428_s30  ;;  %v1909_v2 = vadd.f32 %v1903_v10, %v1892_v54  ;;  %v2071_v20 = vmul.f32 %v5304_v52, %v2059_v1 }
 0x348   : > { %1876 = vrot.lane.b32.xlu2 %v1870_v25, %s3426_s15  ;;  %v1108_v25 = vsel %vm1106_vm9, %v4228_v11, %v4201_v30  ;;  %v2003_v26 = vrot.slane %v1997_v33, 1  ;;  %s4864_s15 = sld [smem:[#allocation2 + $0x24]]  ;;  %vm1494_vm9 = vcmask 752640  }
 0x349   : > { %v1063_v39 = vpop.permute.xlu0 %1062  ;;  %v1255_v6 = vpop.permute.xlu1 %1254  ;;  %v1921_v18 = vmul.f32 %v1916_v13, %v1909_v2  ;;  %v1112_v24 = vadd.f32 %v1108_v25, %v1074_v41  ;;  %v4788_v41 = vstv %s4743_s6  ;;  %v2046_v25 = vmul.f32 %v4670_v44, %v3913_v28  ;;  %s3438_s6 = smov 85  }
 0x34a   : > { %v1069_v35 = vsel %vm1068_vm3, %v1063_v39, %v4623_v29  ;;  %v4735_v47 = vpop.permute.xlu2 %1252  ;;  %v4750_v29 = vstv %s4708_s27  ;;  %v1960_v39 = vadd.f32 %v1954_v22, %v1943_v21  ;;  %v1992_v22 = vmul.f32 %v4675_v45, %v3883_v0  ;;  %s3435_s27 = smov 46  }
 0x34b   : > { %v1073_v23 = vadd.f32 %v1069_v35, %v1023_v58  ;;  %v4739_v59 = vsel %vm1256_vm1, %v4735_v47, %v1255_v6  ;;  %v4753_v58 = vstv %s4712_s28  ;;  %v2184_v10 = vmul.f32 %v4750_v29, %v3913_v28  ;;  %v5305_v35 = vld [vmem:[#allocation26_spill] sm:$0xff]  ;;  %s3436_s28 = smov 45  }
 0x34c   : > { %v2128_v62 = vmul.f32 %v4753_v58, %v3907_v15  ;;  %v1995_v6 = vmul.f32 %v4648_v17, %v3907_v15  ;;  %v5306_v17 = vld [vmem:[#allocation33_spill] sm:$0xff]  ;;  %v2009_v21 = vadd.f32 %v2003_v26, %v1992_v22  ;;  %v2051_v44 = vrot.slane %v2045_v60, 1 }
 0x34d   : > { %v1111_v16 = vadd.f32 %v1107_v53, %v1073_v23  ;;  %v1966_v23 = vsel %vm1965_vm2, %v5300_v61, %v5305_v35  ;;  %v2190_v13 = vrot.slane %v2184_v10, 1  ;;  %v2040_v26 = vmul.f32 %v4700_v56, %v3907_v15  ;;  %v5309_v60 = vld [vmem:[#allocation29_spill] sm:$0xff] }
 0x34e   : > { %v2145_v1 = vadd.f32 %v2139_v40, %v2128_v62  ;;  %v1972_v40 = vmul.f32 %v5305_v35, %v1960_v39  ;;  %v5308_v39 = vld [vmem:[#allocation34_spill] sm:$0xff]  ;;  %v2135_v22 = vmul.f32 %v4722_v38, %v3883_v0  ;;  %vm1306_vm3 = vcmask 785408  }
 0x34f   : > { %1926 = vrot.lane.b32.xlu0 %v1920_v27, %s3427_s23  ;;  %2079 = vrot.lane.b32.xlu1 %v2071_v20, %s3429_s8  ;;  %v1971_v20 = vmul.f32 %v1966_v23, %v1959_v3  ;;  %v2001_v27 = vrot.slane %v1995_v6, 1 }
 0x350   : > { %1928 = vrot.lane.b32.xlu2 %v1921_v18, %s3427_s23  ;;  %v2157_v32 = vmul.f32 %v5306_v17, %v2145_v1  ;;  %v1990_v18 = vmul.f32 %v4675_v45, %v3907_v15  ;;  %s3159_s23 = sld [smem:[#allocation2 + $0x25]] }
 0x351   : > { %v1153_v54 = vpop.permute.xlu0 %1152  ;;  %v4774_v19 = vpop.permute.xlu1 %1300 }
 0x352   : > { %v1157_v30 = vsel %vm1156_vm11, %v4657_v34, %v1153_v54  ;;  %v1158_v14 = vsel %vm1156_vm11, %v1153_v54, %v4663_v7  ;;  %v4780_v11 = vpop.permute.xlu2 %1304  ;;  %v4793_v7 = vstv %s4747_s7  ;;  %v2007_v53 = vadd.f32 %v2001_v27, %v1990_v18  ;;  %s3439_s7 = smov 86  }
 0x353   : > { %v1161_v55 = vadd.f32 %v1157_v30, %v1111_v16  ;;  %v1162_v2 = vadd.f32 %v1158_v14, %v1112_v24  ;;  %v2179_v61 = vmul.f32 %v4793_v7, %v3913_v28  ;;  %v4822_v16 = vstv %s4785_s9  ;;  %v5307_v24 = vld [vmem:[#allocation36_spill] sm:$0xff]  ;;  %s3441_s9 = smov 98  }
 0x354   : > { %v2203_v6 = vsel %vm2202_vm13, %v5308_v39, %v5307_v24  ;;  %v2021_v14 = vmul.f32 %v5301_v43, %v2009_v21  ;;  %v2230_v23 = vmul.f32 %v4822_v16, %v3883_v0  ;;  %v4840_v43 = vstv %s4802_s11  ;;  %s3443_s11 = smov 102  }
 0x355   : > { %v1211_v34 = vadd.f32 %v4704_v31, %v1161_v55  ;;  %v2235_v31 = vmul.f32 %v4788_v41, %v3883_v0  ;;  %v2196_v62 = vadd.f32 %v2190_v13, %v2179_v61  ;;  %v2134_v13 = vmul.f32 %v4722_v38, %v3913_v28 }
 0x356   : > { %vm1644_vm11 = vcmask 654336   ;;  %vm1744_vm13 = vcmask 637952  }
 0x357   : > { %1978 = vrot.lane.b32.xlu0 %v1971_v20, %s3393_s29  ;;  %2163 = vrot.lane.b32.xlu1 %v2157_v32, %s3430_s12  ;;  %v2241_v30 = vrot.slane %v2235_v31, 1  ;;  %v2208_v55 = vmul.f32 %v2203_v6, %v2196_v62  ;;  %v2283_v20 = vmul.f32 %v4840_v43, %v3907_v15  ;;  %v2057_v32 = vadd.f32 %v2051_v44, %v2040_v26 }
 0x358   : > { %1980 = vrot.lane.b32.xlu2 %v1972_v40, %s3393_s29  ;;  %s4828_s29 = sld [smem:[#allocation2 + $0x23]]  ;;  %v2065_v62 = vsel %vm2064_vm14, %v5309_v60, %v5304_v52  ;;  %v4876_v52 = vstv %s4837_s10  ;;  %vm1882_vm14 = vcmask 613376   ;;  %s3444_s10 = smov 44  }
 0x359   : > { %v1205_v33 = vpop.permute.xlu0 %1204  ;;  %v4811_v10 = vpop.permute.xlu1 %1352  ;;  %v2289_v38 = vrot.slane %v2283_v20, 1  ;;  %v2332_v44 = vmul.f32 %v4876_v52, %v3913_v28 }
 0x35a   : > { %v1208_v3 = vsel %vm1206_vm6, %v4693_v57, %v1205_v33  ;;  %v1351_v45 = vpop.permute.xlu2 %1350  ;;  %v2052_v57 = vrot.slane %v2046_v25, 1  ;;  %v5310_v33 = vld [vmem:[#allocation37_spill] sm:$0xff]  ;;  %vm2350_vm6 = vcmask 662528  }
 0x35b   : > { %v1212_v1 = vadd.f32 %v1208_v3, %v1162_v2  ;;  %v4819_v54 = vsel %vm1356_vm12, %v1351_v45, %v4811_v10  ;;  %v2019_v2 = vmul.f32 %v5302_v63, %v2007_v53  ;;  %v2247_v63 = vadd.f32 %v2241_v30, %v2230_v23 }
 0x35c   : > { %v2140_v53 = vrot.slane %v2134_v13, 1  ;;  %v2069_v3 = vmul.f32 %v5309_v60, %v2057_v32  ;;  %v2130_v30 = vmul.f32 %v4753_v58, %v3883_v0  ;;  %v5312_v60 = vld [vmem:[#allocation39_spill] sm:$0xff] }
 0x35d   : > { %v1262_v35 = vadd.f32 %v4739_v59, %v1212_v1  ;;  %v2041_v59 = vmul.f32 %v4700_v56, %v3913_v28  ;;  %v2259_v25 = vmul.f32 %v5310_v33, %v2247_v63  ;;  %v2129_v1 = vmul.f32 %v4753_v58, %v3913_v28 }
 0x35f   : > { %2029 = vrot.lane.b32.xlu0 %v2021_v14, %s3428_s30  ;;  %2215 = vrot.lane.b32.xlu1 %v2208_v55, %s3431_s13  ;;  %v2058_v61 = vadd.f32 %v2052_v57, %v2041_v59  ;;  %v2185_v14 = vmul.f32 %v4750_v29, %v3883_v0  ;;  %v2146_v55 = vadd.f32 %v2140_v53, %v2129_v1 }
 0x360   : > { %2025 = vrot.lane.b32.xlu2 %v2019_v2, %s3428_s30  ;;  %v2183_v59 = vmul.f32 %v4750_v29, %v3907_v15  ;;  %s3437_s30 = smov 84  }
 0x361   : > { %v1251_v40 = vpop.permute.xlu0 %1250  ;;  %v1405_v27 = vpop.permute.xlu1 %1404  ;;  %v2070_v45 = vmul.f32 %v2065_v62, %v2058_v61  ;;  %v2338_v61 = vrot.slane %v2332_v44, 1  ;;  %v5313_v44 = vld [vmem:[#allocation41_spill] sm:$0xff] }
 0x362   : > { %v1257_v56 = vsel %vm1256_vm1, %v1251_v40, %v4735_v47  ;;  %v4853_v31 = vpop.permute.xlu2 %1402  ;;  %v4867_v47 = vstv %s4828_s29  ;;  %v5311_v40 = vld [vmem:[#allocation32_spill] sm:$0xff]  ;;  %v2189_v53 = vrot.slane %v2183_v59, 1  ;;  %vm2252_vm1 = vcmask 572416   ;;  %s3164_s29 = sld [smem:[#allocation2 + $0x58]] }
 0x363   : > { %v1261_v18 = vadd.f32 %v1257_v56, %v1211_v34  ;;  %v4857_v21 = vsel %vm1406_vm15, %v4853_v31, %v1405_v27  ;;  %v2141_v34 = vrot.slane %v2135_v22, 1  ;;  %v2278_v6 = vmul.f32 %v4867_v47, %v3907_v15 }
 0x364   : > { %v2153_v27 = vsel %vm2152_vm4, %v5306_v17, %v5311_v40  ;;  %v2191_v22 = vrot.slane %v2185_v14, 1  ;;  %v2178_v17 = vmul.f32 %v4793_v7, %v3907_v15  ;;  %vm1782_vm4 = vcmask 629760  }
 0x365   : > { %v2295_v57 = vadd.f32 %v2289_v38, %v2278_v6  ;;  %v2147_v26 = vadd.f32 %v2141_v34, %v2130_v30  ;;  %v2158_v56 = vmul.f32 %v2153_v27, %v2146_v55  ;;  %v5314_v55 = vld [vmem:[#allocation40_spill] sm:$0xff] }
 0x366   : > { %v2195_v1 = vadd.f32 %v2189_v53, %v2178_v17 }
 0x367   : > { %2075 = vrot.lane.b32.xlu0 %v2069_v3, %s3429_s8  ;;  %2267 = vrot.lane.b32.xlu1 %v2259_v25, %s3432_s17  ;;  %v2306_v62 = vmul.f32 %v5312_v60, %v2295_v57  ;;  %v4900_v25 = vstv %s4864_s15  ;;  %v2351_v57 = vsel %vm2350_vm6, %v5314_v55, %v5313_v44  ;;  %vm2031_vm6 = vcmask 515072   ;;  %s3450_s15 = smov 29  }
 0x368   : > { %2077 = vrot.lane.b32.xlu2 %v2070_v45, %s3429_s8  ;;  %v2234_v45 = vmul.f32 %v4788_v41, %v3913_v28  ;;  %s3440_s8 = smov 97  }
 0x369   : > { %v1303_v2 = vpop.permute.xlu0 %1302  ;;  %v4885_v23 = vpop.permute.xlu1 %1488 }
 0x36a   : > { %v1307_v58 = vsel %vm1306_vm3, %v4774_v19, %v1303_v2  ;;  %v1308_v63 = vsel %vm1306_vm3, %v1303_v2, %v4780_v11  ;;  %v4893_v13 = vpop.permute.xlu2 %1492  ;;  %v2159_v19 = vmul.f32 %v5311_v40, %v2147_v26  ;;  %v2180_v11 = vmul.f32 %v4793_v7, %v3883_v0 }
 0x36b   : > { %v1311_v20 = vadd.f32 %v1307_v58, %v1261_v18  ;;  %v1312_v32 = vadd.f32 %v1308_v63, %v1262_v35  ;;  %v2327_v35 = vmul.f32 %v4900_v25, %v3913_v28  ;;  %v2233_v18 = vmul.f32 %v4788_v41, %v3907_v15 }
 0x36c   : > { %v2240_v63 = vrot.slane %v2234_v45, 1  ;;  %v2207_v41 = vmul.f32 %v5308_v39, %v2195_v1  ;;  %v2285_v40 = vmul.f32 %v4840_v43, %v3883_v0 }
 0x36d   : > { %v1361_v29 = vadd.f32 %v4819_v54, %v1311_v20  ;;  %v2197_v54 = vadd.f32 %v2191_v22, %v2180_v11  ;;  %v2344_v38 = vadd.f32 %v2338_v61, %v2327_v35  ;;  %v2239_v26 = vrot.slane %v2233_v18, 1 }
 0x36e   : > { %v2229_v20 = vmul.f32 %v4822_v16, %v3913_v28  ;;  %v2291_v35 = vrot.slane %v2285_v40, 1  ;;  %v2333_v18 = vmul.f32 %v4876_v52, %v3883_v0 }
 0x36f   : > { %2165 = vrot.lane.b32.xlu0 %v2158_v56, %s3430_s12  ;;  %2312 = vrot.lane.b32.xlu1 %v2306_v62, %s3387_s22  ;;  %v2209_v2 = vmul.f32 %v5307_v24, %v2197_v54  ;;  %v2356_v59 = vmul.f32 %v2351_v57, %v2344_v38  ;;  %v2284_v24 = vmul.f32 %v4840_v43, %v3913_v28  ;;  %v5315_v62 = vld [vmem:[#allocation35_spill] sm:$0xff] }
 0x370   : > { %2167 = vrot.lane.b32.xlu2 %v2159_v19, %s3430_s12  ;;  %v2246_v27 = vadd.f32 %v2240_v63, %v2229_v20  ;;  %v2253_v19 = vsel %vm2252_vm1, %v5315_v62, %v5310_v33  ;;  %v2279_v43 = vmul.f32 %v4867_v47, %v3913_v28  ;;  %v2280_v33 = vmul.f32 %v4867_v47, %v3883_v0  ;;  %s3442_s12 = smov 101  }
 0x371   : > { %v1355_v3 = vpop.permute.xlu0 %1354  ;;  %v4914_v34 = vpop.permute.xlu1 %1540  ;;  %v2290_v53 = vrot.slane %v2284_v24, 1  ;;  %v1445_v54 = vsel %vm1444_vm8, %v4338_v49, %v4254_v42  ;;  %v2331_v47 = vmul.f32 %v4876_v52, %v3907_v15  ;;  %v2328_v52 = vmul.f32 %v4900_v25, %v3883_v0 }
 0x372   : > { %v1358_v6 = vsel %vm1356_vm12, %v4811_v10, %v1355_v3  ;;  %v1539_v7 = vpop.permute.xlu2 %1538  ;;  %v2228_v10 = vmul.f32 %v4822_v16, %v3907_v15  ;;  %v2258_v17 = vmul.f32 %v2253_v19, %v2246_v27  ;;  %vm1694_vm12 = vcmask 646144  }
 0x373   : > { %v1362_v30 = vadd.f32 %v1358_v6, %v1312_v32  ;;  %v1545_v14 = vsel %vm1544_vm5, %v1539_v7, %v4914_v34  ;;  %v2296_v38 = vadd.f32 %v2290_v53, %v2279_v43  ;;  %v2297_v7 = vadd.f32 %v2291_v35, %v2280_v33 }
 0x374   : > { %vm2219_vm1 = vcmask 482304  }
 0x375   : > { %v1412_v58 = vadd.f32 %v4857_v21, %v1362_v30  ;;  %v2245_v21 = vadd.f32 %v2239_v26, %v2228_v10  ;;  %v2337_v10 = vrot.slane %v2331_v47, 1 }
 0x377   : > { %2217 = vrot.lane.b32.xlu0 %v2209_v2, %s3431_s13  ;;  %2363 = vrot.lane.b32.xlu1 %v2356_v59, %s3433_s20  ;;  %v2257_v11 = vmul.f32 %v5315_v62, %v2245_v21  ;;  %v5317_v2 = vld [vmem:[#allocation38_spill] sm:$0xff]  ;;  %v2339_v59 = vrot.slane %v2333_v18, 1 }
 0x378   : > { %2213 = vrot.lane.b32.xlu2 %v2207_v41, %s3431_s13  ;;  %v2302_v26 = vsel %vm1644_vm11, %v5312_v60, %v5317_v2  ;;  %s3163_s13 = sld [smem:[#allocation2 + $0x27]] }
 0x379   : > { %v1401_v32 = vpop.permute.xlu0 %1400  ;;  %v1593_v39 = vpop.permute.xlu1 %1592  ;;  %v2307_v63 = vmul.f32 %v2302_v26, %v2296_v38 }
 0x37a   : > { %v1407_v22 = vsel %vm1406_vm15, %v1401_v32, %v4853_v31  ;;  %v1591_v61 = vpop.permute.xlu2 %1590  ;;  %v5316_v31 = vld [vmem:[#allocation7_spill] sm:$0xff]  ;;  %vm1932_vm15 = vcmask 605184  }
 0x37b   : > { %v1411_v56 = vadd.f32 %v1407_v22, %v1361_v29  ;;  %v1596_v16 = vsel %vm1594_vm7, %v1591_v61, %v1593_v39  ;;  %v1446_v29 = vsel %vm1444_vm8, %v4254_v42, %v4233_v4  ;;  %vm2269_vm8 = vcmask 474112  }
 0x37c   : > { %v1450_v1 = vadd.f32 %v1446_v29, %v1412_v58  ;;  %v2308_v58 = vmul.f32 %v5317_v2, %v2297_v7 }
 0x37d   : > { %v1449_v45 = vadd.f32 %v1445_v54, %v1411_v56 }
 0x37f   : > { %2263 = vrot.lane.b32.xlu0 %v2257_v11, %s3432_s17  ;;  %2398 = vrot.lane.b32.xlu1 %v5316_v31, %s3434_s21  ;;  %v5318_v11 = vld [vmem:[#allocation8_spill] sm:$0xff] }
 0x380   : > { %2265 = vrot.lane.b32.xlu2 %v2258_v17, %s3432_s17  ;;  %s3179_s17 = sld [smem:[#allocation2 + $0x2f]] }
 0x381   : > { %v1491_v3 = vpop.permute.xlu0 %1490  ;;  %v1639_v6 = vpop.permute.xlu1 %1638 }
 0x382   : > { %v1495_v30 = vsel %vm1494_vm9, %v4885_v23, %v1491_v3  ;;  %v1496_v4 = vsel %vm1494_vm9, %v1491_v3, %v4893_v13  ;;  %v1643_v57 = vpop.permute.xlu2 %1642  ;;  %v2326_v23 = vmul.f32 %v4900_v25, %v3907_v15  ;;  %v2345_v13 = vadd.f32 %v2339_v59, %v2328_v52 }
 0x383   : > { %v1499_v42 = vadd.f32 %v1495_v30, %v1449_v45  ;;  %v1500_v49 = vadd.f32 %v1496_v4, %v1450_v1  ;;  %vm2169_vm9 = vcmask 490496  }
 0x384   : > { %v2343_v24 = vadd.f32 %v2337_v10, %v2326_v23  ;;  %v2357_v40 = vmul.f32 %v5313_v44, %v2345_v13 }
 0x385   : > { %v1549_v41 = vadd.f32 %v1545_v14, %v1499_v42  ;;  %v1784_v42 = vsel %vm1782_vm4, %v4285_v48, %v4272_v12 }
 0x386   : > { %v2355_v22 = vmul.f32 %v5314_v55, %v2343_v24 }
 0x387   : > { %2314 = vrot.lane.b32.xlu0 %v2307_v63, %s3387_s22 }
 0x388   : > { %2316 = vrot.lane.b32.xlu2 %v2308_v58, %s3387_s22  ;;  %s3160_s22 = sld [smem:[#allocation2 + $0x56]] }
 0x389   : > { %v1543_v20 = vpop.permute.xlu0 %1542  ;;  %v1691_v60 = vpop.permute.xlu1 %1690 }
 0x38a   : > { %v1546_v14 = vsel %vm1544_vm5, %v4914_v34, %v1543_v20  ;;  %v1689_v21 = vpop.permute.xlu2 %1688  ;;  %vm1832_vm5 = vcmask 621568  }
 0x38b   : > { %v1550_v32 = vadd.f32 %v1546_v14, %v1500_v49  ;;  %v1695_v39 = vsel %vm1694_vm12, %v1689_v21, %v1691_v60  ;;  %v1783_v49 = vsel %vm1782_vm4, %v4375_v50, %v4285_v48  ;;  %vm2538_vm4 = vcmask 695296  }
 0x38d   : > { %v1600_v27 = vadd.f32 %v1596_v16, %v1550_v32 }
 0x38f   : > { %2365 = vrot.lane.b32.xlu0 %v2357_v40, %s3433_s20 }
 0x390   : > { %2361 = vrot.lane.b32.xlu2 %v2355_v22, %s3433_s20  ;;  %s3182_s20 = sld [smem:[#allocation2 + $0x61]] }
 0x391   : > { %v1589_v25 = vpop.permute.xlu0 %1588  ;;  %v1743_v56 = vpop.permute.xlu1 %1742 }
 0x392   : > { %v1595_v62 = vsel %vm1594_vm7, %v1589_v25, %v1591_v61  ;;  %v1741_v19 = vpop.permute.xlu2 %1740  ;;  %vm2081_vm7 = vcmask 506880  }
 0x393   : > { %v1599_v34 = vadd.f32 %v1595_v62, %v1549_v41  ;;  %v1746_v53 = vsel %vm1744_vm13, %v1741_v19, %v1743_v56 }
 0x398   : > { %2396 = vrot.lane.b32.xlu2 %v5318_v11, %s3434_s21  ;;  %s3451_s21 = smov 28  }
 0x399   : > { %v1641_v44 = vpop.permute.xlu0 %1640  ;;  %v1827_v16 = vpop.permute.xlu1 %1826 }
 0x39a   : > { %v1645_v55 = vsel %vm1644_vm11, %v1639_v6, %v1641_v44  ;;  %v1646_v35 = vsel %vm1644_vm11, %v1641_v44, %v1643_v57  ;;  %v1831_v17 = vpop.permute.xlu2 %1830  ;;  %vm2367_vm11 = vcmask 384000  }
 0x39b   : > { %v1649_v43 = vadd.f32 %v1645_v55, %v1599_v34  ;;  %v1650_v33 = vadd.f32 %v1646_v35, %v1600_v27 }
 0x39d   : > { %v1699_v29 = vadd.f32 %v1695_v39, %v1649_v43 }
 0x3a1   : > { %v1693_v54 = vpop.permute.xlu0 %1692  ;;  %v1879_v61 = vpop.permute.xlu1 %1878 }
 0x3a2   : > { %v1696_v18 = vsel %vm1694_vm12, %v1691_v60, %v1693_v54  ;;  %v1877_v38 = vpop.permute.xlu2 %1876  ;;  %vm2400_vm12 = vcmask 670720  }
 0x3a3   : > { %v1700_v3 = vadd.f32 %v1696_v18, %v1650_v33  ;;  %v1883_v45 = vsel %vm1882_vm14, %v1877_v38, %v1879_v61 }
 0x3a5   : > { %v1750_v1 = vadd.f32 %v1746_v53, %v1700_v3 }
 0x3a7   : > { %v1788_v59 = vadd.f32 %v1784_v42, %v1750_v1 }
 0x3a9   : > { %v1739_v7 = vpop.permute.xlu0 %1738  ;;  %v1931_v47 = vpop.permute.xlu1 %1930 }
 0x3aa   : > { %v1745_v6 = vsel %vm1744_vm13, %v1739_v7, %v1741_v19  ;;  %v1929_v30 = vpop.permute.xlu2 %1928  ;;  %vm2455_vm13 = vcmask 367616  }
 0x3ab   : > { %v1749_v4 = vadd.f32 %v1745_v6, %v1699_v29  ;;  %v1934_v57 = vsel %vm1932_vm15, %v1929_v30, %v1931_v47 }
 0x3ad   : > { %v1787_v26 = vadd.f32 %v1783_v49, %v1749_v4 }
 0x3b1   : > { %v1829_v2 = vpop.permute.xlu0 %1828  ;;  %v1977_v63 = vpop.permute.xlu1 %1976 }
 0x3b2   : > { %v1833_v41 = vsel %vm1832_vm5, %v1827_v16, %v1829_v2  ;;  %v1834_v58 = vsel %vm1832_vm5, %v1829_v2, %v1831_v17  ;;  %v1981_v10 = vpop.permute.xlu2 %1980  ;;  %vm2588_vm5 = vcmask 703488  }
 0x3b3   : > { %v1837_v52 = vadd.f32 %v1833_v41, %v1787_v26  ;;  %v1838_v23 = vadd.f32 %v1834_v58, %v1788_v59  ;;  %v2380_v41 = vstv %s3160_s22  ;;  %s3445_s22 = smov 100  }
 0x3b4   : > { %v2383_v58 = vmul.f32 %v2380_v41, %v3883_v0 }
 0x3b5   : > { %v1887_v13 = vadd.f32 %v1883_v45, %v1837_v52 }
 0x3b9   : > { %v1881_v20 = vpop.permute.xlu0 %1880  ;;  %v2028_v60 = vpop.permute.xlu1 %2027 }
 0x3ba   : > { %v1884_v24 = vsel %vm1882_vm14, %v1879_v61, %v1881_v20  ;;  %v2026_v14 = vpop.permute.xlu2 %2025  ;;  %vm2488_vm14 = vcmask 687104  }
 0x3bb   : > { %v1888_v12 = vadd.f32 %v1884_v24, %v1838_v23  ;;  %v2032_v21 = vsel %vm2031_vm6, %v2026_v14, %v2028_v60  ;;  %v2382_v23 = vmul.f32 %v2380_v41, %v3913_v28  ;;  %v2389_v24 = vrot.slane %v2383_v58, 1  ;;  %v5323_v58 = vld [vmem:[#allocation5_spill] sm:$0xff] }
 0x3bd   : > { %v1938_v48 = vadd.f32 %v1934_v57, %v1888_v12 }
 0x3c1   : > { %v1927_v50 = vpop.permute.xlu0 %1926  ;;  %v2080_v32 = vpop.permute.xlu1 %2079 }
 0x3c2   : > { %v1933_v39 = vsel %vm1932_vm15, %v1927_v50, %v1929_v30  ;;  %v2078_v40 = vpop.permute.xlu2 %2077  ;;  %vm2505_vm15 = vcmask 359424  }
 0x3c3   : > { %v1937_v27 = vadd.f32 %v1933_v39, %v1887_v13  ;;  %v2083_v22 = vsel %vm2081_vm7, %v2078_v40, %v2080_v32  ;;  %v2430_v32 = vstv %s3162_s25  ;;  %s3167_s25 = sld [smem:[#allocation2 + $0x29]] }
 0x3c9   : > { %v1979_v25 = vpop.permute.xlu0 %1978  ;;  %v2164_v56 = vpop.permute.xlu1 %2163 }
 0x3ca   : > { %v1982_v62 = vsel %vm1965_vm2, %v1977_v63, %v1979_v25  ;;  %v1983_v19 = vsel %vm1965_vm2, %v1979_v25, %v1981_v10  ;;  %v2168_v34 = vpop.permute.xlu2 %2167  ;;  %vm2119_vm2 = vcmask 498688  }
 0x3cb   : > { %v1986_v53 = vadd.f32 %v1982_v62, %v1937_v27  ;;  %v1987_v44 = vadd.f32 %v1983_v19, %v1938_v48  ;;  %v2121_v7 = vsel %vm2119_vm2, %v4314_v36, %v4310_v46  ;;  %v2120_v47 = vsel %vm2119_vm2, %v4417_v51, %v4314_v36 }
 0x3cc   : > { %v2381_v36 = vmul.f32 %v2380_v41, %v3907_v15  ;;  %v2388_v48 = vrot.slane %v2382_v23, 1  ;;  %v5322_v41 = vld [vmem:[#allocation13_spill] sm:$0xff]  ;;  %vm2555_vm2 = vcmask 351232  }
 0x3cd   : > { %v2036_v16 = vadd.f32 %v2032_v21, %v1986_v53  ;;  %v2433_v53 = vmul.f32 %v2430_v32, %v3883_v0 }
 0x3ce   : > { %v2387_v14 = vrot.slane %v2381_v36, 1 }
 0x3d1   : > { %v2030_v55 = vpop.permute.xlu0 %2029  ;;  %v2216_v35 = vpop.permute.xlu1 %2215 }
 0x3d2   : > { %v2033_v17 = vsel %vm2031_vm6, %v2028_v60, %v2030_v55  ;;  %v2214_v43 = vpop.permute.xlu2 %2213  ;;  %v2375_v60 = vstv %s3159_s23  ;;  %s3168_s23 = sld [smem:[#allocation2 + $0x5a]]  ;;  %vm2686_vm6 = vcmask 793600  }
 0x3d3   : > { %v2037_v33 = vadd.f32 %v2033_v17, %v1987_v44  ;;  %v2220_v29 = vsel %vm2219_vm1, %v2214_v43, %v2216_v35  ;;  %v2378_v21 = vmul.f32 %v2375_v60, %v3883_v0  ;;  %v2376_v50 = vmul.f32 %v2375_v60, %v3907_v15 }
 0x3d4   : > { %v2377_v39 = vmul.f32 %v2375_v60, %v3913_v28  ;;  %v2432_v43 = vmul.f32 %v2430_v32, %v3913_v28  ;;  %v2468_v60 = vstv %s3164_s29  ;;  %s3175_s29 = sld [smem:[#allocation2 + $0x2d]] }
 0x3d5   : > { %v2087_v54 = vadd.f32 %v2083_v22, %v2037_v33  ;;  %v2393_v22 = vadd.f32 %v2387_v14, %v2376_v50  ;;  %v2425_v33 = vstv %s3161_s26  ;;  %v2469_v14 = vmul.f32 %v2468_v60, %v3907_v15  ;;  %s3170_s26 = sld [smem:[#allocation2 + $0x5b]] }
 0x3d6   : > { %v2394_v19 = vadd.f32 %v2388_v48, %v2377_v39  ;;  %v2470_v48 = vmul.f32 %v2468_v60, %v3913_v28 }
 0x3d7   : > { %v2125_v4 = vadd.f32 %v2121_v7, %v2087_v54 }
 0x3d9   : > { %v2076_v61 = vpop.permute.xlu0 %2075  ;;  %v2268_v18 = vpop.permute.xlu1 %2267 }
 0x3da   : > { %v2082_v38 = vsel %vm2081_vm7, %v2076_v61, %v2078_v40  ;;  %v2266_v3 = vpop.permute.xlu2 %2265  ;;  %v2395_v40 = vadd.f32 %v2389_v24, %v2378_v21  ;;  %v2428_v61 = vmul.f32 %v2425_v33, %v3883_v0  ;;  %vm2824_vm7 = vcmask 818176  }
 0x3db   : > { %v2086_v45 = vadd.f32 %v2082_v38, %v2036_v16  ;;  %v2271_v1 = vsel %vm2269_vm8, %v2266_v3, %v2268_v18  ;;  %v2438_v18 = vrot.slane %v2432_v43, 1  ;;  %v3335_v43 = vld [vmem:[%s5190_s4] sm:$0x7f] }
 0x3dd   : > { %v2124_v30 = vadd.f32 %v2120_v47, %v2086_v45  ;;  %v2427_v47 = vmul.f32 %v2425_v33, %v3913_v28 }
 0x3e1   : > { %v2166_v6 = vpop.permute.xlu0 %2165  ;;  %v2313_v57 = vpop.permute.xlu1 %2312 }
 0x3e2   : > { %v2170_v42 = vsel %vm2169_vm9, %v2164_v56, %v2166_v6  ;;  %v2171_v49 = vsel %vm2169_vm9, %v2166_v6, %v2168_v34  ;;  %v2317_v2 = vpop.permute.xlu2 %2316  ;;  %vm2605_vm9 = vcmask 343040  }
 0x3e3   : > { %v2174_v26 = vadd.f32 %v2170_v42, %v2124_v30  ;;  %v2175_v59 = vadd.f32 %v2171_v49, %v2125_v4  ;;  %v2444_v42 = vadd.f32 %v2438_v18, %v2427_v47 }
 0x3e5   : > { %v2224_v63 = vadd.f32 %v2220_v29, %v2174_v26  ;;  %v2439_v29 = vrot.slane %v2433_v53, 1 }
 0x3e7   : > { %v2445_v7 = vadd.f32 %v2439_v29, %v2428_v61  ;;  %v5326_v29 = vld [vmem:[#allocation6_spill] sm:$0xff]  ;;  %v2519_v61 = vmul.f32 %v4040_v37, %v3907_v15  ;;  %v2568_v37 = vstv %s3168_s23  ;;  %s3453_s23 = smov 26  }
 0x3e9   : > { %v2218_v46 = vpop.permute.xlu0 %2217  ;;  %v2364_v10 = vpop.permute.xlu1 %2363 }
 0x3ea   : > { %v2221_v51 = vsel %vm2219_vm1, %v2216_v35, %v2218_v46  ;;  %v2362_v52 = vpop.permute.xlu2 %2361  ;;  %v2431_v35 = vmul.f32 %v2430_v32, %v3907_v15  ;;  %vm2874_vm1 = vcmask 826368  }
 0x3eb   : > { %v2225_v13 = vadd.f32 %v2221_v51, %v2175_v59  ;;  %v2368_v20 = vsel %vm2367_vm11, %v2362_v52, %v2364_v10 }
 0x3ec   : > { %v2437_v54 = vrot.slane %v2431_v35, 1  ;;  %v5324_v35 = vld [vmem:[#allocation12_spill] sm:$0xff] }
 0x3ed   : > { %v2275_v12 = vadd.f32 %v2271_v1, %v2225_v13 }
 0x3f1   : > { %v2264_v27 = vpop.permute.xlu0 %2263  ;;  %v2399_v25 = vpop.permute.xlu1 %2398 }
 0x3f2   : > { %v2270_v56 = vsel %vm2269_vm8, %v2264_v27, %v2266_v3  ;;  %v2397_v62 = vpop.permute.xlu2 %2396  ;;  %v2407_v34 = vmul.f32 %v2399_v25, %v2395_v40  ;;  %v2426_v3 = vmul.f32 %v2425_v33, %v3907_v15  ;;  %v2475_v40 = vrot.slane %v2469_v14, 1  ;;  %v3336_v33 = vld [vmem:[%s5190_s4 + $0x8] sm:$0x7f] }
 0x3f3   : > { %v2274_v44 = vadd.f32 %v2270_v56, %v2224_v63  ;;  %v2405_v16 = vmul.f32 %v2397_v62, %v2393_v22  ;;  %v2401_v55 = vsel %vm2400_vm12, %v2397_v62, %v2399_v25  ;;  %v5319_v63 = vld [vmem:[#allocation9_spill] sm:$0xff]  ;;  %v2463_v27 = vstv %s3163_s13  ;;  %s3177_s13 = sld [smem:[#allocation2 + $0x2e]] }
 0x3f4   : > { %v2406_v17 = vmul.f32 %v2401_v55, %v2394_v19  ;;  %2415 = vrot.lane.b32.xlu1 %v2407_v34, %s3435_s27  ;;  %v2443_v4 = vadd.f32 %v2437_v54, %v2426_v3  ;;  %v2476_v22 = vrot.slane %v2470_v48, 1  ;;  %v2464_v25 = vmul.f32 %v2463_v27, %v3907_v15 }
 0x3f5   : > { %2411 = vrot.lane.b32.xlu0 %v2405_v16, %s3435_s27  ;;  %v2465_v56 = vmul.f32 %v2463_v27, %v3913_v28  ;;  %v2471_v54 = vmul.f32 %v2468_v60, %v3883_v0  ;;  %v2514_v3 = vmul.f32 %v4050_v9, %v3907_v15  ;;  %vm2924_vm8 = vcmask 834560  }
 0x3f6   : > { %2413 = vrot.lane.b32.xlu2 %v2406_v17, %s3435_s27  ;;  %v2481_v62 = vadd.f32 %v2475_v40, %v2464_v25  ;;  %v5325_v17 = vld [vmem:[#allocation14_spill] sm:$0xff]  ;;  %s3169_s27 = sld [smem:[#allocation2 + $0x2a]]  ;;  %vm2753_vm12 = vcmask 244736  }
 0x3f7   : > { %v2482_v34 = vadd.f32 %v2476_v22, %v2465_v56  ;;  %v2477_v18 = vrot.slane %v2471_v54, 1 }
 0x3f9   : > { %v2315_v38 = vpop.permute.xlu0 %2314 }
 0x3fa   : > { %v2318_v45 = vsel %vm1627_vm10, %v2313_v57, %v2315_v38  ;;  %v2319_v1 = vsel %vm1627_vm10, %v2315_v38, %v2317_v2  ;;  %v5320_v57 = vld [vmem:[#allocation11_spill] sm:$0xff]  ;;  %v5321_v2 = vld [vmem:[#allocation10_spill] sm:$0xff]  ;;  %vm2417_vm10 = vcmask 375808   ;;  %v2525_v38 = vrot.slane %v2519_v61, 1 }
 0x3fb   : > { %v2322_v6 = vadd.f32 %v2318_v45, %v2274_v44  ;;  %v2323_v30 = vadd.f32 %v2319_v1, %v2275_v12 }
 0x3fc   : > { %2453 = vrot.lane.b32.xlu1 %v2445_v7, %s3436_s28  ;;  %v2531_v7 = vadd.f32 %v2525_v38, %v2514_v3 }
 0x3fd   : > { %2449 = vrot.lane.b32.xlu0 %v2443_v4, %s3436_s28  ;;  %v2372_v46 = vadd.f32 %v2368_v20, %v2322_v6  ;;  %v2569_v4 = vmul.f32 %v2568_v37, %v3907_v15 }
 0x3fe   : > { %2451 = vrot.lane.b32.xlu2 %v2444_v42, %s3436_s28  ;;  %s3172_s28 = sld [smem:[#allocation2 + $0x5c]] }
 0x401   : > { %v2366_v49 = vpop.permute.xlu0 %2365 }
 0x402   : > { %v2369_v26 = vsel %vm2367_vm11, %v2364_v10, %v2366_v49  ;;  %vm2703_vm11 = vcmask 252928  }
 0x403   : > { %v2373_v59 = vadd.f32 %v2369_v26, %v2323_v30  ;;  %v2575_v26 = vrot.slane %v2569_v4, 1 }
 0x405   : > { %2484 = vrot.lane.b32.xlu0 %v5319_v63, %s3437_s30 }
 0x406   : > { %2486 = vrot.lane.b32.xlu2 %v5320_v57, %s3437_s30  ;;  %s3447_s30 = smov 42  }
 0x40e   : > { %2534 = vrot.lane.b32.xlu2 %v5321_v2, %s3438_s6 }
 0x416   : > { %2586 = vrot.lane.b32.xlu2 %v5322_v41, %s3439_s7 }
 0x41e   : > { %2682 = vrot.lane.b32.xlu2 %v5323_v58, %s3440_s8 }
 0x426   : > { %2734 = vrot.lane.b32.xlu2 %v5316_v31, %s3441_s9 }
 0x42e   : > { %2870 = vrot.lane.b32.xlu2 %v5321_v2, %s3442_s12  ;;  %v2571_v2 = vmul.f32 %v2568_v37, %v3883_v0 }
 0x436   : > { %2922 = vrot.lane.b32.xlu2 %v5322_v41, %s3443_s11 }
 0x450   : > { %v2414_v10 = vpop.permute.xlu2 %2413 }
 0x458   : > { %v2452_v31 = vpop.permute.xlu2 %2451 }
 0x460   : > { %v2487_v19 = vpop.permute.xlu2 %2486 }
 0x466   : > { %v2416_v36 = vpop.permute.xlu1 %2415 }
 0x467   : > { %v2412_v51 = vpop.permute.xlu0 %2411  ;;  %v2419_v52 = vsel %vm2417_vm10, %v2414_v10, %v2416_v36 }
 0x468   : > { %v2418_v23 = vsel %vm2417_vm10, %v2412_v51, %v2414_v10  ;;  %v2423_v13 = vadd.f32 %v2419_v52, %v2373_v59  ;;  %v2535_v1 = vpop.permute.xlu2 %2534  ;;  %v2563_v59 = vstv %s3167_s25  ;;  %vm2791_vm10 = vcmask 236544  }
 0x469   : > { %v2422_v20 = vadd.f32 %v2418_v23, %v2372_v46  ;;  %v2543_v6 = vmul.f32 %v2535_v1, %v2531_v7  ;;  %v2570_v46 = vmul.f32 %v2568_v37, %v3913_v28  ;;  %v2566_v14 = vmul.f32 %v2563_v59, %v3883_v0 }
 0x46b   : > { %v2576_v60 = vrot.slane %v2570_v46, 1 }
 0x46e   : > { %v2454_v24 = vpop.permute.xlu1 %2453 }
 0x46f   : > { %v2450_v12 = vpop.permute.xlu0 %2449  ;;  %v2457_v21 = vsel %vm2455_vm13, %v2452_v31, %v2454_v24  ;;  %v2613_v24 = vstv %s3169_s27  ;;  %s238_s27 = scalar_lea.vmem %s5191_s5, %s3187_s24 }
 0x470   : > { %v2456_v50 = vsel %vm2455_vm13, %v2450_v12, %v2452_v31  ;;  %v5041_v32 = vadd.f32 %v2457_v21, %v2423_v13  ;;  %v2587_v12 = vpop.permute.xlu2 %2586  ;;  %v2666_v21 = vstv %s3172_s28  ;;  %vm2841_vm13 = vcmask 228352  }
 0x471   : > { %v2460_v39 = vadd.f32 %v2456_v50, %v2422_v20  ;;  %v2577_v20 = vrot.slane %v2571_v2, 1  ;;  %v2669_v38 = vmul.f32 %v2666_v21, %v3883_v0 }
 0x473   : > { %v2583_v48 = vadd.f32 %v2577_v20, %v2566_v14 }
 0x477   : > { %v2485_v53 = vpop.permute.xlu0 %2484 }
 0x478   : > { %v2489_v44 = vsel %vm2488_vm14, %v2485_v53, %v2487_v19  ;;  %v2493_v16 = vmul.f32 %v2485_v53, %v2481_v62  ;;  %v2595_v62 = vmul.f32 %v2587_v12, %v2583_v48  ;;  %vm2891_vm14 = vcmask 220160  }
 0x479   : > { %v2494_v55 = vmul.f32 %v2489_v44, %v2482_v34 }
 0x47a   : > { %2499 = vrot.lane.b32.xlu1 %v2493_v16, %s3444_s10 }
 0x47b   : > { %2501 = vrot.lane.b32.xlu0 %v2494_v55, %s3444_s10 }
 0x482   : > { %2536 = vrot.lane.b32.xlu1 %v5324_v35, %s3438_s6  ;;  %s3171_s6 = sld [smem:[#allocation2 + $0x2b]] }
 0x483   : > { %2584 = vrot.lane.b32.xlu0 %v5325_v17, %s3439_s7  ;;  %s3174_s7 = sld [smem:[#allocation2 + $0x5d]] }
 0x489   : > { %v2716_v54 = vstv %s3174_s7 }
 0x48a   : > { %2634 = vrot.lane.b32.xlu1 %v3335_v43, %s3417_s16  ;;  %v2717_v7 = vmul.f32 %v2716_v54, %v3907_v15  ;;  %v2719_v2 = vmul.f32 %v2716_v54, %v3883_v0 }
 0x48b   : > { %2636 = vrot.lane.b32.xlu0 %v3336_v33, %s3417_s16  ;;  %s3446_s16 = smov 43   ;;  %v2615_v33 = vmul.f32 %v2613_v24, %v3913_v28 }
 0x492   : > { %2684 = vrot.lane.b32.xlu1 %v5326_v29, %s3440_s8  ;;  %s3173_s8 = sld [smem:[#allocation2 + $0x2c]]  ;;  %v2683_v29 = vpop.permute.xlu2 %2682 }
 0x493   : > { %2732 = vrot.lane.b32.xlu0 %v5318_v11, %s3441_s9  ;;  %v2466_v11 = vmul.f32 %v2463_v27, %v3883_v0  ;;  %v2667_v27 = vmul.f32 %v2666_v21, %v3907_v15  ;;  %s3176_s9 = sld [smem:[#allocation2 + $0x5e]] }
 0x495   : > { %v2483_v45 = vadd.f32 %v2477_v18, %v2466_v11  ;;  %v2673_v44 = vrot.slane %v2667_v27, 1 }
 0x497   : > { %v2495_v47 = vmul.f32 %v2487_v19, %v2483_v45  ;;  %v2668_v45 = vmul.f32 %v2666_v21, %v3913_v28 }
 0x499   : > { %v2674_v4 = vrot.slane %v2668_v45, 1 }
 0x49a   : > { %2820 = vrot.lane.b32.xlu1 %v5319_v63, %s3445_s22  ;;  %v2564_v63 = vmul.f32 %v2563_v59, %v3907_v15 }
 0x49b   : > { %2822 = vrot.lane.b32.xlu0 %v5320_v57, %s3445_s22  ;;  %v2618_v57 = vstv %s3170_s26  ;;  %s3181_s22 = sld [smem:[#allocation2 + $0x30]] }
 0x49c   : > { %v2619_v41 = vmul.f32 %v2618_v57, %v3907_v15  ;;  %v2581_v10 = vadd.f32 %v2575_v26, %v2564_v63  ;;  %v2621_v40 = vmul.f32 %v2618_v57, %v3883_v0  ;;  %v2620_v56 = vmul.f32 %v2618_v57, %v3913_v28 }
 0x49d   : > { %v2711_v26 = vstv %s3173_s8 }
 0x49e   : > { %v2625_v31 = vrot.slane %v2619_v41, 1  ;;  %v2627_v53 = vrot.slane %v2621_v40, 1  ;;  %v2626_v16 = vrot.slane %v2620_v56, 1  ;;  %v2712_v57 = vmul.f32 %v2711_v26, %v3907_v15 }
 0x49f   : > { %v2713_v21 = vmul.f32 %v2711_v26, %v3913_v28  ;;  %v2761_v40 = vstv %s3175_s29 }
 0x4a0   : > { %v2632_v3 = vadd.f32 %v2626_v16, %v2615_v33  ;;  %v2762_v56 = vmul.f32 %v2761_v40, %v3907_v15 }
 0x4a2   : > { %2872 = vrot.lane.b32.xlu1 %v5324_v35, %s3442_s12  ;;  %v2661_v35 = vstv %s3171_s6  ;;  %s3448_s12 = smov 31  }
 0x4a3   : > { %2920 = vrot.lane.b32.xlu0 %v5325_v17, %s3443_s11  ;;  %v2616_v17 = vmul.f32 %v2613_v24, %v3883_v0  ;;  %v2662_v43 = vmul.f32 %v2661_v35, %v3907_v15  ;;  %v2663_v63 = vmul.f32 %v2661_v35, %v3913_v28  ;;  %s3178_s11 = sld [smem:[#allocation2 + $0x5f]] }
 0x4a5   : > { %v2633_v61 = vadd.f32 %v2627_v53, %v2616_v17  ;;  %v2679_v11 = vadd.f32 %v2673_v44, %v2662_v43 }
 0x4aa   : > { %2503 = vrot.lane.b32.xlu1 %v2495_v47, %s3444_s10  ;;  %s3180_s10 = sld [smem:[#allocation2 + $0x60]] }
 0x4ab   : > { %2549 = vrot.lane.b32.xlu0 %v2543_v6, %s3446_s16  ;;  %v2691_v6 = vmul.f32 %v2683_v29, %v2679_v11 }
 0x4b0   : > { %v2854_v33 = vstv %s3180_s10 }
 0x4ec   : > { %v2500_v30 = vpop.permute.xlu1 %2499 }
 0x4ed   : > { %v5075_v42 = vpop.permute.xlu0 %2501 }
 0x4ee   : > { %v2506_v9 = vsel %vm2505_vm15, %v2500_v30, %v5075_v42  ;;  %v2675_v30 = vrot.slane %v2669_v38, 1 }
 0x4ef   : > { %v5079_v49 = vadd.f32 %v2506_v9, %v2460_v39  ;;  %v2723_v9 = vrot.slane %v2717_v7, 1 }
 0x4f4   : > { %v2537_v58 = vpop.permute.xlu1 %2536 }
 0x4f5   : > { %v2539_v36 = vsel %vm2538_vm4, %v2535_v1, %v2537_v58  ;;  %v2545_v51 = vmul.f32 %v2537_v58, %v4077_v5  ;;  %v2585_v52 = vpop.permute.xlu0 %2584  ;;  %v2614_v5 = vmul.f32 %v2613_v24, %v3907_v15  ;;  %v2725_v24 = vrot.slane %v2719_v2, 1 }
 0x4f6   : > { %v2544_v23 = vmul.f32 %v2539_v36, %v4075_v8  ;;  %v2593_v13 = vmul.f32 %v2585_v52, %v2581_v10  ;;  %v2565_v8 = vmul.f32 %v2563_v59, %v3913_v28  ;;  %v2589_v50 = vsel %vm2588_vm5, %v2585_v52, %v2587_v12 }
 0x4f7   : > { %2553 = vrot.lane.b32.xlu1 %v2545_v51, %s3446_s16  ;;  %v2631_v39 = vadd.f32 %v2625_v31, %v2614_v5  ;;  %v2664_v59 = vmul.f32 %v2661_v35, %v3883_v0  ;;  %v2680_v10 = vadd.f32 %v2674_v4, %v2663_v63  ;;  %v2718_v36 = vmul.f32 %v2716_v54, %v3913_v28  ;;  %v2735_v5 = vpop.permute.xlu2 %2734 }
 0x4f8   : > { %2599 = vrot.lane.b32.xlu0 %v2593_v13, %s3447_s30  ;;  %2551 = vrot.lane.b32.xlu2 %v2544_v23, %s3446_s16  ;;  %v2582_v22 = vadd.f32 %v2576_v60, %v2565_v8  ;;  %v2729_v51 = vadd.f32 %v2723_v9, %v2712_v57  ;;  %v2766_v13 = vstv %s3176_s9  ;;  %v2714_v12 = vmul.f32 %v2711_v26, %v3883_v0  ;;  %s3452_s16 = smov 27  }
 0x4f9   : > { %v2681_v41 = vadd.f32 %v2675_v30, %v2664_v59  ;;  %v2767_v60 = vmul.f32 %v2766_v13, %v3907_v15  ;;  %v2724_v14 = vrot.slane %v2718_v36, 1  ;;  %v2768_v44 = vmul.f32 %v2766_v13, %v3913_v28 }
 0x4fa   : > { %v2594_v34 = vmul.f32 %v2589_v50, %v2582_v22  ;;  %v2731_v48 = vadd.f32 %v2725_v24, %v2714_v12  ;;  %v2764_v54 = vmul.f32 %v2761_v40, %v3883_v0  ;;  %v2849_v26 = vstv %s3179_s17 }
 0x4fb   : > { %v2773_v8 = vrot.slane %v2767_v60, 1  ;;  %v2730_v27 = vadd.f32 %v2724_v14, %v2713_v21  ;;  %v2774_v43 = vrot.slane %v2768_v44, 1  ;;  %v2850_v59 = vmul.f32 %v2849_v26, %v3907_v15 }
 0x4fc   : > { %v2635_v25 = vpop.permute.xlu1 %2634  ;;  %v2904_v57 = vstv %s3182_s20  ;;  %v2856_v36 = vmul.f32 %v2854_v33, %v3913_v28  ;;  %v2852_v14 = vmul.f32 %v2849_v26, %v3883_v0  ;;  %v2851_v12 = vmul.f32 %v2849_v26, %v3913_v28 }
 0x4fd   : > { %v2642_v19 = vmul.f32 %v2635_v25, %v2631_v39  ;;  %v2637_v55 = vpop.permute.xlu0 %2636  ;;  %v2804_v39 = vstv %s3178_s11  ;;  %v2779_v53 = vadd.f32 %v2773_v8, %v2762_v56  ;;  %v2907_v21 = vmul.f32 %v2904_v57, %v3883_v0 }
 0x4fe   : > { %v2638_v18 = vsel %vm1306_vm3, %v2635_v25, %v2637_v55  ;;  %v2644_v47 = vmul.f32 %v2637_v55, %v2633_v61  ;;  %vm2736_vm3 = vcmask 801792   ;;  %v2805_v22 = vmul.f32 %v2804_v39, %v3907_v15 }
 0x4ff   : > { %2603 = vrot.lane.b32.xlu1 %v2595_v62, %s3447_s30  ;;  %v2643_v37 = vmul.f32 %v2638_v18, %v2632_v3  ;;  %v2743_v62 = vmul.f32 %v2735_v5, %v2731_v48  ;;  %v2799_v55 = vstv %s3177_s13  ;;  %v2855_v61 = vmul.f32 %v2854_v33, %v3907_v15  ;;  %v2871_v63 = vpop.permute.xlu2 %2870 }
 0x500   : > { %2648 = vrot.lane.b32.xlu0 %v2642_v19, %s3381_s14  ;;  %2601 = vrot.lane.b32.xlu2 %v2594_v34, %s3447_s30  ;;  %v2769_v19 = vmul.f32 %v2766_v13, %v3883_v0  ;;  %v2811_v16 = vrot.slane %v2805_v22, 1  ;;  %v2800_v17 = vmul.f32 %v2799_v55, %v3907_v15  ;;  %v2806_v38 = vmul.f32 %v2804_v39, %v3913_v28 }
 0x501   : > { %v2763_v3 = vmul.f32 %v2761_v40, %v3913_v28  ;;  %v2861_v30 = vrot.slane %v2855_v61, 1  ;;  %v2862_v60 = vrot.slane %v2856_v36, 1  ;;  %v2906_v40 = vmul.f32 %v2904_v57, %v3913_v28 }
 0x502   : > { %v2775_v35 = vrot.slane %v2769_v19, 1  ;;  %v2817_v18 = vadd.f32 %v2811_v16, %v2800_v17  ;;  %v2812_v4 = vrot.slane %v2806_v38, 1  ;;  %v2913_v19 = vrot.slane %v2907_v21, 1 }
 0x504   : > { %v2685_v1 = vpop.permute.xlu1 %2684 }
 0x505   : > { %v2687_v58 = vsel %vm2686_vm6, %v2683_v29, %v2685_v1  ;;  %v2733_v46 = vpop.permute.xlu0 %2732  ;;  %v2693_v23 = vmul.f32 %v2685_v1, %v2681_v41  ;;  %v2807_v29 = vmul.f32 %v2804_v39, %v3883_v0  ;;  %v2781_v1 = vadd.f32 %v2775_v35, %v2764_v54 }
 0x506   : > { %v2692_v20 = vmul.f32 %v2687_v58, %v2680_v10  ;;  %v2741_v31 = vmul.f32 %v2733_v46, %v2729_v51  ;;  %v2737_v50 = vsel %vm2736_vm3, %v2733_v46, %v2735_v5  ;;  %v2857_v58 = vmul.f32 %v2854_v33, %v3883_v0 }
 0x507   : > { %2652 = vrot.lane.b32.xlu1 %v2644_v47, %s3381_s14  ;;  %v2742_v34 = vmul.f32 %v2737_v50, %v2730_v27  ;;  %v2867_v46 = vadd.f32 %v2861_v30, %v2850_v59  ;;  %v2905_v51 = vmul.f32 %v2904_v57, %v3907_v15  ;;  %v2868_v39 = vadd.f32 %v2862_v60, %v2851_v12 }
 0x508   : > { %2650 = vrot.lane.b32.xlu2 %v2643_v37, %s3381_s14  ;;  %2697 = vrot.lane.b32.xlu0 %v2691_v6, %s3448_s12  ;;  %s3449_s14 = smov 30   ;;  %v2780_v6 = vadd.f32 %v2774_v43, %v2763_v3  ;;  %v2813_v37 = vrot.slane %v2807_v29, 1 }
 0x509   : > { %v2879_v13 = vmul.f32 %v2871_v63, %v2867_v46  ;;  %v2911_v24 = vrot.slane %v2905_v51, 1 }
 0x50c   : > { %v5110_v52 = vpop.permute.xlu1 %2820 }
 0x50d   : > { %v2829_v7 = vmul.f32 %v5110_v52, %v2817_v18  ;;  %v2823_v9 = vpop.permute.xlu0 %2822 }
 0x50e   : > { %v2825_v41 = vsel %vm2824_vm7, %v5110_v52, %v2823_v9  ;;  %v2899_v52 = vstv %s3181_s22 }
 0x50f   : > { %2701 = vrot.lane.b32.xlu1 %v2693_v23, %s3448_s12  ;;  %v2900_v5 = vmul.f32 %v2899_v52, %v3907_v15  ;;  %v2902_v15 = vmul.f32 %v2899_v52, %v3883_v0  ;;  %v2901_v44 = vmul.f32 %v2899_v52, %v3913_v28 }
 0x510   : > { %2747 = vrot.lane.b32.xlu0 %v2741_v31, %s3449_s14  ;;  %2699 = vrot.lane.b32.xlu2 %v2692_v20, %s3448_s12  ;;  %v2863_v31 = vrot.slane %v2857_v58, 1 }
 0x511   : > { %v2917_v27 = vadd.f32 %v2911_v24, %v2900_v5  ;;  %v2919_v16 = vadd.f32 %v2913_v19, %v2902_v15 }
 0x512   : > { %v2869_v8 = vadd.f32 %v2863_v31, %v2852_v14 }
 0x514   : > { %v5116_v25 = vpop.permute.xlu1 %2872 }
 0x515   : > { %v2875_v48 = vsel %vm2874_vm1, %v2871_v63, %v5116_v25  ;;  %v2921_v50 = vpop.permute.xlu0 %2920  ;;  %v2881_v22 = vmul.f32 %v5116_v25, %v2869_v8 }
 0x516   : > { %v2880_v56 = vmul.f32 %v2875_v48, %v2868_v39 }
 0x517   : > { %2751 = vrot.lane.b32.xlu1 %v2743_v62, %s3449_s14  ;;  %v2929_v62 = vmul.f32 %v2921_v50, %v2917_v27 }
 0x518   : > { %2785 = vrot.lane.b32.xlu0 %v2779_v53, %s3450_s15  ;;  %2749 = vrot.lane.b32.xlu2 %v2742_v34, %s3449_s14  ;;  %v2912_v34 = vrot.slane %v2906_v40, 1  ;;  %v2923_v53 = vpop.permute.xlu2 %2922 }
 0x519   : > { %v2931_v17 = vmul.f32 %v2923_v53, %v2919_v16 }
 0x51a   : > { %v2918_v35 = vadd.f32 %v2912_v34, %v2901_v44 }
 0x51c   : > { %v2504_v11 = vpop.permute.xlu1 %2503 }
 0x51d   : > { %v2507_v45 = vsel %vm2505_vm15, %v5075_v42, %v2504_v11  ;;  %v2802_v42 = vmul.f32 %v2799_v55, %v3883_v0  ;;  %v2550_v29 = vpop.permute.xlu0 %2549  ;;  %vm2941_vm15 = vcmask 211968  }
 0x51e   : > { %v5132_v47 = vadd.f32 %v2507_v45, %v5041_v32  ;;  %v2801_v32 = vmul.f32 %v2799_v55, %v3913_v28  ;;  %v2925_v55 = vsel %vm2924_vm8, %v2921_v50, %v2923_v53 }
 0x51f   : > { %2789 = vrot.lane.b32.xlu1 %v2781_v1, %s3450_s15  ;;  %v2819_v2 = vadd.f32 %v2813_v37, %v2802_v42  ;;  %v2930_v43 = vmul.f32 %v2925_v55, %v2918_v35 }
 0x520   : > { %2835 = vrot.lane.b32.xlu0 %v2829_v7, %s3451_s21  ;;  %2787 = vrot.lane.b32.xlu2 %v2780_v6, %s3450_s15  ;;  %v2818_v10 = vadd.f32 %v2812_v4, %v2801_v32 }
 0x521   : > { %v2831_v23 = vmul.f32 %v2823_v9, %v2819_v2 }
 0x522   : > { %v2830_v20 = vmul.f32 %v2825_v41, %v2818_v10 }
 0x527   : > { %2839 = vrot.lane.b32.xlu1 %v2831_v23, %s3451_s21 }
 0x528   : > { %2837 = vrot.lane.b32.xlu2 %v2830_v20, %s3451_s21  ;;  %2885 = vrot.lane.b32.xlu0 %v2879_v13, %s3452_s16 }
 0x52f   : > { %2889 = vrot.lane.b32.xlu1 %v2881_v22, %s3452_s16 }
 0x530   : > { %2935 = vrot.lane.b32.xlu0 %v2929_v62, %s3453_s23  ;;  %2887 = vrot.lane.b32.xlu2 %v2880_v56, %s3452_s16 }
 0x537   : > { %2939 = vrot.lane.b32.xlu1 %v2931_v17, %s3453_s23 }
 0x538   : > { %2937 = vrot.lane.b32.xlu2 %v2930_v43, %s3453_s23 }
 0x552   : > { %v2552_v25 = vpop.permute.xlu2 %2551 }
 0x553   : > { %v2556_v9 = vsel %vm2555_vm2, %v2550_v29, %v2552_v25 }
 0x554   : > { %v2560_v32 = vadd.f32 %v2556_v9, %v5079_v49 }
 0x55a   : > { %v2602_v33 = vpop.permute.xlu2 %2601 }
 0x562   : > { %v2651_v54 = vpop.permute.xlu2 %2650 }
 0x569   : > { %v2554_v61 = vpop.permute.xlu1 %2553 }
 0x56a   : > { %v2600_v18 = vpop.permute.xlu0 %2599  ;;  %v2700_v38 = vpop.permute.xlu2 %2699  ;;  %v2557_v41 = vsel %vm2555_vm2, %v2552_v25, %v2554_v61 }
 0x56b   : > { %v2606_v59 = vsel %vm2605_vm9, %v2600_v18, %v2602_v33  ;;  %v2561_v49 = vadd.f32 %v2557_v41, %v5132_v47  ;;  %v5329_v41 = vld [vmem:[#allocation48_spill] sm:$0xff] }
 0x56c   : > { %v2610_v57 = vadd.f32 %v2606_v59, %v2560_v32  ;;  %v5327_v32 = vld [vmem:[#allocation44_spill] sm:$0xff] }
 0x571   : > { %v2604_v11 = vpop.permute.xlu1 %2603 }
 0x572   : > { %v2649_v3 = vpop.permute.xlu0 %2648  ;;  %v2750_v45 = vpop.permute.xlu2 %2749  ;;  %v2607_v51 = vsel %vm2605_vm9, %v2602_v33, %v2604_v11 }
 0x573   : > { %v2654_v63 = vsel %vm1289_vm0, %v2649_v3, %v2651_v54  ;;  %v2611_v24 = vadd.f32 %v2607_v51, %v2561_v49 }
 0x574   : > { %v2658_v58 = vadd.f32 %v2654_v63, %v2610_v57  ;;  %v5328_v57 = vld [vmem:[#allocation42_spill] sm:$0xff] }
 0x579   : > { %v2653_v0 = vpop.permute.xlu1 %2652 }
 0x57a   : > { %v2698_v1 = vpop.permute.xlu0 %2697  ;;  %v2788_v6 = vpop.permute.xlu2 %2787  ;;  %v2655_v31 = vsel %vm1289_vm0, %v2651_v54, %v2653_v0 }
 0x57b   : > { %v2704_v2 = vsel %vm2703_vm11, %v2698_v1, %v2700_v38  ;;  %v2659_v5 = vadd.f32 %v2655_v31, %v2611_v24 }
 0x57c   : > { %v2708_v23 = vadd.f32 %v2704_v2, %v2658_v58 }
 0x581   : > { %v2702_v28 = vpop.permute.xlu1 %2701 }
 0x582   : > { %v2748_v7 = vpop.permute.xlu0 %2747  ;;  %v2838_v4 = vpop.permute.xlu2 %2837  ;;  %v2705_v14 = vsel %vm2703_vm11, %v2700_v38, %v2702_v28 }
 0x583   : > { %v2754_v10 = vsel %vm2753_vm12, %v2748_v7, %v2750_v45  ;;  %v2709_v47 = vadd.f32 %v2705_v14, %v2659_v5 }
 0x584   : > { %v2758_v60 = vadd.f32 %v2754_v10, %v2708_v23 }
 0x589   : > { %v2752_v37 = vpop.permute.xlu1 %2751 }
 0x58a   : > { %v2786_v30 = vpop.permute.xlu0 %2785  ;;  %v2888_v46 = vpop.permute.xlu2 %2887  ;;  %v2755_v8 = vsel %vm2753_vm12, %v2750_v45, %v2752_v37 }
 0x58b   : > { %v2792_v20 = vsel %vm2791_vm10, %v2786_v30, %v2788_v6  ;;  %v2759_v56 = vadd.f32 %v2755_v8, %v2709_v47 }
 0x58c   : > { %v2796_v12 = vadd.f32 %v2792_v20, %v2758_v60  ;;  %v5331_v20 = vld [vmem:[#allocation45_spill] sm:$0xff]  ;;  %v5332_v60 = vld [vmem:[#allocation43_spill] sm:$0xff] }
 0x591   : > { %v2790_v26 = vpop.permute.xlu1 %2789 }
 0x592   : > { %v2836_v42 = vpop.permute.xlu0 %2835  ;;  %v2793_v39 = vsel %vm2791_vm10, %v2788_v6, %v2790_v26  ;;  %v2938_v40 = vpop.permute.xlu2 %2937 }
 0x593   : > { %v2842_v52 = vsel %vm2841_vm13, %v2836_v42, %v2838_v4  ;;  %v2797_v15 = vadd.f32 %v2793_v39, %v2759_v56 }
 0x594   : > { %v2846_v48 = vadd.f32 %v2842_v52, %v2796_v12  ;;  %v5333_v52 = vld [vmem:[#allocation49_spill] sm:$0xff]  ;;  %v5334_v12 = vld [vmem:[#allocation47_spill] sm:$0xff] }
 0x599   : > { %v2840_v36 = vpop.permute.xlu1 %2839 }
 0x59a   : > { %v2886_v13 = vpop.permute.xlu0 %2885  ;;  %v2843_v19 = vsel %vm2841_vm13, %v2838_v4, %v2840_v36 }
 0x59b   : > { %v2892_v21 = vsel %vm2891_vm14, %v2886_v13, %v2888_v46  ;;  %v2847_v16 = vadd.f32 %v2843_v19, %v2797_v15 }
 0x59c   : > { %v2896_v27 = vadd.f32 %v2892_v21, %v2846_v48 }
 0x5a1   : > { %v2890_v50 = vpop.permute.xlu1 %2889 }
 0x5a2   : > { %v2936_v22 = vpop.permute.xlu0 %2935  ;;  %v2893_v53 = vsel %vm2891_vm14, %v2888_v46, %v2890_v50  ;;  %v5330_v46 = vld [vmem:[#allocation46_spill] sm:$0xff] }
 0x5a3   : > { %v2942_v62 = vsel %vm2941_vm15, %v2936_v22, %v2938_v40  ;;  %v2897_v55 = vadd.f32 %v2893_v53, %v2847_v16 }
 0x5a4   : > { %v2946_v34 = vadd.f32 %v2942_v62, %v2896_v27 }
 0x5a6   : > { %v3183_v44 = vmul.f32 -1.442695, %v2946_v34 }
 0x5a8   : > { %3325 = vpow2.f32 %v3183_v44 }
 0x5a9   : > { %v2940_v35 = vpop.permute.xlu1 %2939 }
 0x5aa   : > { %v2943_v17 = vsel %vm2941_vm15, %v2938_v40, %v2940_v35 }
 0x5ab   : > { %v2947_v43 = vadd.f32 %v2943_v17, %v2897_v55 }
 0x5ad   : > { %v3184_v25 = vmul.f32 -1.442695, %v2947_v43 }
 0x5ae   : > { %v3326_v33 = vpop.eup %3325 }
 0x5af   : > { %v2954_v29 = vadd.f32 1.0, %v3326_v33  ;;  %3327 = vpow2.f32 %v3184_v25 }
 0x5b1   : > { %3329 = vrcp.f32 %v2954_v29  ;;  %v2967_v3 = vand.u32 2147483648, %v2954_v29  ;;  %v2965_v45 = vand.u32 2147483647, %v2954_v29  ;;  %vm2961_vm4 = vweird.f32 %v2954_v29 }
 0x5b3   : > { %v2968_v7 = vor.u32 1.1754944e-38, %v2967_v3  ;;  %vm2966_vm6 = vcmp.eq.f32.partialorder %v2965_v45, 8.507059e+37 }
 0x5b5   : > { %v3328_v54 = vpop.eup %3327 }
 0x5b6   : > { %v2955_v61 = vadd.f32 1.0, %v3328_v54 }
 0x5b7   : > { %v3330_v18 = vpop.eup %3329 }
 0x5b8   : > { %v2957_v38 = vmul.f32 %v3330_v18, %v2954_v29  ;;  %3331 = vrcp.f32 %v2955_v61  ;;  %vm2962_vm0 = vweird.f32 %v3330_v18  ;;  %v2982_v26 = vand.u32 2147483648, %v2955_v61 }
 0x5b9   : > { %vm2963_vm5 = vmor %vm2961_vm4, %vm2962_vm0  ;;  %v2980_v59 = vand.u32 2147483647, %v2955_v61  ;;  %vm2976_vm7 = vweird.f32 %v2955_v61 }
 0x5ba   : > { %v2958_v11 = vsub.f32 1.0, %v2957_v38  ;;  %v2983_v51 = vor.u32 1.1754944e-38, %v2982_v26 }
 0x5bb   : > { %vm2981_vm8 = vcmp.eq.f32.partialorder %v2980_v59, 8.507059e+37 }
 0x5bc   : > { %v2959_v0 = vmul.f32 %v3330_v18, %v2958_v11 }
 0x5be   : > { %v3332_v1 = vpop.eup %3331  ;;  %v2960_v28 = vadd.f32 %v3330_v18, %v2959_v0 }
 0x5bf   : > { %v2972_v6 = vmul.f32 %v3332_v1, %v2955_v61  ;;  %vm2977_vm3 = vweird.f32 %v3332_v1 }
 0x5c0   : > { %v2964_v37 = vsel %vm2963_vm5, %v3330_v18, %v2960_v28  ;;  %vm2978_vm1 = vmor %vm2976_vm7, %vm2977_vm3 }
 0x5c1   : > { %v2969_v30 = vsel %vm2966_vm6, %v2968_v7, %v2964_v37  ;;  %v2973_v4 = vsub.f32 1.0, %v2972_v6 }
 0x5c2   : > { %v2986_v9 = vperm.slane %v2969_v30, 0 }
 0x5c3   : > { %v2974_v42 = vmul.f32 %v3332_v1, %v2973_v4 }
 0x5c4   : > { %v2988_v63 = vmul.f32 %v2986_v9, %v5327_v32  ;;  %v2990_v2 = vmul.f32 %v2986_v9, %v5328_v57  ;;  %v2992_v58 = vmul.f32 %v2986_v9, %v5329_v41  ;;  %v2994_v10 = vmul.f32 %v2986_v9, %v5330_v46 }
 0x5c5   : > { %v2975_v36 = vadd.f32 %v3332_v1, %v2974_v42 }
 0x5c6   : > { %2996 = vst [vmem:[%s238_s27] sm:$0xff] %v2988_v63 }
 0x5c7   : > { %2998 = vst [vmem:[%s238_s27 + $0x10] sm:$0xff] %v2990_v2  ;;  %v2979_v23 = vsel %vm2978_vm1, %v3332_v1, %v2975_v36 }
 0x5c8   : > { %3000 = vst [vmem:[%s238_s27 + $0x20] sm:$0xff] %v2992_v58  ;;  %v2984_v13 = vsel %vm2981_vm8, %v2983_v51, %v2979_v23 }
 0x5c9   : > { %3002 = vst [vmem:[%s238_s27 + $0x30] sm:$0xff] %v2994_v10  ;;  %v2987_v49 = vperm.slane %v2984_v13, 0 }
 0x5cb   : > { %v2989_v31 = vmul.f32 %v2987_v49, %v5331_v20  ;;  %v2991_v24 = vmul.f32 %v2987_v49, %v5332_v60  ;;  %v2993_v14 = vmul.f32 %v2987_v49, %v5333_v52  ;;  %v2995_v5 = vmul.f32 %v2987_v49, %v5334_v12 }
 0x5cd   : > { %2997 = vst [vmem:[%s238_s27 + $0x8] sm:$0xff] %v2989_v31 }
 0x5ce   : > { %2999 = vst [vmem:[%s238_s27 + $0x18] sm:$0xff] %v2991_v24 }
 0x5cf   : > { %3001 = vst [vmem:[%s238_s27 + $0x28] sm:$0xff] %v2993_v14 }
 0x5d0   : > { %3003 = vst [vmem:[%s238_s27 + $0x38] sm:$0xff] %v2995_v5 }
 0x5d1 PF: > { %s16_s18 = sadd.s32 1, %s3362_s18  }
 0x5d2   : > { %p13_p7 = scmp.ge.s32.totalorder %s16_s18, 4  }
 0x5d4   :  { %15 = sbr.rel (!%p13_p7) target bundleno = 1 (0x1), region = 75 }
 0x5d9   :  { %3025 = vsyncpa [#allocation3], 1 }
 0x5da   :  { %3027 = vsyncpa [#allocation3 + $0x1], 1 }

</bundles_post_ra>
